<compile_context>
chip_gen: v6e
topology: v6e:2x2x1
jax: 0.10.0
libtpu: 0.0.40
codegen_flags: <defaults>
</compile_context>

<pallas_src>
import math
from functools import partial

import jax
import jax.numpy as jnp
from jax import lax
from jax.experimental import pallas as pl
from jax.experimental.pallas import tpu as pltpu


def _conv_ps_kernel(x_ref, w_ref, b_ref, o_ref, *, th, wo, k, cin):
    """One (batch, row-tile) step of the kxk 'same' conv, channel-major output.

    x_ref : (th + k - 1, wo + k - 1, cin)  bf16  padded input row-tile (halo incl.)
    w_ref : (k*k, OC, cin)                 bf16  conv weight, tap-major (resident)
    b_ref : (OC, 1)                        f32   conv bias (resident)
    o_ref : (OC, th*wo)                    f32   conv output, channel-major (lane-dense)
    """
    rows = th * wo
    acc = None
    for kh in range(k):                       # unrolled at trace time: k*k small dots
        for kw in range(k):
            tap = x_ref[kh:kh + th, kw:kw + wo, :].reshape(rows, cin)   # (rows, cin)
            # (OC, cin) contracted with (rows, cin) on their last dims -> (OC, rows),
            # f32 accumulation on the MXU (q @ k^T style dot_general).
            part = lax.dot_general(
                w_ref[kh * k + kw], tap,
                dimension_numbers=(((1,), (1,)), ((), ())),
                preferred_element_type=jnp.float32)
            acc = part if acc is None else acc + part
    o_ref[...] = (acc + b_ref[...]).astype(o_ref.dtype)


def _pick_tile_rows(ho, wo, cin, oc, k, wp, budget_bytes=12 << 20):
    """Largest divisor of `ho` whose per-step VMEM footprint fits the budget."""
    for th in range(ho, 0, -1):
        if ho % th:
            continue
        rows = th * wo
        need = (2 * (th + k - 1) * wp * cin * 2        # double-buffered bf16 input tile
                + rows * cin * 2                        # per-tap temp (bf16)
                + 3 * oc * rows * 4                     # acc + double-buffered f32 output
                + k * k * oc * cin * 2 + oc * 4)        # resident weight + bias
        if need <= budget_bytes:
            return th
    return 1


def pixel_shuffle_pack_init(key, in_channels, out_channels,
                            upsample_kernel=3, scale_factor=4):
    """Deterministic params matching nn.Conv2d + xavier_uniform_ (gain=1), bias=0."""
    k = upsample_kernel
    oc_conv = out_channels * scale_factor * scale_factor
    fan_in = in_channels * k * k
    fan_out = oc_conv * k * k
    bound = math.sqrt(6.0 / (fan_in + fan_out))
    weight = jax.random.uniform(
        key, (oc_conv, in_channels, k, k), jnp.float32, -bound, bound)  # OIHW
    bias = jnp.zeros((oc_conv,), jnp.float32)
    return {"weight": weight, "bias": bias,
            "scale_factor": scale_factor, "kernel": k}


def pixel_shuffle_pack_forward(params, x_nchw):
    """x_nchw: (N, Cin, H, W) -> (N, Cout, H*r, W*r), matching the PyTorch module."""
    weight = params["weight"]            # (OC, Cin, kh, kw) OIHW
    bias = params["bias"]                # (OC,)
    r = params["scale_factor"]
    k = params["kernel"]
    pad = (k - 1) // 2

    N, Cin, H, W = x_nchw.shape
    OC = weight.shape[0]
    Hp, Wp = H + 2 * pad, W + 2 * pad
    Ho, Wo = Hp - k + 1, Wp - k + 1      # conv output spatial size ('same' for odd k)

    # Cheap glue on the *small* input tensor only: NCHW -> NHWC, bf16, spatial pad.
    x_nhwc = jnp.transpose(x_nchw, (0, 2, 3, 1)).astype(jnp.bfloat16)
    xp = jnp.pad(x_nhwc, ((0, 0), (pad, pad), (pad, pad), (0, 0)))

    th = _pick_tile_rows(Ho, Wo, Cin, OC, k, Wp)
    T = Ho // th
    if T == 1:
        x_tiles = xp[:, None]                                  # (N, 1, Hp, Wp, Cin), no copy
    else:
        # Row tiles with a (k-1)-row halo (tiny duplication, unlike im2col's 9x).
        x_tiles = jnp.stack(
            [xp[:, t * th:t * th + th + k - 1] for t in range(T)], axis=1)

    rows = th * Wo
    # Weight as (tap, OC, Cin), tap index = kh*k + kw; bf16 operands for the MXU.
    w3d = jnp.transpose(weight, (2, 3, 0, 1)).reshape(k * k, OC, Cin).astype(jnp.bfloat16)
    b2d = bias.astype(jnp.float32).reshape(OC, 1)

    kernel = partial(_conv_ps_kernel, th=th, wo=Wo, k=k, cin=Cin)
    cost = pl.CostEstimate(
        flops=2 * N * Ho * Wo * k * k * Cin * OC,
        transcendentals=0,
        bytes_accessed=(x_tiles.size * 2 + w3d.size * 2 + b2d.size * 4
                        + N * T * OC * rows * 4))

    y = pl.pallas_call(
        kernel,
        out_shape=jax.ShapeDtypeStruct((N * T * OC, rows), jnp.float32),
        grid_spec=pltpu.PrefetchScalarGridSpec(
            num_scalar_prefetch=0,
            grid=(N, T),
            in_specs=[
                pl.BlockSpec((None, None, th + k - 1, Wp, Cin),
                             lambda n, t: (n, t, 0, 0, 0)),               # row tile + halo
                pl.BlockSpec((k * k, OC, Cin), lambda n, t: (0, 0, 0)),   # resident weight
                pl.BlockSpec((OC, 1), lambda n, t: (0, 0)),               # resident bias
            ],
            out_specs=pl.BlockSpec((OC, rows), lambda n, t: (n * T + t, 0)),
        ),
        compiler_params=pltpu.CompilerParams(
            dimension_semantics=("parallel", "parallel")),
        cost_estimate=cost,
    )(x_tiles, w3d, b2d)

    # y rows = [(n*T + t)*OC + oc], cols = (local_h, w). Conv output is already
    # channel-major, so un-tiling + torch pixel_shuffle fold into ONE transpose:
    # out[n, c, (t*th+lh)*r + i, w*r + j] = y[n, t, c*r*r + i*r + j, lh, w]
    Cout = OC // (r * r)
    y = y.reshape(N, T, Cout, r, r, th, Wo)          # (n, t, cout, i, j, lh, w)
    y = jnp.transpose(y, (0, 2, 1, 5, 3, 6, 4))      # (n, cout, t, lh, i, w, j)
    return y.reshape(N, Cout, Ho * r, Wo * r)


def _reference_forward(params, x_nchw):
    # Pure-JAX reference (lax conv + pixel shuffle) for correctness checking.
    weight = params["weight"]
    bias = params["bias"]
    r = params["scale_factor"]
    k = params["kernel"]
    pad = (k - 1) // 2
    y = jax.lax.conv_general_dilated(
        x_nchw.astype(jnp.float32), weight,
        window_strides=(1, 1), padding=[(pad, pad), (pad, pad)],
        dimension_numbers=("NCHW", "OIHW", "NCHW"))
    y = y + bias[None, :, None, None]
    N, C, H, W = y.shape
    Cout = C // (r * r)
    y = y.reshape(N, Cout, r, r, H, W)
    y = jnp.transpose(y, (0, 1, 4, 2, 5, 3))
    return y.reshape(N, Cout, H * r, W * r)


if __name__ == "__main__":
    key = jax.random.PRNGKey(0)
    k_w, k_x = jax.random.split(key)

    # Small shapes consistent with the module: batch=2, in_channels=4, 16x16.
    N, Cin, H, W = 2, 4, 16, 16
    out_channels, scale_factor, upsample_kernel = 4, 4, 3

    params = pixel_shuffle_pack_init(
        k_w, Cin, out_channels,
        upsample_kernel=upsample_kernel, scale_factor=scale_factor)
    x = jax.random.normal(k_x, (N, Cin, H, W), jnp.float32)

    # The kernel runs its MXU dots in bf16 (f32 accumulation). For an
    # apples-to-apples parity check, quantize x / weight to bf16-representable
    # values so the f32 reference sees the exact same operand values.
    x_q = x.astype(jnp.bfloat16).astype(jnp.float32)
    params_q = dict(
        params, weight=params["weight"].astype(jnp.bfloat16).astype(jnp.float32))

    out = jax.block_until_ready(pixel_shuffle_pack_forward(params_q, x_q))
    ref = jax.block_until_ready(_reference_forward(params_q, x_q))

    assert out.shape == (N, out_channels, H * scale_factor, W * scale_factor), out.shape
    assert jnp.allclose(out, ref, rtol=2e-3, atol=2e-3), \
        float(jnp.max(jnp.abs(out - ref)))
    print("KERNEL_OK")
</pallas_src>

<mosaic_0001>
module attributes {stable_mosaic.version = 11 : i64} {
  func.func @_conv_ps_kernel(%arg0: i32, %arg1: i32, %arg2: memref<1x1x18x18x4xbf16, #tpu.memory_space<vmem>>, %arg3: memref<9x64x4xbf16, #tpu.memory_space<vmem>>, %arg4: memref<64x1xf32, #tpu.memory_space<vmem>>, %arg5: memref<64x256xf32, #tpu.memory_space<vmem>>) attributes {dimension_semantics = [#tpu.dimension_semantics<parallel>, #tpu.dimension_semantics<parallel>], iteration_bounds = array<i64: 2, 1>, scalar_prefetch = 0 : i64, scratch_operands = 0 : i64, tpu.core_type = #tpu.core_type<tc>, window_params = [{transform_indices = @transform_0, window_bounds = array<i64: 1, 1, 18, 18, 4>}, {pipeline_mode = #tpu.pipeline_mode<synchronous>, transform_indices = @transform_1, window_bounds = array<i64: 9, 64, 4>}, {pipeline_mode = #tpu.pipeline_mode<synchronous>, transform_indices = @transform_2, window_bounds = array<i64: 64, 1>}, {transform_indices = @transform_3, window_bounds = array<i64: 64, 256>}]} {
    %c0 = arith.constant 0 : index
    %c0_0 = arith.constant 0 : index
    %c0_1 = arith.constant 0 : index
    %c0_2 = arith.constant 0 : index
    %c0_3 = arith.constant 0 : index
    %0 = vector.load %arg2[%c0, %c0_0, %c0_1, %c0_2, %c0_3] : memref<1x1x18x18x4xbf16, #tpu.memory_space<vmem>>, vector<1x1x16x16x4xbf16>
    %1 = vector.shape_cast %0 : vector<1x1x16x16x4xbf16> to vector<16x16x4xbf16>
    %2 = vector.shape_cast %1 : vector<16x16x4xbf16> to vector<256x4xbf16>
    %c0_4 = arith.constant 0 : index
    %c0_5 = arith.constant 0 : index
    %c0_6 = arith.constant 0 : index
    %3 = vector.load %arg3[%c0_4, %c0_5, %c0_6] : memref<9x64x4xbf16, #tpu.memory_space<vmem>>, vector<1x64x4xbf16>
    %4 = vector.shape_cast %3 : vector<1x64x4xbf16> to vector<64x4xbf16>
    %cst = arith.constant dense<0.000000e+00> : vector<64x256xf32>
    %5 = tpu.matmul %4, %2, %cst {dimension_numbers = #tpu.dot_dimension_numbers<[1], [1], [0], [0], [0, 0, 1, 0], [], []>} : vector<64x4xbf16>, vector<256x4xbf16>, vector<64x256xf32> -> vector<64x256xf32>
    %c0_7 = arith.constant 0 : index
    %c0_8 = arith.constant 0 : index
    %c0_9 = arith.constant 0 : index
    %c1 = arith.constant 1 : index
    %c0_10 = arith.constant 0 : index
    %6 = vector.load %arg2[%c0_7, %c0_8, %c0_9, %c1, %c0_10] : memref<1x1x18x18x4xbf16, #tpu.memory_space<vmem>>, vector<1x1x16x16x4xbf16>
    %7 = vector.shape_cast %6 : vector<1x1x16x16x4xbf16> to vector<16x16x4xbf16>
    %8 = vector.shape_cast %7 : vector<16x16x4xbf16> to vector<256x4xbf16>
    %c1_11 = arith.constant 1 : index
    %c0_12 = arith.constant 0 : index
    %c0_13 = arith.constant 0 : index
    %9 = vector.load %arg3[%c1_11, %c0_12, %c0_13] : memref<9x64x4xbf16, #tpu.memory_space<vmem>>, vector<1x64x4xbf16>
    %10 = vector.shape_cast %9 : vector<1x64x4xbf16> to vector<64x4xbf16>
    %cst_14 = arith.constant dense<0.000000e+00> : vector<64x256xf32>
    %11 = tpu.matmul %10, %8, %cst_14 {dimension_numbers = #tpu.dot_dimension_numbers<[1], [1], [0], [0], [0, 0, 1, 0], [], []>} : vector<64x4xbf16>, vector<256x4xbf16>, vector<64x256xf32> -> vector<64x256xf32>
    %12 = arith.addf %5, %11 : vector<64x256xf32>
    %c0_15 = arith.constant 0 : index
    %c0_16 = arith.constant 0 : index
    %c0_17 = arith.constant 0 : index
    %c2 = arith.constant 2 : index
    %c0_18 = arith.constant 0 : index
    %13 = vector.load %arg2[%c0_15, %c0_16, %c0_17, %c2, %c0_18] : memref<1x1x18x18x4xbf16, #tpu.memory_space<vmem>>, vector<1x1x16x16x4xbf16>
    %14 = vector.shape_cast %13 : vector<1x1x16x16x4xbf16> to vector<16x16x4xbf16>
    %15 = vector.shape_cast %14 : vector<16x16x4xbf16> to vector<256x4xbf16>
    %c2_19 = arith.constant 2 : index
    %c0_20 = arith.constant 0 : index
    %c0_21 = arith.constant 0 : index
    %16 = vector.load %arg3[%c2_19, %c0_20, %c0_21] : memref<9x64x4xbf16, #tpu.memory_space<vmem>>, vector<1x64x4xbf16>
    %17 = vector.shape_cast %16 : vector<1x64x4xbf16> to vector<64x4xbf16>
    %cst_22 = arith.constant dense<0.000000e+00> : vector<64x256xf32>
    %18 = tpu.matmul %17, %15, %cst_22 {dimension_numbers = #tpu.dot_dimension_numbers<[1], [1], [0], [0], [0, 0, 1, 0], [], []>} : vector<64x4xbf16>, vector<256x4xbf16>, vector<64x256xf32> -> vector<64x256xf32>
    %19 = arith.addf %12, %18 : vector<64x256xf32>
    %c0_23 = arith.constant 0 : index
    %c0_24 = arith.constant 0 : index
    %c1_25 = arith.constant 1 : index
    %c0_26 = arith.constant 0 : index
    %c0_27 = arith.constant 0 : index
    %20 = vector.load %arg2[%c0_23, %c0_24, %c1_25, %c0_26, %c0_27] : memref<1x1x18x18x4xbf16, #tpu.memory_space<vmem>>, vector<1x1x16x16x4xbf16>
    %21 = vector.shape_cast %20 : vector<1x1x16x16x4xbf16> to vector<16x16x4xbf16>
    %22 = vector.shape_cast %21 : vector<16x16x4xbf16> to vector<256x4xbf16>
    %c3 = arith.constant 3 : index
    %c0_28 = arith.constant 0 : index
    %c0_29 = arith.constant 0 : index
    %23 = vector.load %arg3[%c3, %c0_28, %c0_29] : memref<9x64x4xbf16, #tpu.memory_space<vmem>>, vector<1x64x4xbf16>
    %24 = vector.shape_cast %23 : vector<1x64x4xbf16> to vector<64x4xbf16>
    %cst_30 = arith.constant dense<0.000000e+00> : vector<64x256xf32>
    %25 = tpu.matmul %24, %22, %cst_30 {dimension_numbers = #tpu.dot_dimension_numbers<[1], [1], [0], [0], [0, 0, 1, 0], [], []>} : vector<64x4xbf16>, vector<256x4xbf16>, vector<64x256xf32> -> vector<64x256xf32>
    %26 = arith.addf %19, %25 : vector<64x256xf32>
    %c0_31 = arith.constant 0 : index
    %c0_32 = arith.constant 0 : index
    %c1_33 = arith.constant 1 : index
    %c1_34 = arith.constant 1 : index
    %c0_35 = arith.constant 0 : index
    %27 = vector.load %arg2[%c0_31, %c0_32, %c1_33, %c1_34, %c0_35] : memref<1x1x18x18x4xbf16, #tpu.memory_space<vmem>>, vector<1x1x16x16x4xbf16>
    %28 = vector.shape_cast %27 : vector<1x1x16x16x4xbf16> to vector<16x16x4xbf16>
    %29 = vector.shape_cast %28 : vector<16x16x4xbf16> to vector<256x4xbf16>
    %c4 = arith.constant 4 : index
    %c0_36 = arith.constant 0 : index
    %c0_37 = arith.constant 0 : index
    %30 = vector.load %arg3[%c4, %c0_36, %c0_37] : memref<9x64x4xbf16, #tpu.memory_space<vmem>>, vector<1x64x4xbf16>
    %31 = vector.shape_cast %30 : vector<1x64x4xbf16> to vector<64x4xbf16>
    %cst_38 = arith.constant dense<0.000000e+00> : vector<64x256xf32>
    %32 = tpu.matmul %31, %29, %cst_38 {dimension_numbers = #tpu.dot_dimension_numbers<[1], [1], [0], [0], [0, 0, 1, 0], [], []>} : vector<64x4xbf16>, vector<256x4xbf16>, vector<64x256xf32> -> vector<64x256xf32>
    %33 = arith.addf %26, %32 : vector<64x256xf32>
    %c0_39 = arith.constant 0 : index
    %c0_40 = arith.constant 0 : index
    %c1_41 = arith.constant 1 : index
    %c2_42 = arith.constant 2 : index
    %c0_43 = arith.constant 0 : index
    %34 = vector.load %arg2[%c0_39, %c0_40, %c1_41, %c2_42, %c0_43] : memref<1x1x18x18x4xbf16, #tpu.memory_space<vmem>>, vector<1x1x16x16x4xbf16>
    %35 = vector.shape_cast %34 : vector<1x1x16x16x4xbf16> to vector<16x16x4xbf16>
    %36 = vector.shape_cast %35 : vector<16x16x4xbf16> to vector<256x4xbf16>
    %c5 = arith.constant 5 : index
    %c0_44 = arith.constant 0 : index
    %c0_45 = arith.constant 0 : index
    %37 = vector.load %arg3[%c5, %c0_44, %c0_45] : memref<9x64x4xbf16, #tpu.memory_space<vmem>>, vector<1x64x4xbf16>
    %38 = vector.shape_cast %37 : vector<1x64x4xbf16> to vector<64x4xbf16>
    %cst_46 = arith.constant dense<0.000000e+00> : vector<64x256xf32>
    %39 = tpu.matmul %38, %36, %cst_46 {dimension_numbers = #tpu.dot_dimension_numbers<[1], [1], [0], [0], [0, 0, 1, 0], [], []>} : vector<64x4xbf16>, vector<256x4xbf16>, vector<64x256xf32> -> vector<64x256xf32>
    %40 = arith.addf %33, %39 : vector<64x256xf32>
    %c0_47 = arith.constant 0 : index
    %c0_48 = arith.constant 0 : index
    %c2_49 = arith.constant 2 : index
    %c0_50 = arith.constant 0 : index
    %c0_51 = arith.constant 0 : index
    %41 = vector.load %arg2[%c0_47, %c0_48, %c2_49, %c0_50, %c0_51] : memref<1x1x18x18x4xbf16, #tpu.memory_space<vmem>>, vector<1x1x16x16x4xbf16>
    %42 = vector.shape_cast %41 : vector<1x1x16x16x4xbf16> to vector<16x16x4xbf16>
    %43 = vector.shape_cast %42 : vector<16x16x4xbf16> to vector<256x4xbf16>
    %c6 = arith.constant 6 : index
    %c0_52 = arith.constant 0 : index
    %c0_53 = arith.constant 0 : index
    %44 = vector.load %arg3[%c6, %c0_52, %c0_53] : memref<9x64x4xbf16, #tpu.memory_space<vmem>>, vector<1x64x4xbf16>
    %45 = vector.shape_cast %44 : vector<1x64x4xbf16> to vector<64x4xbf16>
    %cst_54 = arith.constant dense<0.000000e+00> : vector<64x256xf32>
    %46 = tpu.matmul %45, %43, %cst_54 {dimension_numbers = #tpu.dot_dimension_numbers<[1], [1], [0], [0], [0, 0, 1, 0], [], []>} : vector<64x4xbf16>, vector<256x4xbf16>, vector<64x256xf32> -> vector<64x256xf32>
    %47 = arith.addf %40, %46 : vector<64x256xf32>
    %c0_55 = arith.constant 0 : index
    %c0_56 = arith.constant 0 : index
    %c2_57 = arith.constant 2 : index
    %c1_58 = arith.constant 1 : index
    %c0_59 = arith.constant 0 : index
    %48 = vector.load %arg2[%c0_55, %c0_56, %c2_57, %c1_58, %c0_59] : memref<1x1x18x18x4xbf16, #tpu.memory_space<vmem>>, vector<1x1x16x16x4xbf16>
    %49 = vector.shape_cast %48 : vector<1x1x16x16x4xbf16> to vector<16x16x4xbf16>
    %50 = vector.shape_cast %49 : vector<16x16x4xbf16> to vector<256x4xbf16>
    %c7 = arith.constant 7 : index
    %c0_60 = arith.constant 0 : index
    %c0_61 = arith.constant 0 : index
    %51 = vector.load %arg3[%c7, %c0_60, %c0_61] : memref<9x64x4xbf16, #tpu.memory_space<vmem>>, vector<1x64x4xbf16>
    %52 = vector.shape_cast %51 : vector<1x64x4xbf16> to vector<64x4xbf16>
    %cst_62 = arith.constant dense<0.000000e+00> : vector<64x256xf32>
    %53 = tpu.matmul %52, %50, %cst_62 {dimension_numbers = #tpu.dot_dimension_numbers<[1], [1], [0], [0], [0, 0, 1, 0], [], []>} : vector<64x4xbf16>, vector<256x4xbf16>, vector<64x256xf32> -> vector<64x256xf32>
    %54 = arith.addf %47, %53 : vector<64x256xf32>
    %c0_63 = arith.constant 0 : index
    %c0_64 = arith.constant 0 : index
    %c2_65 = arith.constant 2 : index
    %c2_66 = arith.constant 2 : index
    %c0_67 = arith.constant 0 : index
    %55 = vector.load %arg2[%c0_63, %c0_64, %c2_65, %c2_66, %c0_67] : memref<1x1x18x18x4xbf16, #tpu.memory_space<vmem>>, vector<1x1x16x16x4xbf16>
    %56 = vector.shape_cast %55 : vector<1x1x16x16x4xbf16> to vector<16x16x4xbf16>
    %57 = vector.shape_cast %56 : vector<16x16x4xbf16> to vector<256x4xbf16>
    %c8 = arith.constant 8 : index
    %c0_68 = arith.constant 0 : index
    %c0_69 = arith.constant 0 : index
    %58 = vector.load %arg3[%c8, %c0_68, %c0_69] : memref<9x64x4xbf16, #tpu.memory_space<vmem>>, vector<1x64x4xbf16>
    %59 = vector.shape_cast %58 : vector<1x64x4xbf16> to vector<64x4xbf16>
    %cst_70 = arith.constant dense<0.000000e+00> : vector<64x256xf32>
    %60 = tpu.matmul %59, %57, %cst_70 {dimension_numbers = #tpu.dot_dimension_numbers<[1], [1], [0], [0], [0, 0, 1, 0], [], []>} : vector<64x4xbf16>, vector<256x4xbf16>, vector<64x256xf32> -> vector<64x256xf32>
    %61 = arith.addf %54, %60 : vector<64x256xf32>
    %c0_71 = arith.constant 0 : index
    %c0_72 = arith.constant 0 : index
    %62 = vector.load %arg4[%c0_71, %c0_72] : memref<64x1xf32, #tpu.memory_space<vmem>>, vector<64x1xf32>
    %63 = vector.broadcast %62 : vector<64x1xf32> to vector<64x256xf32>
    %64 = arith.addf %61, %63 : vector<64x256xf32>
    %c0_73 = arith.constant 0 : index
    %c0_74 = arith.constant 0 : index
    %65 = vector.load %arg5[%c0_73, %c0_74] : memref<64x256xf32, #tpu.memory_space<vmem>>, vector<64x256xf32>
    tpu.vector_store %arg5[%c0_73, %c0_74], %64 {strides = array<i32>} : memref<64x256xf32, #tpu.memory_space<vmem>>, vector<64x256xf32>,
    return
  }
  func.func @transform_0(%arg0: i32, %arg1: i32) -> (i32, i32, i32, i32, i32) {
    %c0_i32 = arith.constant 0 : i32
    %c0_i32_0 = arith.constant 0 : i32
    %c0_i32_1 = arith.constant 0 : i32
    %c0_i32_2 = arith.constant 0 : i32
    return %arg0, %arg1, %c0_i32, %c0_i32_0, %c0_i32_1 : i32, i32, i32, i32, i32
  }
  func.func @transform_1(%arg0: i32, %arg1: i32) -> (i32, i32, i32) {
    %c0_i32 = arith.constant 0 : i32
    %c0_i32_0 = arith.constant 0 : i32
    %c0_i32_1 = arith.constant 0 : i32
    %c0_i32_2 = arith.constant 0 : i32
    return %c0_i32, %c0_i32_0, %c0_i32_1 : i32, i32, i32
  }
  func.func @transform_2(%arg0: i32, %arg1: i32) -> (i32, i32) {
    %c0_i32 = arith.constant 0 : i32
    %c0_i32_0 = arith.constant 0 : i32
    %c0_i32_1 = arith.constant 0 : i32
    return %c0_i32, %c0_i32_0 : i32, i32
  }
  func.func @transform_3(%arg0: i32, %arg1: i32) -> (i32, i32) {
    %c1_i32 = arith.constant 1 : i32
    %0 = arith.muli %arg0, %c1_i32 : i32
    %1 = arith.addi %0, %arg1 : i32
    %c0_i32 = arith.constant 0 : i32
    %c0_i32_0 = arith.constant 0 : i32
    return %1, %c0_i32 : i32, i32
  }
}

</mosaic_0001>

<bundles_post_ra>
// kernel: tpu_custom_call.1
= control target key start
LH: loop header
LB: loop body
LE: loop exit
PB: predicated region body
PF: predicated region fallthrough
CT: control target
= control target key end

     0   :  { %8 = vsyncpa [#allocation3], 0  ;;  %s7695_s0 = inlined_call_operand.vmem [shape: bf16[2,1,18,18,4], index: 0, kind: input, shape index: {}]   ;;  %s7696_s1 = inlined_call_operand.vmem [shape: bf16[9,64,4], index: 1, kind: input, shape index: {}]   ;;  %s7697_s2 = inlined_call_operand.vmem [shape: f32[64,1], index: 2, kind: input, shape index: {}]   ;;  %s7698_s3 = inlined_call_operand.hbm [shape: f32[128,256], index: 3, kind: output, shape index: {}]  }
   0x1   :  { %10 = vsyncpa [#allocation3 + $0x1], 0  ;;  %s5449_s12 = smov 0   ;;  %s5451_s13 = smov 0  }
   0x2   :  { %s5453_s14 = smov 0   ;;  %s5455_s15 = smov 0  }
   0x3   :  { %s5457_s16 = smov 0   ;;  %s5459_s17 = smov 0  }
   0x4 LB: > { %s4354_s18 = sadd.s32 4294967295, %s5423_s17   ;;  %s4355_s19 = sadd.s32 4294967294, %s5423_s17   ;;  %s5423_s17 = sphi %s5459_s17, %s16_s17   ;;  %s5419_s16 = sphi %s5457_s16, %s7768_s16   ;;  %s5415_s15 = sphi %s5455_s15, %s7767_s15   ;;  %s5411_s14 = sphi %s5453_s14, %s7766_s14   ;;  %s5407_s13 = sphi %s5451_s13, %s7765_s13   ;;  %s5403_s12 = sphi %s5449_s12, %s7764_s12  }
   0x5   : > { %s28_s20 = sadd.s32 1, %s5419_s16  ;;  %s107_s21 = sadd.s32 1, %s5411_s14 }
   0x6   : > { %p30_p0 = scmp.ge.s32.totalorder %s28_s20, 2  ;;  %p117_p1 = scmp.ne.s32.totalorder %s5411_s14, %s5407_s13 }
   0x7   : > { %p118_p2 = scmp.eq.s32.totalorder %s4354_s18, 1  ;;  %p123_p3 = scmp.ne.s32.totalorder %s5407_s13, %s5403_s12 }
   0x8   : > { %s7770_s20 = smov (%p30_p0, %s28_s20), 0  ;;  %p124_p5 = scmp.eq.s32.totalorder %s4355_s19, 1 }
   0x9   : > { %p5489_p4 = por %p118_p2, %p117_p1  ;;  %s104_s23 = ssub.s32 %s5419_s16, %s7770_s20 }
   0xa   : > { %p4358_p6 = scmp.ge.s32.totalorder %s5423_s17, 1  ;;  %p105_p7 = scmp.eq.s32.totalorder %s104_s23, 0 }
   0xb   : > { %p5496_p8 = por %p124_p5, %p123_p3  ;;  %p160_p9 = scmp.lt.s32.totalorder %s5423_s17, 3 }
   0xc   : > { %s5502_s25 = scalar_select %p105_p7, %s5411_s14, %s107_s21  }
   0xd   : > { %p161_p10 = pnand %p4358_p6, %p160_p9 }
   0xf   : > { %164 = sbr.rel (%p161_p10) target bundleno = 612 (0x264), region = 32 }
  0x14   : > { %p188_p11 = scmp.lt.s32.totalorder %s5415_s15, 1  ;;  %v5509_v0 = vld [vmem:[%s7696_s1] sm:$0xff]   ;;  %vm720_vm0 = vcmask 31744   ;;  %vm256_vm1 = vsmask.f32 3328  ;;  %vm1135_vm4 = vcmask 1042432  }
  0x15   : > { %v5281_v1 = vld [vmem:[%s7696_s1 + $0x20] sm:$0xff]   ;;  %4929 = vmatprep.mubr.msk.bf16.mxu1 %vm720_vm0, %v5509_v0  ;;  %vm257_vm2 = vsmask.f32 7440  ;;  %vm1136_vm5 = vcmask 1046532   ;;  %s185_s19 = sand.u32 1, %s5407_s13   ;;  %s5426_s5 = smov [#allocation2]  }
  0x16   : > { %s189_s26 = scalar_select %p188_p11, %s5415_s15, 1  ;;  %4905 = vmatprep.mubr.msk.bf16.mxu0 %vm720_vm0, %v5281_v1  ;;  %vm5559_vm3 = vmor %vm256_vm1, %vm257_vm2 }
  0x17   : > { %vm5829_vm6 = vmor %vm1135_vm4, %vm1136_vm5  ;;  %s4359_s21 = sshll.u32 %s185_s19, 7  ;;  %s5351_s6 = sshll.u32 %s5426_s5, 4  ;;  %s5352_s6 = int_to_ptr.vmem [resolvable:$false] %s5351_s6 }
  0x18   : > { %s5201_s4 = smul.u32 216, %s189_s26  ;;  %s7600_s23 = scalar_lea.vmem [#allocation2], %s4359_s21 }
  0x19   : > { %s4888_s26 = sshll.u32 %s5415_s15, 11  ;;  %s4274_s27 = sshll.u32 %s7600_s23, 4  ;;  %s7642_s27 = int_to_ptr.vmem [resolvable:$true] %s4274_s27 }
  0x1a   : > { %s5520_s7 = scalar_lea.vmem %s7695_s0, %s5201_s4  ;;  %s7640_s30 = scalar_lea.hbm %s7698_s3, %s4888_s26 }
  0x1b   : > { %v230_v2 = vld [vmem:[%s5520_s7 + $0xb4] sm:$0xf]  ;;  %v5524_v3 = vld [vmem:[%s5520_s7 + $0xb8] sm:$0xf]  ;;  %v228_v14 = vld [vmem:[%s5520_s7 + $0xa8] sm:$0xf]  ;;  %p5354_p1 = scmp.lt.s32.totalorder %s7642_s27, %s5352_s6 }
  0x1c   : > { %v214_v4 = vld [vmem:[%s5520_s7 + $0x54] sm:$0xf]  ;;  %v620_v5 = vshrl.u32 %v230_v2, 16  ;;  %v623_v6 = vshll.u32 %v230_v2, 16  ;;  %v633_v7 = vshrl.u32 %v5524_v3, 16  ;;  %v4412_v8 = vcombine.low %v230_v2, %v5524_v3  ;;  %s7650_s15 = scalar_lea.sflag [#allocation3], %s185_s19 }
  0x1d   : > { %v5530_v9 = vld [vmem:[%s5520_s7 + $0x58] sm:$0xf]  ;;  %v7699_v10 = vrot.slane %v5524_v3, 5  ;;  %v428_v11 = vshrl.u32 %v214_v4, 16  ;;  %v431_v12 = vshll.u32 %v214_v4, 16  ;;  %v596_v23 = vshrl.u32 %v228_v14, 16 }
  0x1e   : > { %v441_v13 = vshrl.u32 %v5530_v9, 16  ;;  %v622_v15 = vrot.slane %v620_v5, 4  ;;  %v625_v16 = vrot.slane %v623_v6, 5  ;;  %5129 = vmatprep.subr.msk.bf16.mxu1 %vm720_vm0, %v4412_v8  ;;  %v4404_v17 = vcombine.low %v214_v4, %v5530_v9  ;;  %v5539_v19 = vld [vmem:[%s5520_s7 + $0xac] sm:$0xf]  ;;  %s5347_s4 = scalar_lea.vmem %s7642_s27, 2048 }
  0x1f   : > { %v5543_v20 = vrot.slane %v7699_v10, 4  ;;  %v430_v21 = vrot.slane %v428_v11, 4  ;;  %v433_v22 = vrot.slane %v431_v12, 5  ;;  %v5546_v24 = vld [vmem:[%s5520_s7 + $0xbc] sm:$0x1]  ;;  %v599_v26 = vshll.u32 %v228_v14, 16  ;;  %p5348_p12 = scmp.ne.s32.totalorder %s7642_s27, %s5347_s4 }
  0x20   : > { %v988_v25 = vsel %vm720_vm0, %v4404_v17, 0  ;;  %v609_v27 = vshrl.u32 %v5539_v19, 16  ;;  %v4411_v28 = vcombine.low %v228_v14, %v5539_v19  ;;  %v212_v29 = vld [vmem:[%s5520_s7 + $0x48] sm:$0xf]  ;;  %v598_v30 = vrot.slane %v596_v23, 4  ;;  %s5353_s8 = scalar_lea.vmem %s5352_s6, 4096 }
  0x21   : > { %4914 = vmatpush3.bf16.xpose.msra.mxu1 %v988_v25  ;;  %v626_v31 = vor.u32 %v625_v16, %v622_v15  ;;  %v629_v32 = vshll.u32 %v5524_v3, 16  ;;  %v635_v33 = vrot.slane %v633_v7, 4  ;;  %v5554_v34 = vld [vmem:[%s5520_s7 + $0x4c] sm:$0xf]  ;;  %v601_v35 = vrot.slane %v599_v26, 5  ;;  %p5349_p13 = pnand %p5348_p12, %p5489_p4  ;;  %p5355_p2 = scmp.lt.s32.totalorder %s5353_s8, %s5347_s4 }
  0x22   : > { %5130 = vmatprep.subr.msk.bf16.mxu1 %vm720_vm0, %v4411_v28  ;;  %v639_v37 = vshll.u32 %v5546_v24, 16  ;;  %v1248_v38 = vrot.slane %v5546_v24, 5  ;;  %v404_v39 = vshrl.u32 %v212_v29, 16  ;;  %v407_v42 = vshll.u32 %v212_v29, 16  ;;  %v5567_v44 = vld [vmem:[%s5520_s7 + $0x5c] sm:$0x1] }
  0x23   : > { %v627_v40 = vrot.slane %v626_v31, 4  ;;  %v631_v41 = vrot.slane %v629_v32, 5  ;;  %v417_v43 = vshrl.u32 %v5554_v34, 16  ;;  %v4403_v47 = vcombine.low %v212_v29, %v5554_v34  ;;  %v226_v49 = vld [vmem:[%s5520_s7 + $0x9c] sm:$0xf]  ;;  %p5350_p0 = pneg %p5349_p13  ;;  %p5356_p3 = por %p5355_p2, %p5354_p1 }
  0x24   : > { %v641_v45 = vrot.slane %v639_v37, 5  ;;  %v5569_v46 = vrot.slane %v404_v39, 4  ;;  %v434_v48 = vor.u32 %v433_v22, %v430_v21  ;;  %v409_v52 = vrot.slane %v407_v42, 5  ;;  %v5577_v54 = vld [vmem:[%s5520_s7 + $0xa0] sm:$0xf] }
  0x25   : > { %v632_v50 = vsel %vm5559_vm3, %v627_v40, %v631_v41  ;;  %v636_v51 = vor.u32 %v635_v33, %v631_v41  ;;  %v437_v53 = vshll.u32 %v5530_v9, 16  ;;  %v985_v55 = vsel %vm720_vm0, %v4403_v47, 0  ;;  %v5583_v63 = vld [vmem:[%s5520_s7 + $0xb0] sm:$0x1]  ;;  %v210_v6 = vld [vmem:[%s5520_s7 + $0x3c] sm:$0xf]  ;;  %p5357_p5 = pnand %p5356_p3, %p5350_p0 }
  0x26   : > { %v435_v56 = vrot.slane %v434_v48, 4  ;;  %v443_v57 = vrot.slane %v441_v13, 4  ;;  %v447_v58 = vshll.u32 %v5567_v44, 16  ;;  %v572_v62 = vshrl.u32 %v226_v49, 16  ;;  %v5593_v13 = vld [vmem:[%s5520_s7 + $0x40] sm:$0xf] }
  0x27   : > { %v637_v59 = vrot.slane %v636_v51, 4  ;;  %v439_v60 = vrot.slane %v437_v53, 5  ;;  %v575_v2 = vshll.u32 %v226_v49, 16  ;;  %v585_v4 = vshrl.u32 %v5577_v54, 16  ;;  %v5604_v37 = vld [vmem:[%s5520_s7 + $0x50] sm:$0x1] }
  0x28   : > { %v449_v1 = vrot.slane %v447_v58, 5  ;;  %v4410_v5 = vcombine.low %v226_v49, %v5577_v54  ;;  %v574_v12 = vrot.slane %v572_v62, 4  ;;  %v602_v16 = vor.u32 %v601_v35, %v598_v30  ;;  %v5619_v62 = vld [vmem:[%s5520_s7 + $0xa4] sm:$0x1]  ;;  %v1101_v24 = vld [vmem:[%s5520_s7 + $0xa8] sm:$0xe] }
  0x29   : > { %v642_v7 = vsel %vm5559_vm3, %v637_v59, %v641_v45  ;;  %4916 = vmatpush3.bf16.xpose.msra.mxu1 %v985_v55  ;;  %v440_v8 = vsel %vm5559_vm3, %v435_v56, %v439_v60  ;;  %v444_v11 = vor.u32 %v443_v57, %v439_v60  ;;  %v577_v15 = vrot.slane %v575_v2, 5  ;;  %v5610_v45 = vld [vmem:[%s5520_s7 + $0x94] sm:$0xf]  ;;  %v208_v2 = vld [vmem:[%s5520_s7 + $0x30] sm:$0xf] }
  0x2a   : > { %v4388_v14 = vcombine.low %v632_v50, %v642_v7  ;;  %5131 = vmatprep.subr.msk.bf16.mxu1 %vm720_vm0, %v4410_v5  ;;  %v605_v17 = vshll.u32 %v5539_v19, 16  ;;  %v611_v22 = vrot.slane %v609_v27, 4  ;;  %v615_v23 = vshll.u32 %v5583_v63, 16  ;;  %v224_v27 = vld [vmem:[%s5520_s7 + $0x90] sm:$0xf] }
  0x2b   : > { %v445_v21 = vrot.slane %v444_v11, 4  ;;  %v380_v25 = vshrl.u32 %v210_v6, 16  ;;  %v603_v26 = vrot.slane %v602_v16, 4  ;;  %v383_v29 = vshll.u32 %v210_v6, 16  ;;  %v5626_v5 = vld [vmem:[%s5520_s7 + $0x34] sm:$0xf] }
  0x2c   : > { %5121 = vmatprep.subr.msk.bf16.mxu0 %vm720_vm0, %v4388_v14  ;;  %v607_v28 = vrot.slane %v605_v17, 5  ;;  %v393_v31 = vshrl.u32 %v5593_v13, 16  ;;  %v617_v30 = vrot.slane %v615_v23, 5  ;;  %v4402_v35 = vcombine.low %v210_v6, %v5593_v13 }
  0x2d   : > { %v450_v32 = vsel %vm5559_vm3, %v445_v21, %v449_v1  ;;  %v382_v33 = vrot.slane %v380_v25, 4  ;;  %v385_v42 = vrot.slane %v383_v29, 5  ;;  %v410_v48 = vor.u32 %v409_v52, %v5569_v46 }
  0x2e   : > { %v4380_v39 = vcombine.low %v440_v8, %v450_v32  ;;  %v608_v40 = vsel %vm5559_vm3, %v603_v26, %v607_v28  ;;  %v612_v41 = vor.u32 %v611_v22, %v607_v28  ;;  %v982_v47 = vsel %vm720_vm0, %v4402_v35, 0 }
  0x2f   : > { %v413_v49 = vshll.u32 %v5554_v34, 16  ;;  %v419_v50 = vrot.slane %v417_v43, 4  ;;  %v423_v55 = vshll.u32 %v5604_v37, 16  ;;  %v548_v56 = vshrl.u32 %v224_v27, 16 }
  0x30   : > { %v755_v51 = vsel %vm720_vm0, %v4380_v39, 0  ;;  %v613_v53 = vrot.slane %v612_v41, 4  ;;  %v411_v57 = vrot.slane %v410_v48, 4  ;;  %v551_v59 = vshll.u32 %v224_v27, 16  ;;  %v222_v39 = vld [vmem:[%s5520_s7 + $0x84] sm:$0xf] }
  0x31   : > { %4890 = vmatpush3.bf16.xpose.msra.mxu0 %v755_v51  ;;  %4918 = vmatpush3.bf16.xpose.msra.mxu1 %v982_v47  ;;  %v415_v58 = vrot.slane %v413_v49, 5  ;;  %v561_v60 = vshrl.u32 %v5610_v45, 16  ;;  %v425_v46 = vrot.slane %v423_v55, 5  ;;  %v550_v52 = vrot.slane %v548_v56, 4  ;;  %v5646_v49 = vld [vmem:[%s5520_s7 + $0x88] sm:$0xf] }
  0x32   : > { %v618_v43 = vsel %vm5559_vm3, %v613_v53, %v617_v30  ;;  %v4409_v1 = vcombine.low %v224_v27, %v5610_v45  ;;  %v553_v11 = vrot.slane %v551_v59, 5  ;;  %v578_v14 = vor.u32 %v577_v15, %v574_v12  ;;  %v5637_v12 = vld [vmem:[%s5520_s7 + $0x44] sm:$0x1] }
  0x33   : > { %v4387_v6 = vcombine.low %v608_v40, %v618_v43  ;;  %v416_v7 = vsel %vm5559_vm3, %v411_v57, %v415_v58  ;;  %v420_v8 = vor.u32 %v419_v50, %v415_v58  ;;  %v581_v16 = vshll.u32 %v5577_v54, 16  ;;  %v5654_v58 = vld [vmem:[%s5520_s7 + $0x98] sm:$0x1] }
  0x34   : > { %5132 = vmatprep.subr.msk.bf16.mxu1 %vm720_vm0, %v4409_v1  ;;  %v587_v17 = vrot.slane %v585_v4, 4  ;;  %v591_v21 = vshll.u32 %v5619_v62, 16  ;;  %v356_v23 = vshrl.u32 %v208_v2, 16  ;;  %v359_v25 = vshll.u32 %v208_v2, 16 }
  0x35   : > { %5122 = vmatprep.subr.msk.bf16.mxu0 %vm720_vm0, %v4387_v6  ;;  %v421_v22 = vrot.slane %v420_v8, 4  ;;  %v369_v26 = vshrl.u32 %v5626_v5, 16  ;;  %v579_v28 = vrot.slane %v578_v14, 4  ;;  %v583_v29 = vrot.slane %v581_v16, 5  ;;  %v5666_v14 = vld [vmem:[%s5520_s7 + $0x28] sm:$0xf] }
  0x36   : > { %v593_v32 = vrot.slane %v591_v21, 5  ;;  %v4401_v30 = vcombine.low %v208_v2, %v5626_v5  ;;  %v358_v15 = vrot.slane %v356_v23, 4  ;;  %v361_v35 = vrot.slane %v359_v25, 5  ;;  %v206_v2 = vld [vmem:[%s5520_s7 + $0x24] sm:$0xf] }
  0x37   : > { %v426_v4 = vsel %vm5559_vm3, %v421_v22, %v425_v46  ;;  %v386_v27 = vor.u32 %v385_v42, %v382_v33  ;;  %v584_v41 = vsel %vm5559_vm3, %v579_v28, %v583_v29  ;;  %v588_v47 = vor.u32 %v587_v17, %v583_v29 }
  0x38   : > { %v4379_v40 = vcombine.low %v416_v7, %v426_v4  ;;  %v979_v48 = vsel %vm720_vm0, %v4401_v30, 0  ;;  %v389_v51 = vshll.u32 %v5593_v13, 16  ;;  %v395_v53 = vrot.slane %v393_v31, 4 }
  0x39   : > { %4920 = vmatpush3.bf16.xpose.msra.mxu1 %v979_v48  ;;  %v387_v50 = vrot.slane %v386_v27, 4  ;;  %v399_v33 = vshll.u32 %v5637_v12, 16  ;;  %v589_v55 = vrot.slane %v588_v47, 4  ;;  %v524_v56 = vshrl.u32 %v222_v39, 16 }
  0x3a   : > { %v752_v42 = vsel %vm720_vm0, %v4379_v40, 0  ;;  %v527_v57 = vshll.u32 %v222_v39, 16  ;;  %v391_v59 = vrot.slane %v389_v51, 5  ;;  %v537_v46 = vshrl.u32 %v5646_v49, 16 }
  0x3b   : > { %4892 = vmatpush3.bf16.xpose.msra.mxu0 %v752_v42  ;;  %v401_v43 = vrot.slane %v399_v33, 5  ;;  %v4408_v1 = vcombine.low %v222_v39, %v5646_v49  ;;  %v594_v31 = vsel %vm5559_vm3, %v589_v55, %v593_v32  ;;  %v5661_v6 = vrot.slane %v524_v56, 4 }
  0x3c   : > { %v5663_v7 = vrot.slane %v527_v57, 5  ;;  %v554_v8 = vor.u32 %v553_v11, %v550_v52  ;;  %v4386_v16 = vcombine.low %v584_v41, %v594_v31  ;;  %v392_v17 = vsel %vm5559_vm3, %v387_v50, %v391_v59  ;;  %v5676_v52 = vld [vmem:[%s5520_s7 + $0x38] sm:$0x1] }
  0x3d   : > { %v396_v21 = vor.u32 %v395_v53, %v391_v59  ;;  %5133 = vmatprep.subr.msk.bf16.mxu1 %vm720_vm0, %v4408_v1  ;;  %v557_v22 = vshll.u32 %v5610_v45, 16  ;;  %v563_v25 = vrot.slane %v561_v60, 4  ;;  %v567_v28 = vshll.u32 %v5654_v58, 16  ;;  %v220_v60 = vld [vmem:[%s5520_s7 + $0x78] sm:$0xf] }
  0x3e   : > { %v555_v23 = vrot.slane %v554_v8, 4  ;;  %v332_v29 = vshrl.u32 %v206_v2, 16  ;;  %5123 = vmatprep.subr.msk.bf16.mxu0 %vm720_vm0, %v4386_v16  ;;  %v335_v30 = vshll.u32 %v206_v2, 16  ;;  %v345_v4 = vshrl.u32 %v5666_v14, 16  ;;  %v5687_v53 = vld [vmem:[%s5520_s7 + $0x7c] sm:$0xf] }
  0x3f   : > { %v397_v11 = vrot.slane %v396_v21, 4  ;;  %v559_v32 = vrot.slane %v557_v22, 5  ;;  %v569_v27 = vrot.slane %v567_v28, 5  ;;  %v4400_v40 = vcombine.low %v206_v2, %v5666_v14  ;;  %v204_v1 = vld [vmem:[%s5520_s7 + $0x18] sm:$0xf] }
  0x40   : > { %v334_v39 = vrot.slane %v332_v29, 4  ;;  %v362_v41 = vor.u32 %v361_v35, %v358_v15  ;;  %v337_v51 = vrot.slane %v335_v30, 5  ;;  %v365_v56 = vshll.u32 %v5626_v5, 16  ;;  %v5692_v15 = vld [vmem:[%s5520_s7 + $0x8c] sm:$0x1] }
  0x41   : > { %v402_v47 = vsel %vm5559_vm3, %v397_v11, %v401_v43  ;;  %v560_v48 = vsel %vm5559_vm3, %v555_v23, %v559_v32  ;;  %v564_v50 = vor.u32 %v563_v25, %v559_v32  ;;  %v976_v42 = vsel %vm720_vm0, %v4400_v40, 0 }
  0x42   : > { %v4378_v33 = vcombine.low %v392_v17, %v402_v47  ;;  %v363_v55 = vrot.slane %v362_v41, 4  ;;  %4922 = vmatpush3.bf16.xpose.msra.mxu1 %v976_v42  ;;  %v371_v57 = vrot.slane %v369_v26, 4  ;;  %v375_v59 = vshll.u32 %v5676_v52, 16  ;;  %v5701_v17 = vld [vmem:[%s5520_s7 + $0x1c] sm:$0xf] }
  0x43   : > { %v565_v35 = vrot.slane %v564_v50, 4  ;;  %v500_v43 = vshrl.u32 %v220_v60, 16  ;;  %v367_v31 = vrot.slane %v365_v56, 5  ;;  %v503_v8 = vshll.u32 %v220_v60, 16  ;;  %v5714_v41 = vld [vmem:[%s5520_s7 + $0x2c] sm:$0x1] }
  0x44   : > { %v749_v2 = vsel %vm720_vm0, %v4378_v33, 0  ;;  %v513_v16 = vshrl.u32 %v5687_v53, 16  ;;  %v377_v22 = vrot.slane %v375_v59, 5  ;;  %v4407_v26 = vcombine.low %v220_v60, %v5687_v53  ;;  %v218_v33 = vld [vmem:[%s5520_s7 + $0x6c] sm:$0xf] }
  0x45   : > { %4894 = vmatpush3.bf16.xpose.msra.mxu0 %v749_v2  ;;  %v570_v21 = vsel %vm5559_vm3, %v565_v35, %v569_v27  ;;  %v502_v23 = vrot.slane %v500_v43, 4  ;;  %v368_v28 = vsel %vm5559_vm3, %v363_v55, %v367_v31  ;;  %v372_v29 = vor.u32 %v371_v57, %v367_v31  ;;  %v5723_v59 = vld [vmem:[%s5520_s7 + $0x70] sm:$0xf] }
  0x46   : > { %v4385_v25 = vcombine.low %v560_v48, %v570_v21  ;;  %v505_v11 = vrot.slane %v503_v8, 5  ;;  %5134 = vmatprep.subr.msk.bf16.mxu1 %vm720_vm0, %v4407_v26  ;;  %v530_v32 = vor.u32 %v5663_v7, %v5661_v6  ;;  %v533_v30 = vshll.u32 %v5646_v49, 16 }
  0x47   : > { %v539_v40 = vrot.slane %v537_v46, 4  ;;  %v543_v27 = vshll.u32 %v5692_v15, 16  ;;  %v373_v60 = vrot.slane %v372_v29, 4  ;;  %v308_v47 = vshrl.u32 %v204_v1, 16 }
  0x48   : > { %5124 = vmatprep.subr.msk.bf16.mxu0 %vm720_vm0, %v4385_v25  ;;  %v311_v48 = vshll.u32 %v204_v1, 16  ;;  %v321_v50 = vshrl.u32 %v5701_v17, 16  ;;  %v531_v42 = vrot.slane %v530_v32, 4  ;;  %v535_v55 = vrot.slane %v533_v30, 5 }
  0x49   : > { %v545_v56 = vrot.slane %v543_v27, 5  ;;  %v4399_v6 = vcombine.low %v204_v1, %v5701_v17  ;;  %v378_v46 = vsel %vm5559_vm3, %v373_v60, %v377_v22  ;;  %v310_v7 = vrot.slane %v308_v47, 4 }
  0x4a   : > { %v313_v35 = vrot.slane %v311_v48, 5  ;;  %v338_v57 = vor.u32 %v337_v51, %v334_v39  ;;  %v4377_v43 = vcombine.low %v368_v28, %v378_v46  ;;  %v536_v2 = vsel %vm5559_vm3, %v531_v42, %v535_v55  ;;  %v5733_v39 = vld [vmem:[%s5520_s7 + $0x80] sm:$0x1]  ;;  %v202_v51 = vld [vmem:[%s5520_s7 + $0xc] sm:$0xf] }
  0x4b   : > { %v540_v31 = vor.u32 %v539_v40, %v535_v55  ;;  %v973_v8 = vsel %vm720_vm0, %v4399_v6, 0  ;;  %v341_v1 = vshll.u32 %v5666_v14, 16  ;;  %v347_v26 = vrot.slane %v345_v4, 4  ;;  %v5746_v55 = vld [vmem:[%s5520_s7 + $0x10] sm:$0xf] }
  0x4c   : > { %4924 = vmatpush3.bf16.xpose.msra.mxu1 %v973_v8  ;;  %v339_v21 = vrot.slane %v338_v57, 4  ;;  %v351_v22 = vshll.u32 %v5714_v41, 16  ;;  %v746_v25 = vsel %vm720_vm0, %v4377_v43, 0  ;;  %v476_v29 = vshrl.u32 %v218_v33, 16 }
  0x4d   : > { %v541_v28 = vrot.slane %v540_v31, 4  ;;  %v479_v32 = vshll.u32 %v218_v33, 16  ;;  %4896 = vmatpush3.bf16.xpose.msra.mxu0 %v746_v25  ;;  %v343_v30 = vrot.slane %v341_v1, 5  ;;  %v489_v27 = vshrl.u32 %v5723_v59, 16  ;;  %v5754_v1 = vld [vmem:[%s5520_s7 + $0x20] sm:$0x1] }
  0x4e   : > { %v353_v40 = vrot.slane %v351_v22, 5  ;;  %v4406_v60 = vcombine.low %v218_v33, %v5723_v59  ;;  %v5741_v47 = vrot.slane %v476_v29, 4  ;;  %v506_v42 = vor.u32 %v505_v11, %v502_v23 }
  0x4f   : > { %v546_v4 = vsel %vm5559_vm3, %v541_v28, %v545_v56  ;;  %v5743_v48 = vrot.slane %v479_v32, 5  ;;  %v344_v46 = vsel %vm5559_vm3, %v339_v21, %v343_v30  ;;  %v348_v57 = vor.u32 %v347_v26, %v343_v30  ;;  %v216_v28 = vld [vmem:[%s5520_s7 + $0x60] sm:$0xf] }
  0x50   : > { %v4384_v6 = vcombine.low %v536_v2, %v546_v4  ;;  %5135 = vmatprep.subr.msk.bf16.mxu1 %vm720_vm0, %v4406_v60  ;;  %v509_v33 = vshll.u32 %v5687_v53, 16  ;;  %v507_v43 = vrot.slane %v506_v42, 4  ;;  %v515_v31 = vrot.slane %v513_v16, 4  ;;  %v5767_v4 = vld [vmem:[%s5520_s7 + $0x64] sm:$0xf] }
  0x51   : > { %v519_v56 = vshll.u32 %v5733_v39, 16  ;;  %v284_v8 = vshrl.u32 %v202_v51, 16  ;;  %v349_v23 = vrot.slane %v348_v57, 4  ;;  %v287_v2 = vshll.u32 %v202_v51, 16 }
  0x52   : > { %5125 = vmatprep.subr.msk.bf16.mxu0 %vm720_vm0, %v4384_v6  ;;  %v511_v11 = vrot.slane %v509_v33, 5  ;;  %v297_v21 = vshrl.u32 %v5746_v55, 16  ;;  %v4398_v25 = vcombine.low %v202_v51, %v5746_v55  ;;  %v314_v16 = vor.u32 %v313_v35, %v310_v7  ;;  %v5772_v7 = vld [vmem:[%s5520_s7 + $0x74] sm:$0x1] }
  0x53   : > { %v521_v26 = vrot.slane %v519_v56, 5  ;;  %v5758_v22 = vrot.slane %v284_v8, 4  ;;  %v354_v29 = vsel %vm5559_vm3, %v349_v23, %v353_v40  ;;  %v289_v60 = vrot.slane %v287_v2, 5 }
  0x54   : > { %v512_v32 = vsel %vm5559_vm3, %v507_v43, %v511_v11  ;;  %v516_v30 = vor.u32 %v515_v31, %v511_v11  ;;  %v4376_v42 = vcombine.low %v344_v46, %v354_v29  ;;  %v970_v6 = vsel %vm720_vm0, %v4398_v25, 0  ;;  %v200_v31 = vld [vmem:[%s5520_s7] sm:$0xf]  ;;  %v5781_v11 = vld [vmem:[%s5520_s7 + $0x4] sm:$0xf] }
  0x55   : > { %v315_v57 = vrot.slane %v314_v16, 4  ;;  %v317_v51 = vshll.u32 %v5701_v17, 16  ;;  %4926 = vmatpush3.bf16.xpose.msra.mxu1 %v970_v6  ;;  %v323_v40 = vrot.slane %v321_v50, 4  ;;  %v327_v33 = vshll.u32 %v5754_v1, 16 }
  0x56   : > { %v517_v35 = vrot.slane %v516_v30, 4  ;;  %v452_v43 = vshrl.u32 %v216_v28, 16  ;;  %v743_v56 = vsel %vm720_vm0, %v4376_v42, 0  ;;  %v455_v46 = vshll.u32 %v216_v28, 16 }
  0x57   : > { %v319_v8 = vrot.slane %v317_v51, 5  ;;  %v465_v23 = vshrl.u32 %v5767_v4, 16  ;;  %4898 = vmatpush3.bf16.xpose.msra.mxu0 %v743_v56  ;;  %v329_v25 = vrot.slane %v327_v33, 5  ;;  %v4405_v50 = vcombine.low %v216_v28, %v5767_v4  ;;  %v5794_v28 = vld [vmem:[%s5520_s7 + $0x14] sm:$0x1] }
  0x58   : > { %v522_v2 = vsel %vm5559_vm3, %v517_v35, %v521_v26  ;;  %v454_v16 = vrot.slane %v452_v43, 4  ;;  %v457_v6 = vrot.slane %v455_v46, 5  ;;  %v482_v51 = vor.u32 %v5743_v48, %v5741_v47  ;;  %v5279_v48 = vld [vmem:[%s5520_s7 + $0xc0] sm:$0xff]  }
  0x59   : > { %v4383_v29 = vcombine.low %v512_v32, %v522_v2  ;;  %v320_v30 = vsel %vm5559_vm3, %v315_v57, %v319_v8  ;;  %v324_v42 = vor.u32 %v323_v40, %v319_v8  ;;  %5136 = vmatprep.subr.msk.bf16.mxu1 %vm720_vm0, %v4405_v50  ;;  %v485_v26 = vshll.u32 %v5723_v59, 16 }
  0x5a   : > { %v491_v35 = vrot.slane %v489_v27, 4  ;;  %v495_v33 = vshll.u32 %v5772_v7, 16  ;;  %v260_v43 = vshrl.u32 %v200_v31, 16  ;;  %v263_v57 = vshll.u32 %v200_v31, 16 }
  0x5b   : > { %5126 = vmatprep.subr.msk.bf16.mxu0 %vm720_vm0, %v4383_v29  ;;  %v325_v32 = vrot.slane %v324_v42, 4  ;;  %v273_v40 = vshrl.u32 %v5781_v11, 16  ;;  %v483_v56 = vrot.slane %v482_v51, 4  ;;  %v487_v8 = vrot.slane %v485_v26, 5  ;;  %v5807_v26 = vld [vmem:[%s5520_s7 + $0x68] sm:$0x1] }
  0x5c   : > { %v497_v46 = vrot.slane %v495_v33, 5  ;;  %v4397_v47 = vcombine.low %v200_v31, %v5781_v11  ;;  %v262_v2 = vrot.slane %v260_v43, 4  ;;  %v265_v50 = vrot.slane %v263_v57, 5  ;;  %v5280_v31 = vld [vmem:[%s5520_s7 + $0x60] sm:$0xff]   ;;  %v5818_v57 = vld [vmem:[%s5520_s7 + $0x8] sm:$0x1] }
  0x5d   : > { %v330_v27 = vsel %vm5559_vm3, %v325_v32, %v329_v25  ;;  %v290_v29 = vor.u32 %v289_v60, %v5758_v22  ;;  %v488_v61 = vsel %vm5559_vm3, %v483_v56, %v487_v8  ;;  %v492_v18 = vor.u32 %v491_v35, %v487_v8  ;;  %v1102_v56 = vld [vmem:[%s5520_s7 + $0xb4] sm:$0xe] }
  0x5e   : > { %v4375_v42 = vcombine.low %v320_v30, %v330_v27  ;;  %v967_v51 = vsel %vm720_vm0, %v4397_v47, 0  ;;  %v293_v25 = vshll.u32 %v5746_v55, 16  ;;  %v299_v32 = vrot.slane %v297_v21, 4 }
  0x5f   : > { %4928 = vmatpush3.bf16.xpose.msra.mxu1 %v967_v51  ;;  %v291_v33 = vrot.slane %v290_v29, 4  ;;  %v303_v22 = vshll.u32 %v5794_v28, 16  ;;  %v493_v30 = vrot.slane %v492_v18, 4  ;;  %v458_v35 = vor.u32 %v457_v6, %v454_v16 }
  0x60   : > { %v740_v60 = vsel %vm720_vm0, %v4375_v42, 0  ;;  %5145 = vmatprep.subr.msk.bf16.mxu1 %vm720_vm0, %v5279_v48  ;;  %v461_v43 = vshll.u32 %v5767_v4, 16  ;;  %v295_v8 = vrot.slane %v293_v25, 5  ;;  %v467_v27 = vrot.slane %v465_v23, 4  ;;  %v5283_v25 = vld [vmem:[%s5520_s7 + $0x54] sm:$0xff]  }
  0x61   : > { %4900 = vmatpush3.bf16.xpose.msra.mxu0 %v740_v60  ;;  %v305_v47 = vrot.slane %v303_v22, 5  ;;  %v471_v21 = vshll.u32 %v5807_v26, 16  ;;  %v498_v29 = vsel %vm5559_vm3, %v493_v30, %v497_v46  ;;  %v459_v18 = vrot.slane %v458_v35, 4  ;;  %v5290_v46 = vld [vmem:[%s7696_s1 + $0x8] sm:$0xff]  }
  0x62   : > { %v463_v42 = vrot.slane %v461_v43, 5  ;;  %v1652_v16 = vsel %vm720_vm0, %v5280_v31, 0  ;;  %v4382_v6 = vcombine.low %v488_v61, %v498_v29  ;;  %v296_v48 = vsel %vm5559_vm3, %v291_v33, %v295_v8 }
  0x63   : > { %v300_v51 = vor.u32 %v299_v32, %v295_v8  ;;  %v473_v10 = vrot.slane %v471_v21, 5  ;;  %v266_v22 = vor.u32 %v265_v50, %v262_v2  ;;  %v269_v33 = vshll.u32 %v5781_v11, 16  ;;  %v5282_v32 = vld [vmem:[%s5520_s7 + $0xb4] sm:$0xff]  }
  0x64   : > { %v464_v61 = vsel %vm5559_vm3, %v459_v18, %v463_v42  ;;  %v468_v31 = vor.u32 %v467_v27, %v463_v42  ;;  %5127 = vmatprep.subr.msk.bf16.mxu0 %vm720_vm0, %v4382_v6  ;;  %v275_v30 = vrot.slane %v273_v40, 4  ;;  %v279_v35 = vshll.u32 %v5818_v57, 16  ;;  %v1094_v50 = vld [vmem:[%s5520_s7 + $0x54] sm:$0xe]  ;;  %v5285_v42 = vld [vmem:[%s5520_s7 + $0x48] sm:$0xff]  }
  0x65   : > { %v301_v60 = vrot.slane %v300_v51, 4  ;;  %v4432_v43 = vrot.slane %v1102_v56, 9  ;;  %v267_v21 = vrot.slane %v266_v22, 4  ;;  %v271_v29 = vrot.slane %v269_v33, 5 }
  0x66   : > { %v469_v8 = vrot.slane %v468_v31, 4  ;;  %4930 = vmatmul.mubr.msk.bf16.vlgmr.msra.gmra.mxu1 %vm720_vm0, %v5509_v0  ;;  %v5850_v2 = vsel %vm5829_vm6, %v5543_v20, %v1248_v38  ;;  %v281_v27 = vrot.slane %v279_v35, 5  ;;  %v7710_v56 = vrot.slane %v5524_v3, 5 }
  0x67   : > { %v306_v40 = vsel %vm5559_vm3, %v301_v60, %v305_v47  ;;  %4962 = vmatpush3.bf16.xpose.msra.mxu1 %v1652_v16  ;;  %v1649_v18 = vsel %vm720_vm0, %v5283_v25, 0  ;;  %4931 = vmatprep.mubr.msk.bf16.mxu1 %vm720_vm0, %v5290_v46  ;;  %v272_v47 = vsel %vm5559_vm3, %v267_v21, %v271_v29  ;;  %v276_v16 = vor.u32 %v275_v30, %v271_v29  ;;  %v1093_v60 = vld [vmem:[%s5520_s7 + $0x48] sm:$0xe]  ;;  %v1100_v21 = vld [vmem:[%s5520_s7 + $0x9c] sm:$0xe] }
  0x68   : > { %v5859_v0 = vsel %vm5829_vm6, %v4432_v43, %v7710_v56  ;;  %v4374_v20 = vcombine.low %v296_v48, %v306_v40  ;;  %v474_v38 = vsel %vm5559_vm3, %v469_v8, %v473_v10  ;;  %5146 = vmatprep.subr.msk.bf16.mxu1 %vm720_vm0, %v5282_v32  ;;  %v4424_v51 = vrot.slane %v1094_v50, 9  ;;  %v5284_v29 = vld [vmem:[%s5520_s7 + $0xa8] sm:$0xff]   ;;  %v5287_v50 = vld [vmem:[%s5520_s7 + $0x3c] sm:$0xff]  }
  0x69   : > { %v4381_v3 = vcombine.low %v464_v61, %v474_v38  ;;  %v4460_v6 = vcombine.low %v5859_v0, %v5850_v2  ;;  %v7711_v25 = vrot.slane %v5530_v9, 5  ;;  %v277_v22 = vrot.slane %v276_v16, 4  ;;  %v1092_v40 = vld [vmem:[%s5520_s7 + $0x3c] sm:$0xe] }
  0x6a   : > { %v737_v48 = vsel %vm720_vm0, %v4374_v20, 0  ;;  %v4431_v10 = vrot.slane %v1101_v24, 9  ;;  %v1238_v33 = vrot.slane %v5539_v19, 5  ;;  %v7713_v30 = vrot.slane %v5567_v44, 5  ;;  %v5893_v19 = vld [vmem:[%s7696_s1 + $0x10] sm:$0xff]  }
  0x6b   : > { %v1191_v31 = vrot.slane %v7711_v25, 4  ;;  %4902 = vmatpush3.bf16.xpose.msra.mxu0 %v737_v48  ;;  %v7712_v61 = vmov %v7711_v25  ;;  %v1241_v43 = vrot.slane %v5583_v63, 5  ;;  %v5887_v8 = vsel %vm720_vm0, %v5285_v42, 0 }
  0x6c   : > { %v1190_v32 = vsel %vm5829_vm6, %v4424_v51, %v7712_v61  ;;  %5128 = vmatprep.subr.msk.bf16.mxu0 %vm720_vm0, %v4381_v3  ;;  %v282_v9 = vsel %vm5559_vm3, %v277_v22, %v281_v27  ;;  %v5901_v2 = vsel %vm5829_vm6, %v4431_v10, %v1238_v33  ;;  %v1240_v63 = vrot.slane %v1238_v33, 4  ;;  %v1099_v51 = vld [vmem:[%s5520_s7 + $0x90] sm:$0xe]  ;;  %v5286_v61 = vld [vmem:[%s5520_s7 + $0x9c] sm:$0xff]  }
  0x6d   : > { %v1193_v35 = vsel %vm5829_vm6, %v1191_v31, %v7713_v30  ;;  %v4373_v56 = vcombine.low %v272_v47, %v282_v9  ;;  %v4423_v0 = vrot.slane %v1093_v60, 9  ;;  %v1182_v24 = vrot.slane %v5554_v34, 5  ;;  %v5289_v31 = vld [vmem:[%s5520_s7 + $0x30] sm:$0xff]  }
  0x6e   : > { %v4452_v44 = vcombine.low %v1190_v32, %v1193_v35  ;;  %v1185_v42 = vrot.slane %v5604_v37, 5  ;;  %v5912_v27 = vsel %vm5829_vm6, %v1240_v63, %v1241_v43  ;;  %v4430_v38 = vrot.slane %v1100_v21, 9  ;;  %4932 = vmatmul.mubr.msk.bf16.gmra.mxu1 %vm720_vm0, %v5290_v46  ;;  %v1091_v35 = vld [vmem:[%s5520_s7 + $0x30] sm:$0xe]  ;;  %v5948_v43 = vld [vmem:[%s7696_s1 + $0x18] sm:$0xff]  }
  0x6f   : > { %v1231_v16 = vrot.slane %v5577_v54, 5  ;;  %v734_v47 = vsel %vm720_vm0, %v4373_v56, 0  ;;  %4964 = vmatpush3.bf16.xpose.msra.mxu1 %v1649_v18  ;;  %v4459_v34 = vcombine.low %v5901_v2, %v5912_v27  ;;  %v1183_v37 = vsel %vm5829_vm6, %v4423_v0, %v1182_v24  ;;  %4933 = vmatprep.mubr.msk.bf16.mxu1 %vm720_vm0, %v5893_v19 }
  0x70   : > { %v5908_v20 = vsel %vm720_vm0, %v4452_v44, 0  ;;  %v1184_v3 = vrot.slane %v1182_v24, 4  ;;  %5147 = vmatprep.subr.msk.bf16.mxu1 %vm720_vm0, %v5284_v29  ;;  %v1234_v18 = vrot.slane %v5619_v62, 5  ;;  %v5931_v25 = vsel %vm720_vm0, %v5287_v50, 0  ;;  %v1098_v44 = vld [vmem:[%s5520_s7 + $0x84] sm:$0xe] }
  0x71   : > { %v5927_v54 = vsel %vm5829_vm6, %v4430_v38, %v1231_v16  ;;  %v1233_v46 = vrot.slane %v1231_v16, 4  ;;  %v4422_v22 = vrot.slane %v1092_v40, 9  ;;  %v1175_v10 = vrot.slane %v5593_v13, 5  ;;  %v5292_v40 = vld [vmem:[%s5520_s7 + $0x24] sm:$0xff]  }
  0x72   : > { %v1186_v48 = vsel %vm5829_vm6, %v1184_v3, %v1185_v42  ;;  %v1178_v33 = vrot.slane %v5637_v12, 5  ;;  %v4429_v62 = vrot.slane %v1099_v51, 9  ;;  %v1224_v30 = vrot.slane %v5610_v45, 5  ;;  %v1090_v24 = vld [vmem:[%s5520_s7 + $0x24] sm:$0xe]  ;;  %v5989_v51 = vld [vmem:[%s7696_s1 + $0x28] sm:$0xff]  }
  0x73   : > { %v4451_v60 = vcombine.low %v1183_v37, %v1186_v48  ;;  %v5941_v32 = vsel %vm5829_vm6, %v1233_v46, %v1234_v18  ;;  %4904 = vmatpush3.bf16.xpose.msra.mxu0 %v734_v47  ;;  %v1176_v12 = vsel %vm5829_vm6, %v4422_v22, %v1175_v10  ;;  %v1177_v21 = vrot.slane %v1175_v10, 4  ;;  %v5296_v18 = vld [vmem:[%s5520_s7 + $0x18] sm:$0xff]  }
  0x74   : > { %v4458_v13 = vcombine.low %v5927_v54, %v5941_v32  ;;  %v1227_v9 = vrot.slane %v5654_v58, 5  ;;  %5137 = vmatprep.subr.msk.bf16.mxu0 %vm720_vm0, %v4460_v6  ;;  %v5962_v29 = vsel %vm5829_vm6, %v4429_v62, %v1224_v30  ;;  %v1226_v63 = vrot.slane %v1224_v30, 4 }
  0x75   : > { %v5958_v45 = vsel %vm720_vm0, %v4451_v60, 0  ;;  %v5965_v50 = vsel %vm720_vm0, %v5289_v31, 0  ;;  %v1179_v56 = vsel %vm5829_vm6, %v1177_v21, %v1178_v33  ;;  %v4421_v58 = vrot.slane %v1091_v35, 9  ;;  %v5346_v33 = vld [vmem:[%s7696_s1 + $0x20] sm:$0xff]   ;;  %v5288_v60 = vld [vmem:[%s5520_s7 + $0x90] sm:$0xff]  }
  0x76   : > { %v1168_v0 = vrot.slane %v5626_v5, 5  ;;  %v1171_v6 = vrot.slane %v5676_v52, 5  ;;  %v4450_v42 = vcombine.low %v1176_v12, %v1179_v56  ;;  %v5975_v38 = vsel %vm5829_vm6, %v1226_v63, %v1227_v9  ;;  %4934 = vmatmul.mubr.msk.bf16.gmra.mxu1 %vm720_vm0, %v5893_v19 }
  0x77   : > { %v4428_v16 = vrot.slane %v1098_v44, 9  ;;  %v1217_v47 = vrot.slane %v5646_v49, 5  ;;  %4966 = vmatpush3.bf16.xpose.msra.mxu1 %v5887_v8  ;;  %v4457_v5 = vcombine.low %v5962_v29, %v5975_v38  ;;  %v1220_v3 = vrot.slane %v5692_v15, 5  ;;  %v1097_v49 = vld [vmem:[%s5520_s7 + $0x78] sm:$0xe]  ;;  %4935 = vmatprep.mubr.msk.bf16.mxu1 %vm720_vm0, %v5948_v43 }
  0x78   : > { %v1169_v52 = vsel %vm5829_vm6, %v4421_v58, %v1168_v0  ;;  %v1170_v37 = vrot.slane %v1168_v0, 4  ;;  %5148 = vmatprep.subr.msk.bf16.mxu1 %vm720_vm0, %v5286_v61  ;;  %v5996_v8 = vsel %vm720_vm0, %v4450_v42, 0  ;;  %v6003_v46 = vsel %vm720_vm0, %v5292_v40, 0  ;;  %v1096_v44 = vld [vmem:[%s5520_s7 + $0x6c] sm:$0xe] }
  0x79   : > { %v6000_v19 = vsel %vm5829_vm6, %v4428_v16, %v1217_v47  ;;  %v1219_v15 = vrot.slane %v1217_v47, 4  ;;  %v4420_v48 = vrot.slane %v1090_v24, 9  ;;  %v1161_v22 = vrot.slane %v5666_v14, 5  ;;  %v1089_v14 = vld [vmem:[%s5520_s7 + $0x18] sm:$0xe]  ;;  %v5300_v58 = vld [vmem:[%s5520_s7 + $0xc] sm:$0xff]  }
  0x7a   : > { %v1172_v31 = vsel %vm5829_vm6, %v1170_v37, %v1171_v6  ;;  %v1164_v10 = vrot.slane %v5714_v41, 5  ;;  %4906 = vmatmul.mubr.msk.bf16.vlgmr.msra.gmra.mxu0 %vm720_vm0, %v5346_v33  ;;  %v4427_v30 = vrot.slane %v1097_v49, 9  ;;  %v1210_v35 = vrot.slane %v5687_v53, 5  ;;  %v6024_v41 = vld [vmem:[%s7696_s1 + $0x60] sm:$0xff]   ;;  %v1088_v0 = vld [vmem:[%s5520_s7 + $0xc] sm:$0xe] }
  0x7b   : > { %v4449_v61 = vcombine.low %v1169_v52, %v1172_v31  ;;  %v6017_v62 = vsel %vm5829_vm6, %v1219_v15, %v1220_v3  ;;  %4938 = vmatpush3.bf16.xpose.msra.mxu0 %v5908_v20  ;;  %v1162_v21 = vsel %vm5829_vm6, %v4420_v48, %v1161_v22  ;;  %v1163_v9 = vrot.slane %v1161_v22, 4  ;;  %4907 = vmatprep.mubr.msk.bf16.mxu0 %vm720_vm0, %v5989_v51  ;;  %v6061_v24 = vld [vmem:[%s5520_s7 + $0xc4] sm:$0xf]  ;;  %v4624_v49 = vld [vmem:[%s5520_s7 + $0xc0] sm:$0xe] }
  0x7c   : > { %v4456_v12 = vcombine.low %v6000_v19, %v6017_v62  ;;  %v1213_v53 = vrot.slane %v5733_v39, 5  ;;  %5138 = vmatprep.subr.msk.bf16.mxu0 %vm720_vm0, %v4459_v34  ;;  %v6044_v63 = vsel %vm5829_vm6, %v4427_v30, %v1210_v35  ;;  %v1212_v40 = vrot.slane %v1210_v35, 4  ;;  %v6058_v34 = vld [vmem:[%s7696_s1 + $0x30] sm:$0xff]   ;;  %v6099_v33 = vld [vmem:[%s5520_s7 + $0x64] sm:$0xf] }
  0x7d   : > { %v6040_v20 = vsel %vm720_vm0, %v4449_v61, 0  ;;  %v6047_v56 = vsel %vm720_vm0, %v5296_v18, 0  ;;  %v1165_v39 = vsel %vm5829_vm6, %v1163_v9, %v1164_v10  ;;  %v4419_v6 = vrot.slane %v1089_v14, 9  ;;  %v1095_v18 = vld [vmem:[%s5520_s7 + $0x60] sm:$0xe] }
  0x7e   : > { %v1154_v2 = vrot.slane %v5701_v17, 5  ;;  %v1157_v27 = vrot.slane %v5754_v1, 5  ;;  %v4448_v42 = vcombine.low %v1162_v21, %v1165_v39  ;;  %v6065_v16 = vsel %vm5829_vm6, %v1212_v40, %v1213_v53  ;;  %4936 = vmatmul.mubr.msk.bf16.gmra.mxu1 %vm720_vm0, %v5948_v43  ;;  %v6079_v43 = vld [vmem:[%s5520_s7 + $0xc8] sm:$0x1]  ;;  %v1087_v53 = vld [vmem:[%s5520_s7] sm:$0xe] }
  0x7f   : > { %v4426_v17 = vrot.slane %v1096_v44, 9  ;;  %v1203_v47 = vrot.slane %v5723_v59, 5  ;;  %4968 = vmatpush3.bf16.xpose.msra.mxu1 %v5931_v25  ;;  %v4455_v1 = vcombine.low %v6044_v63, %v6065_v16  ;;  %v1206_v3 = vrot.slane %v5772_v7, 5  ;;  %4977 = vmatprep.mubr.msk.bf16.mxu1 %vm720_vm0, %v6024_v41  ;;  %v6109_v14 = vld [vmem:[%s5520_s7 + $0x68] sm:$0x1] }
  0x80   : > { %v1155_v52 = vsel %vm5829_vm6, %v4419_v6, %v1154_v2  ;;  %v1156_v37 = vrot.slane %v1154_v2, 4  ;;  %5149 = vmatprep.subr.msk.bf16.mxu1 %vm720_vm0, %v5288_v60  ;;  %v6084_v59 = vsel %vm720_vm0, %v4448_v42, 0  ;;  %v6091_v7 = vsel %vm720_vm0, %v5300_v58, 0  ;;  %v6210_v38 = vld [vmem:[%s5520_s7 + $0x5c] sm:$0x1] }
  0x81   : > { %v6088_v25 = vsel %vm5829_vm6, %v4426_v17, %v1203_v47  ;;  %v1205_v15 = vrot.slane %v1203_v47, 4  ;;  %v4418_v48 = vrot.slane %v1088_v0, 9  ;;  %v1147_v22 = vrot.slane %v5746_v55, 5  ;;  %v4616_v55 = vld [vmem:[%s5520_s7 + $0x60] sm:$0xe] }
  0x82   : > { %v1158_v31 = vsel %vm5829_vm6, %v1156_v37, %v1157_v27  ;;  %v1150_v10 = vrot.slane %v5794_v28, 5  ;;  %4908 = vmatmul.mubr.msk.bf16.gmra.mxu0 %vm720_vm0, %v5989_v51  ;;  %v4640_v30 = vrot.slane %v4624_v49, 9  ;;  %v2596_v35 = vrot.slane %v6061_v24, 5  ;;  %v6144_v17 = vld [vmem:[%s5520_s7 + $0xb8] sm:$0xf] }
  0x83   : > { %v4447_v60 = vcombine.low %v1155_v52, %v1158_v31  ;;  %v6105_v61 = vsel %vm5829_vm6, %v1205_v15, %v1206_v3  ;;  %4940 = vmatpush3.bf16.xpose.msra.mxu0 %v5958_v45  ;;  %4909 = vmatprep.mubr.msk.bf16.mxu0 %vm720_vm0, %v6058_v34  ;;  %v1148_v51 = vsel %vm5829_vm6, %v4418_v48, %v1147_v22  ;;  %v1149_v21 = vrot.slane %v1147_v22, 4  ;;  %v5291_v45 = vld [vmem:[%s5520_s7 + $0x84] sm:$0xff]   ;;  %v4623_v47 = vld [vmem:[%s5520_s7 + $0xb4] sm:$0xe]  ;;  %v6165_v31 = vld [vmem:[%s5520_s7 + $0xbc] sm:$0x1] }
  0x84   : > { %v4454_v28 = vcombine.low %v6088_v25, %v6105_v61  ;;  %v2599_v9 = vrot.slane %v6079_v43, 5  ;;  %5139 = vmatprep.subr.msk.bf16.mxu0 %vm720_vm0, %v4458_v13  ;;  %v6131_v40 = vsel %vm5829_vm6, %v4640_v30, %v2596_v35  ;;  %v2598_v58 = vrot.slane %v2596_v35, 4  ;;  %v4574_v30 = vld [vmem:[%s5520_s7 + $0xc0] sm:$0xf]  ;;  %v4544_v25 = vld [vmem:[%s5520_s7 + $0x48] sm:$0xf] }
  0x85   : > { %v6127_v44 = vsel %vm720_vm0, %v4447_v60, 0  ;;  %v4425_v0 = vrot.slane %v1095_v18, 9  ;;  %v1151_v39 = vsel %vm5829_vm6, %v1149_v21, %v1150_v10  ;;  %v1196_v6 = vrot.slane %v5767_v4, 5  ;;  %v5301_v4 = vld [vmem:[%s7696_s1 + $0x38] sm:$0xff]  }
  0x86   : > { %v1199_v54 = vrot.slane %v5807_v26, 5  ;;  %v4632_v32 = vrot.slane %v4616_v55, 9  ;;  %v4446_v2 = vcombine.low %v1148_v51, %v1151_v39  ;;  %v6139_v13 = vsel %vm5829_vm6, %v2598_v58, %v2599_v9 }
  0x87   : > { %v2540_v27 = vrot.slane %v6099_v33, 5  ;;  %v2543_v42 = vrot.slane %v6109_v14, 5  ;;  %4970 = vmatpush3.bf16.xpose.msra.mxu1 %v5965_v50  ;;  %v4668_v26 = vcombine.low %v6131_v40, %v6139_v13  ;;  %v6155_v52 = vsel %vm5829_vm6, %v4425_v0, %v1196_v6 }
  0x88   : > { %v1198_v37 = vrot.slane %v1196_v6, 4  ;;  %v4417_v3 = vrot.slane %v1087_v53, 9  ;;  %5150 = vmatprep.subr.msk.bf16.mxu1 %vm720_vm0, %v5291_v45  ;;  %v6159_v49 = vsel %vm720_vm0, %v4446_v2, 0  ;;  %v1140_v18 = vrot.slane %v5781_v11, 5  ;;  %v6190_v53 = vld [vmem:[%s5520_s7 + $0x58] sm:$0xf] }
  0x89   : > { %v2541_v50 = vsel %vm5829_vm6, %v4632_v32, %v2540_v27  ;;  %v2542_v15 = vrot.slane %v2540_v27, 4  ;;  %v1143_v22 = vrot.slane %v5818_v57, 5  ;;  %v4639_v10 = vrot.slane %v4623_v47, 9  ;;  %v4615_v6 = vld [vmem:[%s5520_s7 + $0x54] sm:$0xe] }
  0x8a   : > { %v6169_v48 = vsel %vm5829_vm6, %v1198_v37, %v1199_v54  ;;  %v2589_v60 = vrot.slane %v6144_v17, 5  ;;  %4910 = vmatmul.mubr.msk.bf16.gmra.mxu0 %vm720_vm0, %v6058_v34  ;;  %v1141_v55 = vsel %vm5829_vm6, %v4417_v3, %v1140_v18  ;;  %v1142_v51 = vrot.slane %v1140_v18, 4 }
  0x8b   : > { %v4453_v11 = vcombine.low %v6155_v52, %v6169_v48  ;;  %v2544_v35 = vsel %vm5829_vm6, %v2542_v15, %v2543_v42  ;;  %4942 = vmatpush3.bf16.xpose.msra.mxu0 %v5996_v8  ;;  %4911 = vmatprep.mubr.msk.bf16.mxu0 %vm720_vm0, %v5301_v4  ;;  %v2592_v9 = vrot.slane %v6165_v31, 5  ;;  %v5295_v8 = vld [vmem:[%s5520_s7 + $0x78] sm:$0xff]   ;;  %v2176_v58 = vshrl.u32 %v4574_v30, 16 }
  0x8c   : > { %v4660_v57 = vcombine.low %v2541_v50, %v2544_v35  ;;  %v6186_v34 = vsel %vm5829_vm6, %v4639_v10, %v2589_v60  ;;  %v2591_v21 = vrot.slane %v2589_v60, 4  ;;  %5140 = vmatprep.subr.msk.bf16.mxu0 %vm720_vm0, %v4457_v5  ;;  %v1144_v45 = vsel %vm5829_vm6, %v1142_v51, %v1143_v22  ;;  %v4550_v5 = vld [vmem:[%s5520_s7 + $0x60] sm:$0xf]  ;;  %v4565_v52 = vld [vmem:[%s5520_s7 + $0x9c] sm:$0xf] }
  0x8d   : > { %v2179_v0 = vshll.u32 %v4574_v30, 16  ;;  %v2185_v39 = vshll.u32 %v6061_v24, 16  ;;  %v4445_v32 = vcombine.low %v1141_v55, %v1144_v45  ;;  %v2189_v29 = vshrl.u32 %v6061_v24, 16  ;;  %v6222_v50 = vld [vmem:[%s7696_s1 + $0x40] sm:$0xff]   ;;  %v6234_v45 = vld [vmem:[%s5520_s7 + $0xac] sm:$0xf] }
  0x8e   : > { %v6202_v54 = vsel %vm720_vm0, %v4660_v57, 0  ;;  %v6206_v2 = vsel %vm5829_vm6, %v2591_v21, %v2592_v9  ;;  %v2178_v42 = vrot.slane %v2176_v58, 4  ;;  %v2195_v15 = vshll.u32 %v6079_v43, 16  ;;  %v4622_v57 = vld [vmem:[%s5520_s7 + $0xa8] sm:$0xe] }
  0x8f   : > { %v4667_v27 = vcombine.low %v6186_v34, %v6206_v2  ;;  %v2181_v47 = vrot.slane %v2179_v0, 5  ;;  %v2187_v37 = vrot.slane %v2185_v39, 5  ;;  %4972 = vmatpush3.bf16.xpose.msra.mxu1 %v6003_v46  ;;  %v6217_v3 = vsel %vm720_vm0, %v4445_v32, 0  ;;  %v5299_v32 = vld [vmem:[%s5520_s7 + $0x6c] sm:$0xff]  }
  0x90   : > { %v2191_v24 = vrot.slane %v2189_v29, 4  ;;  %v4631_v18 = vrot.slane %v4615_v6, 9  ;;  %5151 = vmatprep.subr.msk.bf16.mxu1 %vm720_vm0, %v5295_v8  ;;  %v2533_v10 = vrot.slane %v6190_v53, 5  ;;  %v2536_v46 = vrot.slane %v6210_v38, 5 }
  0x91   : > { %v2182_v22 = vor.u32 %v2181_v47, %v2178_v42  ;;  %v1984_v60 = vshrl.u32 %v4550_v5, 16  ;;  %v2197_v35 = vrot.slane %v2195_v15, 5  ;;  %v1987_v55 = vshll.u32 %v4550_v5, 16 }
  0x92   : > { %v2192_v30 = vor.u32 %v2191_v24, %v2187_v37  ;;  %v1993_v51 = vshll.u32 %v6099_v33, 16  ;;  %4912 = vmatmul.mubr.msk.bf16.gmra.mxu0 %vm720_vm0, %v5301_v4  ;;  %v2534_v21 = vsel %vm5829_vm6, %v4631_v18, %v2533_v10  ;;  %v2535_v9 = vrot.slane %v2533_v10, 4  ;;  %v6241_v4 = vld [vmem:[%s5520_s7 + $0xb0] sm:$0x1] }
  0x93   : > { %v2183_v43 = vrot.slane %v2182_v22, 4  ;;  %v1986_v8 = vrot.slane %v1984_v60, 4  ;;  %4944 = vmatpush3.bf16.xpose.msra.mxu0 %v6040_v20  ;;  %4953 = vmatprep.mubr.msk.bf16.mxu0 %vm720_vm0, %v6222_v50  ;;  %v1989_v0 = vrot.slane %v1987_v55, 5  ;;  %v1997_v6 = vshrl.u32 %v6099_v33, 16  ;;  %v4571_v33 = vld [vmem:[%s5520_s7 + $0xb4] sm:$0xf] }
  0x94   : > { %v2193_v58 = vrot.slane %v2192_v30, 4  ;;  %v1995_v39 = vrot.slane %v1993_v51, 5  ;;  %5141 = vmatprep.subr.msk.bf16.mxu0 %vm720_vm0, %v4456_v12  ;;  %v2537_v29 = vsel %vm5829_vm6, %v2535_v9, %v2536_v46  ;;  %v2003_v5 = vshll.u32 %v6109_v14, 16  ;;  %v4614_v22 = vld [vmem:[%s5520_s7 + $0x48] sm:$0xe] }
  0x95   : > { %v2188_v20 = vsel %vm5559_vm3, %v2183_v43, %v2187_v37  ;;  %v4638_v42 = vrot.slane %v4622_v57, 9  ;;  %v4659_v24 = vcombine.low %v2534_v21, %v2537_v29  ;;  %v1990_v19 = vor.u32 %v1989_v0, %v1986_v8  ;;  %v6266_v30 = vld [vmem:[%s5520_s7 + $0x4c] sm:$0xf]  ;;  %v6278_v8 = vld [vmem:[%s5520_s7 + $0x50] sm:$0x1] }
  0x96   : > { %v2198_v47 = vsel %vm5559_vm3, %v2193_v58, %v2197_v35  ;;  %v1999_v62 = vrot.slane %v1997_v6, 4  ;;  %v2005_v12 = vrot.slane %v2003_v5, 5  ;;  %v2582_v18 = vrot.slane %v6234_v45, 5 }
  0x97   : > { %v6256_v15 = vcombine.low %v2188_v20, %v2198_v47  ;;  %v2585_v37 = vrot.slane %v6241_v4, 5  ;;  %4974 = vmatpush3.bf16.xpose.msra.mxu1 %v6047_v56  ;;  %v6263_v14 = vsel %vm720_vm0, %v4659_v24, 0  ;;  %v1991_v10 = vrot.slane %v1990_v19, 4  ;;  %v4547_v20 = vld [vmem:[%s5520_s7 + $0x54] sm:$0xf] }
  0x98   : > { %v2000_v46 = vor.u32 %v1999_v62, %v1995_v39  ;;  %v2152_v60 = vshrl.u32 %v4571_v33, 16  ;;  %5152 = vmatprep.subr.msk.bf16.mxu1 %vm720_vm0, %v5299_v32  ;;  %v6271_v35 = vsel %vm5829_vm6, %v4638_v42, %v2582_v18  ;;  %v2584_v55 = vrot.slane %v2582_v18, 4 }
  0x99   : > { %v2155_v51 = vshll.u32 %v4571_v33, 16  ;;  %v2161_v57 = vshll.u32 %v6144_v17, 16  ;;  %v1996_v56 = vsel %vm5559_vm3, %v1991_v10, %v1995_v39  ;;  %v2165_v9 = vshrl.u32 %v6144_v17, 16 }
  0x9a   : > { %v2001_v43 = vrot.slane %v2000_v46, 4  ;;  %v2154_v21 = vrot.slane %v2152_v60, 4  ;;  %v6282_v58 = vsel %vm5829_vm6, %v2584_v55, %v2585_v37  ;;  %v2171_v32 = vshll.u32 %v6165_v31, 16  ;;  %v4621_v37 = vld [vmem:[%s5520_s7 + $0x9c] sm:$0xe] }
  0x9b   : > { %v2157_v0 = vrot.slane %v2155_v51, 5  ;;  %v2163_v6 = vrot.slane %v2161_v57, 5  ;;  %4946 = vmatpush3.bf16.xpose.msra.mxu0 %v6084_v59  ;;  %v4666_v29 = vcombine.low %v6271_v35, %v6282_v58  ;;  %v2167_v17 = vrot.slane %v2165_v9, 4  ;;  %v6440_v35 = vld [vmem:[%s7696_s1 + $0x78] sm:$0xff]  }
  0x9c   : > { %v2006_v39 = vsel %vm5559_vm3, %v2001_v43, %v2005_v12  ;;  %v4630_v5 = vrot.slane %v4614_v22, 9  ;;  %5142 = vmatprep.subr.msk.bf16.mxu0 %vm720_vm0, %v4455_v1  ;;  %v2173_v33 = vrot.slane %v2171_v32, 5  ;;  %v2526_v59 = vrot.slane %v6266_v30, 5  ;;  %v6303_v1 = vld [vmem:[%s5520_s7 + $0xa0] sm:$0xf] }
  0x9d   : > { %v4596_v42 = vcombine.low %v1996_v56, %v2006_v39  ;;  %v2158_v31 = vor.u32 %v2157_v0, %v2154_v21  ;;  %v2168_v47 = vor.u32 %v2167_v17, %v2163_v6  ;;  %v2529_v24 = vrot.slane %v6278_v8, 5  ;;  %v6319_v56 = vld [vmem:[%s5520_s7 + $0xa4] sm:$0x1]  ;;  %v6329_v0 = vld [vmem:[%s7696_s1 + $0x68] sm:$0xff]  }
  0x9e   : > { %v1960_v19 = vshrl.u32 %v4547_v20, 16  ;;  %v1963_v62 = vshll.u32 %v4547_v20, 16  ;;  %v2527_v63 = vsel %vm5829_vm6, %v4630_v5, %v2526_v59  ;;  %v2528_v16 = vrot.slane %v2526_v59, 4  ;;  %v6338_v5 = vld [vmem:[%s5520_s7 + $0x40] sm:$0xf] }
  0x9f   : > { %v6298_v12 = vsel %vm720_vm0, %v4596_v42, 0  ;;  %v2159_v18 = vrot.slane %v2158_v31, 4  ;;  %4976 = vmatpush3.bf16.xpose.msra.mxu1 %v6091_v7  ;;  %v2169_v22 = vrot.slane %v2168_v47, 4  ;;  %v1969_v60 = vshll.u32 %v6190_v53, 16  ;;  %v4613_v59 = vld [vmem:[%s5520_s7 + $0x3c] sm:$0xe] }
  0xa0   : > { %v1962_v10 = vrot.slane %v1960_v19, 4  ;;  %v1965_v46 = vrot.slane %v1963_v62, 5  ;;  %5161 = vmatprep.subr.msk.bf16.mxu1 %vm720_vm0, %v4668_v26  ;;  %v2530_v51 = vsel %vm5829_vm6, %v2528_v16, %v2529_v24  ;;  %v1973_v57 = vshrl.u32 %v6190_v53, 16  ;;  %v4568_v26 = vld [vmem:[%s5520_s7 + $0xa8] sm:$0xf] }
  0xa1   : > { %v2164_v55 = vsel %vm5559_vm3, %v2159_v18, %v2163_v6  ;;  %v1979_v7 = vshll.u32 %v6210_v38, 16  ;;  %v2174_v43 = vsel %vm5559_vm3, %v2169_v22, %v2173_v33  ;;  %v4658_v21 = vcombine.low %v2527_v63, %v2530_v51  ;;  %v6354_v18 = vld [vmem:[%s5520_s7 + $0x44] sm:$0x1] }
  0xa2   : > { %v1966_v40 = vor.u32 %v1965_v46, %v1962_v10  ;;  %v1971_v13 = vrot.slane %v1969_v60, 5  ;;  %v6324_v9 = vcombine.low %v2164_v55, %v2174_v43  ;;  %v1975_v53 = vrot.slane %v1973_v57, 4 }
  0xa3   : > { %v1981_v38 = vrot.slane %v1979_v7, 5  ;;  %v4637_v6 = vrot.slane %v4621_v37, 9  ;;  %4948 = vmatpush3.bf16.xpose.msra.mxu0 %v6127_v44  ;;  %v6333_v32 = vsel %vm720_vm0, %v4658_v21, 0  ;;  %v2575_v39 = vrot.slane %v6303_v1, 5  ;;  %v6385_v21 = vld [vmem:[%s5520_s7 + $0x94] sm:$0xf] }
  0xa4   : > { %v1967_v20 = vrot.slane %v1966_v40, 4  ;;  %v2578_v17 = vrot.slane %v6319_v56, 5  ;;  %5143 = vmatprep.subr.msk.bf16.mxu0 %vm720_vm0, %v4454_v28  ;;  %v1976_v42 = vor.u32 %v1975_v53, %v1971_v13  ;;  %v2128_v31 = vshrl.u32 %v4568_v26, 16  ;;  %v4620_v40 = vld [vmem:[%s5520_s7 + $0x90] sm:$0xe] }
  0xa5   : > { %v2131_v44 = vshll.u32 %v4568_v26, 16  ;;  %v2137_v33 = vshll.u32 %v6234_v45, 16  ;;  %v6350_v24 = vsel %vm5829_vm6, %v4637_v6, %v2575_v39  ;;  %v2577_v19 = vrot.slane %v2575_v39, 4 }
  0xa6   : > { %v1972_v47 = vsel %vm5559_vm3, %v1967_v20, %v1971_v13  ;;  %v2141_v62 = vshrl.u32 %v6234_v45, 16  ;;  %4978 = vmatmul.mubr.msk.bf16.vlgmr.msra.gmra.mxu1 %vm720_vm0, %v6024_v41  ;;  %v1977_v61 = vrot.slane %v1976_v42, 4  ;;  %v2130_v28 = vrot.slane %v2128_v31, 4 }
  0xa7   : > { %v2133_v63 = vrot.slane %v2131_v44, 5  ;;  %v2139_v16 = vrot.slane %v2137_v33, 5  ;;  %5010 = vmatpush3.bf16.xpose.msra.mxu1 %v6202_v54  ;;  %4979 = vmatprep.mubr.msk.bf16.mxu1 %vm720_vm0, %v6329_v0  ;;  %v6364_v37 = vsel %vm5829_vm6, %v2577_v19, %v2578_v17  ;;  %v2147_v22 = vshll.u32 %v6241_v4, 16  ;;  %v6403_v17 = vld [vmem:[%s5520_s7 + $0x98] sm:$0x1] }
  0xa8   : > { %v2143_v45 = vrot.slane %v2141_v62, 4  ;;  %v4629_v10 = vrot.slane %v4613_v59, 9  ;;  %5162 = vmatprep.subr.msk.bf16.mxu1 %vm720_vm0, %v4667_v27  ;;  %v1982_v41 = vsel %vm5559_vm3, %v1977_v61, %v1981_v38  ;;  %v4665_v54 = vcombine.low %v6350_v24, %v6364_v37  ;;  %v6382_v27 = vld [vmem:[%s7696_s1 + $0x70] sm:$0xff]  }
  0xa9   : > { %v2134_v46 = vor.u32 %v2133_v63, %v2130_v28  ;;  %v2519_v60 = vrot.slane %v6338_v5, 5  ;;  %v4595_v55 = vcombine.low %v1972_v47, %v1982_v41  ;;  %v2149_v4 = vrot.slane %v2147_v22, 5  ;;  %v6426_v28 = vld [vmem:[%s5520_s7 + $0x34] sm:$0xf]  ;;  %v4612_v63 = vld [vmem:[%s5520_s7 + $0x30] sm:$0xe] }
  0xaa   : > { %v2144_v51 = vor.u32 %v2143_v45, %v2139_v16  ;;  %v2522_v57 = vrot.slane %v6354_v18, 5  ;;  %v1936_v43 = vshrl.u32 %v4544_v25, 16  ;;  %v1939_v53 = vshll.u32 %v4544_v25, 16  ;;  %v6435_v41 = vld [vmem:[%s5520_s7 + $0x38] sm:$0x1] }
  0xab   : > { %v2135_v7 = vrot.slane %v2134_v46, 4  ;;  %v2520_v34 = vsel %vm5829_vm6, %v4629_v10, %v2519_v60  ;;  %v2521_v2 = vrot.slane %v2519_v60, 4  ;;  %4950 = vmatpush3.bf16.xpose.msra.mxu0 %v6159_v49  ;;  %v6390_v13 = vsel %vm720_vm0, %v4595_v55, 0  ;;  %v4562_v37 = vld [vmem:[%s5520_s7 + $0x90] sm:$0xf] }
  0xac   : > { %v2145_v26 = vrot.slane %v2144_v51, 4  ;;  %v1945_v38 = vshll.u32 %v6266_v30, 16  ;;  %5144 = vmatprep.subr.msk.bf16.mxu0 %vm720_vm0, %v4453_v11  ;;  %v1938_v39 = vrot.slane %v1936_v43, 4  ;;  %v1949_v49 = vshrl.u32 %v6266_v30, 16 }
  0xad   : > { %v2140_v6 = vsel %vm5559_vm3, %v2135_v7, %v2139_v16  ;;  %v2523_v20 = vsel %vm5829_vm6, %v2521_v2, %v2522_v57  ;;  %v1941_v44 = vrot.slane %v1939_v53, 5  ;;  %v1955_v59 = vshll.u32 %v6278_v8, 16  ;;  %v4541_v7 = vld [vmem:[%s5520_s7 + $0x3c] sm:$0xf] }
  0xae   : > { %v2150_v42 = vsel %vm5559_vm3, %v2145_v26, %v2149_v4  ;;  %v4657_v31 = vcombine.low %v2520_v34, %v2523_v20  ;;  %v1947_v33 = vrot.slane %v1945_v38, 5  ;;  %4980 = vmatmul.mubr.msk.bf16.gmra.mxu1 %vm720_vm0, %v6329_v0  ;;  %v1951_v11 = vrot.slane %v1949_v49, 4  ;;  %v6465_v20 = vld [vmem:[%s7696_s1 + $0x48] sm:$0xff]  }
  0xaf   : > { %v6410_v48 = vcombine.low %v2140_v6, %v2150_v42  ;;  %v4636_v30 = vrot.slane %v4620_v40, 9  ;;  %5012 = vmatpush3.bf16.xpose.msra.mxu1 %v6263_v14  ;;  %4981 = vmatprep.mubr.msk.bf16.mxu1 %vm720_vm0, %v6382_v27  ;;  %v1942_v19 = vor.u32 %v1941_v44, %v1938_v39  ;;  %v2568_v0 = vrot.slane %v6385_v21, 5  ;;  %v4619_v44 = vld [vmem:[%s5520_s7 + $0x84] sm:$0xe] }
  0xb0   : > { %v6415_v47 = vsel %vm720_vm0, %v4657_v31, 0  ;;  %v2571_v62 = vrot.slane %v6403_v17, 5  ;;  %5163 = vmatprep.subr.msk.bf16.mxu1 %vm720_vm0, %v4666_v29  ;;  %v1952_v8 = vor.u32 %v1951_v11, %v1947_v33  ;;  %v1957_v25 = vrot.slane %v1955_v59, 5  ;;  %v6476_v31 = vld [vmem:[%s5520_s7 + $0x88] sm:$0xf] }
  0xb1   : > { %v2104_v14 = vshrl.u32 %v4565_v52, 16  ;;  %v2107_v61 = vshll.u32 %v4565_v52, 16  ;;  %v1943_v16 = vrot.slane %v1942_v19, 4  ;;  %v6431_v45 = vsel %vm5829_vm6, %v4636_v30, %v2568_v0  ;;  %v6487_v59 = vld [vmem:[%s5520_s7 + $0x8c] sm:$0x1] }
  0xb2   : > { %v2570_v22 = vrot.slane %v2568_v0, 4  ;;  %v2113_v10 = vshll.u32 %v6303_v1, 16  ;;  %v1953_v58 = vrot.slane %v1952_v8, 4  ;;  %v2117_v60 = vshrl.u32 %v6303_v1, 16 }
  0xb3   : > { %v2106_v29 = vrot.slane %v2104_v14, 4  ;;  %v2109_v46 = vrot.slane %v2107_v61, 5  ;;  %4952 = vmatpush3.bf16.xpose.msra.mxu0 %v6217_v3  ;;  %v1948_v55 = vsel %vm5559_vm3, %v1943_v16, %v1947_v33  ;;  %v2123_v57 = vshll.u32 %v6319_v56, 16  ;;  %v4611_v16 = vld [vmem:[%s5520_s7 + $0x24] sm:$0xe] }
  0xb4   : > { %v6448_v51 = vsel %vm5829_vm6, %v2570_v22, %v2571_v62  ;;  %v2115_v4 = vrot.slane %v2113_v10, 5  ;;  %5153 = vmatprep.subr.msk.bf16.mxu0 %vm720_vm0, %v6256_v15  ;;  %v1958_v34 = vsel %vm5559_vm3, %v1953_v58, %v1957_v25  ;;  %v2119_v2 = vrot.slane %v2117_v60, 4 }
  0xb5   : > { %v4664_v3 = vcombine.low %v6431_v45, %v6448_v51  ;;  %v2110_v1 = vor.u32 %v2109_v46, %v2106_v29  ;;  %v4594_v43 = vcombine.low %v1948_v55, %v1958_v34  ;;  %v2125_v40 = vrot.slane %v2123_v57, 5  ;;  %v5306_v34 = vld [vmem:[%s7696_s1 + $0x50] sm:$0xff]  }
  0xb6   : > { %v4628_v26 = vrot.slane %v4612_v63, 9  ;;  %v2512_v53 = vrot.slane %v6426_v28, 5  ;;  %4982 = vmatmul.mubr.msk.bf16.gmra.mxu1 %vm720_vm0, %v6382_v27  ;;  %v2120_v15 = vor.u32 %v2119_v2, %v2115_v4  ;;  %v2515_v38 = vrot.slane %v6435_v41, 5 }
  0xb7   : > { %v2111_v56 = vrot.slane %v2110_v1, 4  ;;  %v1912_v6 = vshrl.u32 %v4541_v7, 16  ;;  %5014 = vmatpush3.bf16.xpose.msra.mxu1 %v6333_v32  ;;  %v6469_v39 = vsel %vm720_vm0, %v4594_v43, 0  ;;  %4983 = vmatprep.mubr.msk.bf16.mxu1 %vm720_vm0, %v6440_v35  ;;  %v1915_v42 = vshll.u32 %v4541_v7, 16  ;;  %v6521_v7 = vld [vmem:[%s5520_s7 + $0x28] sm:$0xf] }
  0xb8   : > { %v2513_v49 = vsel %vm5829_vm6, %v4628_v26, %v2512_v53  ;;  %v2514_v27 = vrot.slane %v2512_v53, 4  ;;  %5164 = vmatprep.subr.msk.bf16.mxu1 %vm720_vm0, %v4665_v54  ;;  %v2121_v33 = vrot.slane %v2120_v15, 4  ;;  %v1921_v11 = vshll.u32 %v6338_v5, 16  ;;  %v6497_v54 = vld [vmem:[%s7696_s1 + $0xa0] sm:$0xff]  }
  0xb9   : > { %v2116_v32 = vsel %vm5559_vm3, %v2111_v56, %v2115_v4  ;;  %v1914_v52 = vrot.slane %v1912_v6, 4  ;;  %v1917_v19 = vrot.slane %v1915_v42, 5  ;;  %v1925_v0 = vshrl.u32 %v6338_v5, 16  ;;  %v4538_v56 = vld [vmem:[%s5520_s7 + $0x30] sm:$0xf] }
  0xba   : > { %v2516_v30 = vsel %vm5829_vm6, %v2514_v27, %v2515_v38  ;;  %v1931_v24 = vshll.u32 %v6354_v18, 16  ;;  %4954 = vmatmul.mubr.msk.bf16.vlgmr.msra.gmra.mxu0 %vm720_vm0, %v6222_v50  ;;  %v2126_v62 = vsel %vm5559_vm3, %v2121_v33, %v2125_v40  ;;  %v1923_v25 = vrot.slane %v1921_v11, 5  ;;  %v6530_v40 = vld [vmem:[%s5520_s7 + $0x2c] sm:$0x1]  ;;  %v6553_v33 = vld [vmem:[%s5520_s7 + $0x7c] sm:$0xf] }
  0xbb   : > { %v4656_v8 = vcombine.low %v2513_v49, %v2516_v30  ;;  %v4635_v14 = vrot.slane %v4619_v44, 9  ;;  %4986 = vmatpush3.bf16.xpose.msra.mxu0 %v6298_v12  ;;  %4955 = vmatprep.mubr.msk.bf16.mxu0 %vm720_vm0, %v6465_v20  ;;  %v6506_v5 = vcombine.low %v2116_v32, %v2126_v62  ;;  %v1918_v18 = vor.u32 %v1917_v19, %v1914_v52  ;;  %v6556_v52 = vld [vmem:[%s5520_s7 + $0x80] sm:$0x1] }
  0xbc   : > { %v1927_v61 = vrot.slane %v1925_v0, 4  ;;  %v1933_v63 = vrot.slane %v1931_v24, 5  ;;  %5154 = vmatprep.subr.msk.bf16.mxu0 %vm720_vm0, %v6324_v9  ;;  %v2561_v22 = vrot.slane %v6476_v31, 5  ;;  %v2564_v10 = vrot.slane %v6487_v59, 5 }
  0xbd   : > { %v2700_v50 = vsel %vm720_vm0, %v4656_v8, 0  ;;  %v2080_v12 = vshrl.u32 %v4562_v37, 16  ;;  %v1919_v58 = vrot.slane %v1918_v18, 4  ;;  %v2083_v46 = vshll.u32 %v4562_v37, 16  ;;  %v4559_v18 = vld [vmem:[%s5520_s7 + $0x84] sm:$0xf] }
  0xbe   : > { %v1928_v29 = vor.u32 %v1927_v61, %v1923_v25  ;;  %v2089_v60 = vshll.u32 %v6385_v21, 16  ;;  %4984 = vmatmul.mubr.msk.bf16.gmra.mxu1 %vm720_vm0, %v6440_v35  ;;  %v2562_v55 = vsel %vm5829_vm6, %v4635_v14, %v2561_v22  ;;  %v2563_v9 = vrot.slane %v2561_v22, 4  ;;  %v5308_v61 = vld [vmem:[%s7696_s1 + $0x58] sm:$0xff]  }
  0xbf   : > { %v2082_v4 = vrot.slane %v2080_v12, 4  ;;  %v2093_v57 = vshrl.u32 %v6385_v21, 16  ;;  %5016 = vmatpush3.bf16.xpose.msra.mxu1 %v6415_v47  ;;  %v1924_v1 = vsel %vm5559_vm3, %v1919_v58, %v1923_v25  ;;  %v2085_v2 = vrot.slane %v2083_v46, 5  ;;  %5025 = vmatprep.mubr.msk.bf16.mxu1 %vm720_vm0, %v6497_v54 }
  0xc0   : > { %v1929_v35 = vrot.slane %v1928_v29, 4  ;;  %v2091_v43 = vrot.slane %v2089_v60, 5  ;;  %5165 = vmatprep.subr.msk.bf16.mxu1 %vm720_vm0, %v4664_v3  ;;  %v2565_v21 = vsel %vm5829_vm6, %v2563_v9, %v2564_v10  ;;  %v2099_v26 = vshll.u32 %v6403_v17, 16  ;;  %v6584_v9 = vld [vmem:[%s5520_s7 + $0x1c] sm:$0xf] }
  0xc1   : > { %v2095_v47 = vrot.slane %v2093_v57, 4  ;;  %v4627_v53 = vrot.slane %v4611_v16, 9  ;;  %v4663_v38 = vcombine.low %v2562_v55, %v2565_v21  ;;  %v2086_v6 = vor.u32 %v2085_v2, %v2082_v4 }
  0xc2   : > { %v1934_v15 = vsel %vm5559_vm3, %v1929_v35, %v1933_v63  ;;  %v2505_v45 = vrot.slane %v6521_v7, 5  ;;  %4956 = vmatmul.mubr.msk.bf16.gmra.mxu0 %vm720_vm0, %v6465_v20  ;;  %v2101_v49 = vrot.slane %v2099_v26, 5  ;;  %v2508_v17 = vrot.slane %v6530_v40, 5  ;;  %v4618_v20 = vld [vmem:[%s5520_s7 + $0x78] sm:$0xe] }
  0xc3   : > { %v4593_v51 = vcombine.low %v1924_v1, %v1934_v15  ;;  %v2096_v3 = vor.u32 %v2095_v47, %v2091_v43  ;;  %4988 = vmatpush3.bf16.xpose.msra.mxu0 %v6390_v13  ;;  %4957 = vmatprep.mubr.msk.bf16.mxu0 %vm720_vm0, %v5306_v34  ;;  %v2087_v27 = vrot.slane %v2086_v6, 4  ;;  %v1888_v32 = vshrl.u32 %v4538_v56, 16  ;;  %v4610_v47 = vld [vmem:[%s5520_s7 + $0x18] sm:$0xe]  ;;  %v4535_v15 = vld [vmem:[%s5520_s7 + $0x24] sm:$0xf] }
  0xc4   : > { %v2506_v42 = vsel %vm5829_vm6, %v4627_v53, %v2505_v45  ;;  %v2507_v44 = vrot.slane %v2505_v45, 4  ;;  %5155 = vmatprep.subr.msk.bf16.mxu0 %vm720_vm0, %v6410_v48  ;;  %v1891_v30 = vshll.u32 %v4538_v56, 16  ;;  %v1897_v19 = vshll.u32 %v6426_v28, 16  ;;  %v6602_v56 = vld [vmem:[%s5520_s7 + $0x20] sm:$0x1] }
  0xc5   : > { %v6562_v11 = vsel %vm720_vm0, %v4593_v51, 0  ;;  %v2097_v13 = vrot.slane %v2096_v3, 4  ;;  %v2092_v0 = vsel %vm5559_vm3, %v2087_v27, %v2091_v43  ;;  %v1890_v37 = vrot.slane %v1888_v32, 4  ;;  %v6613_v32 = vld [vmem:[%s7696_s1 + $0x80] sm:$0xff]  }
  0xc6   : > { %v2509_v24 = vsel %vm5829_vm6, %v2507_v44, %v2508_v17  ;;  %v1901_v62 = vshrl.u32 %v6426_v28, 16  ;;  %v1893_v25 = vrot.slane %v1891_v30, 5  ;;  %v1899_v14 = vrot.slane %v1897_v19, 5  ;;  %v4617_v44 = vld [vmem:[%s5520_s7 + $0x6c] sm:$0xe] }
  0xc7   : > { %v2102_v8 = vsel %vm5559_vm3, %v2097_v13, %v2101_v49  ;;  %v4655_v48 = vcombine.low %v2506_v42, %v2509_v24  ;;  %5018 = vmatpush3.bf16.xpose.msra.mxu1 %v2700_v50  ;;  %v1907_v22 = vshll.u32 %v6435_v41, 16  ;;  %v4634_v10 = vrot.slane %v4618_v20, 9  ;;  %v6623_v24 = vld [vmem:[%s5520_s7 + $0x74] sm:$0x1] }
  0xc8   : > { %v6576_v63 = vcombine.low %v2092_v0, %v2102_v8  ;;  %v1903_v16 = vrot.slane %v1901_v62, 4  ;;  %5166 = vmatprep.subr.msk.bf16.mxu1 %vm720_vm0, %v4663_v38  ;;  %v1894_v12 = vor.u32 %v1893_v25, %v1890_v37  ;;  %v2554_v58 = vrot.slane %v6553_v33, 5  ;;  %v6620_v0 = vld [vmem:[%s5520_s7 + $0x70] sm:$0xf]  ;;  %v4556_v37 = vld [vmem:[%s5520_s7 + $0x78] sm:$0xf] }
  0xc9   : > { %v2697_v28 = vsel %vm720_vm0, %v4655_v48, 0  ;;  %v2557_v29 = vrot.slane %v6556_v52, 5  ;;  %v1909_v60 = vrot.slane %v1907_v22, 5  ;;  %v2056_v55 = vshrl.u32 %v4559_v18, 16 }
  0xca   : > { %v1904_v46 = vor.u32 %v1903_v16, %v1899_v14  ;;  %v2059_v50 = vshll.u32 %v4559_v18, 16  ;;  %4958 = vmatmul.mubr.msk.bf16.gmra.mxu0 %vm720_vm0, %v5306_v34  ;;  %v1895_v41 = vrot.slane %v1894_v12, 4  ;;  %v2555_v4 = vsel %vm5829_vm6, %v4634_v10, %v2554_v58 }
  0xcb   : > { %v2556_v57 = vrot.slane %v2554_v58, 4  ;;  %v2065_v1 = vshll.u32 %v6476_v31, 16  ;;  %4990 = vmatpush3.bf16.xpose.msra.mxu0 %v6469_v39  ;;  %4959 = vmatprep.mubr.msk.bf16.mxu0 %vm720_vm0, %v5308_v61  ;;  %v2058_v2 = vrot.slane %v2056_v55, 4  ;;  %v2069_v21 = vshrl.u32 %v6476_v31, 16 }
  0xcc   : > { %v1905_v35 = vrot.slane %v1904_v46, 4  ;;  %v2061_v43 = vrot.slane %v2059_v50, 5  ;;  %5156 = vmatprep.subr.msk.bf16.mxu0 %vm720_vm0, %v6506_v5  ;;  %v1900_v34 = vsel %vm5559_vm3, %v1895_v41, %v1899_v14  ;;  %v2075_v39 = vshll.u32 %v6487_v59, 16  ;;  %v6645_v50 = vld [vmem:[%s5520_s7 + $0x10] sm:$0xf] }
  0xcd   : > { %v2558_v26 = vsel %vm5829_vm6, %v2556_v57, %v2557_v29  ;;  %v2067_v53 = vrot.slane %v2065_v1, 5  ;;  %v2071_v45 = vrot.slane %v2069_v21, 4  ;;  %v4626_v3 = vrot.slane %v4610_v47, 9  ;;  %v4609_v1 = vld [vmem:[%s5520_s7 + $0xc] sm:$0xe] }
  0xce   : > { %v1910_v31 = vsel %vm5559_vm3, %v1905_v35, %v1909_v60  ;;  %v4662_v38 = vcombine.low %v2555_v4, %v2558_v26  ;;  %v2062_v6 = vor.u32 %v2061_v43, %v2058_v2  ;;  %v2077_v51 = vrot.slane %v2075_v39, 5  ;;  %v6653_v47 = vld [vmem:[%s5520_s7 + $0x14] sm:$0x1] }
  0xcf   : > { %v4592_v5 = vcombine.low %v1900_v34, %v1910_v31  ;;  %v2498_v49 = vrot.slane %v6584_v9, 5  ;;  %5020 = vmatpush3.bf16.xpose.msra.mxu1 %v2697_v28  ;;  %v2072_v17 = vor.u32 %v2071_v45, %v2067_v53  ;;  %v2501_v27 = vrot.slane %v6602_v56, 5 }
  0xd0   : > { %v2063_v59 = vrot.slane %v2062_v6, 4  ;;  %v1864_v42 = vshrl.u32 %v4535_v15, 16  ;;  %5167 = vmatprep.subr.msk.bf16.mxu1 %vm720_vm0, %v4662_v38  ;;  %v1867_v19 = vshll.u32 %v4535_v15, 16  ;;  %v1873_v25 = vshll.u32 %v6521_v7, 16  ;;  %v4532_v15 = vld [vmem:[%s5520_s7 + $0x18] sm:$0xf] }
  0xd1   : > { %v2298_v20 = vsel %vm720_vm0, %v4592_v5, 0  ;;  %v2499_v13 = vsel %vm5829_vm6, %v4626_v3, %v2498_v49  ;;  %v2500_v30 = vrot.slane %v2498_v49, 4  ;;  %v2073_v8 = vrot.slane %v2072_v17, 4 }
  0xd2   : > { %v2068_v62 = vsel %vm5559_vm3, %v2063_v59, %v2067_v53  ;;  %v1866_v48 = vrot.slane %v1864_v42, 4  ;;  %4960 = vmatmul.mubr.msk.bf16.gmra.mxu0 %vm720_vm0, %v5308_v61  ;;  %v1869_v18 = vrot.slane %v1867_v19, 5  ;;  %v1877_v16 = vshrl.u32 %v6521_v7, 16  ;;  %v4782_v42 = vld [vmem:[%s5520_s7 + $0xcc] sm:$0xf] }
  0xd3   : > { %v2502_v14 = vsel %vm5829_vm6, %v2500_v30, %v2501_v27  ;;  %v1883_v22 = vshll.u32 %v6530_v40, 16  ;;  %4992 = vmatpush3.bf16.xpose.msra.mxu0 %v6562_v11  ;;  %v2078_v10 = vsel %vm5559_vm3, %v2073_v8, %v2077_v51  ;;  %v1875_v12 = vrot.slane %v1873_v25, 5  ;;  %5001 = vmatprep.mubr.msk.bf16.mxu0 %vm720_vm0, %v6613_v32  ;;  %v6671_v19 = vld [vmem:[%s5520_s7 + $0xd0] sm:$0xf] }
  0xd4   : > { %v4654_v28 = vcombine.low %v2499_v13, %v2502_v14  ;;  %v4633_v58 = vrot.slane %v4617_v44, 9  ;;  %5157 = vmatprep.subr.msk.bf16.mxu0 %vm720_vm0, %v6576_v63  ;;  %v4599_v61 = vcombine.low %v2068_v62, %v2078_v10  ;;  %v1870_v7 = vor.u32 %v1869_v18, %v1866_v48 }
  0xd5   : > { %v1879_v29 = vrot.slane %v1877_v16, 4  ;;  %v1885_v40 = vrot.slane %v1883_v22, 5  ;;  %v2547_v46 = vrot.slane %v6620_v0, 5  ;;  %v2550_v60 = vrot.slane %v6623_v24, 5 }
  0xd6   : > { %v2694_v11 = vsel %vm720_vm0, %v4654_v28, 0  ;;  %v2032_v55 = vshrl.u32 %v4556_v37, 16  ;;  %v1871_v41 = vrot.slane %v1870_v7, 4  ;;  %v2035_v57 = vshll.u32 %v4556_v37, 16 }
  0xd7   : > { %v1880_v4 = vor.u32 %v1879_v29, %v1875_v12  ;;  %v2041_v63 = vshll.u32 %v6553_v33, 16  ;;  %5022 = vmatpush3.bf16.xpose.msra.mxu1 %v2694_v11  ;;  %v2548_v35 = vsel %vm5829_vm6, %v4633_v58, %v2547_v46  ;;  %v2549_v2 = vrot.slane %v2547_v46, 4 }
  0xd8   : > { %v2034_v43 = vrot.slane %v2032_v55, 4  ;;  %v2045_v21 = vshrl.u32 %v6553_v33, 16  ;;  %v1876_v34 = vsel %vm5559_vm3, %v1871_v41, %v1875_v12  ;;  %v2037_v53 = vrot.slane %v2035_v57, 5  ;;  %v6683_v12 = vld [vmem:[%s5520_s7 + $0xd4] sm:$0x1] }
  0xd9   : > { %v1881_v26 = vrot.slane %v1880_v4, 4  ;;  %v2043_v39 = vrot.slane %v2041_v63, 5  ;;  %v2551_v31 = vsel %vm5829_vm6, %v2549_v2, %v2550_v60  ;;  %v2051_v6 = vshll.u32 %v6556_v52, 16 }
  0xda   : > { %v2047_v38 = vrot.slane %v2045_v21, 4  ;;  %v4625_v45 = vrot.slane %v4609_v1, 9  ;;  %v4661_v5 = vcombine.low %v2548_v35, %v2551_v31  ;;  %v2038_v51 = vor.u32 %v2037_v53, %v2034_v43 }
  0xdb   : > { %v1886_v33 = vsel %vm5559_vm3, %v1881_v26, %v1885_v40  ;;  %v2491_v3 = vrot.slane %v6645_v50, 5  ;;  %4994 = vmatpush3.bf16.xpose.msra.mxu0 %v2298_v20  ;;  %v2053_v17 = vrot.slane %v2051_v6, 5  ;;  %v2494_v27 = vrot.slane %v6653_v47, 5  ;;  %v6695_v26 = vld [vmem:[%s7696_s1 + $0xa8] sm:$0xff]  }
  0xdc   : > { %v4591_v49 = vcombine.low %v1876_v34, %v1886_v33  ;;  %v2048_v59 = vor.u32 %v2047_v38, %v2043_v39  ;;  %5158 = vmatprep.subr.msk.bf16.mxu0 %vm720_vm0, %v4599_v61  ;;  %5168 = vmatprep.subr.msk.bf16.mxu1 %vm720_vm0, %v4661_v5  ;;  %v2039_v52 = vrot.slane %v2038_v51, 4  ;;  %v1840_v30 = vshrl.u32 %v4532_v15, 16  ;;  %v4758_v38 = vld [vmem:[%s5520_s7 + $0x6c] sm:$0xf]  ;;  %v6704_v51 = vld [vmem:[%s5520_s7 + $0x70] sm:$0xf] }
  0xdd   : > { %v2492_v44 = vsel %vm5829_vm6, %v4625_v45, %v2491_v3  ;;  %v2493_v13 = vrot.slane %v2491_v3, 4  ;;  %v1843_v62 = vshll.u32 %v4532_v15, 16  ;;  %v1849_v8 = vshll.u32 %v6584_v9, 16 }
  0xde   : > { %v2295_v20 = vsel %vm720_vm0, %v4591_v49, 0  ;;  %v2049_v37 = vrot.slane %v2048_v59, 4  ;;  %v2044_v48 = vsel %vm5559_vm3, %v2039_v52, %v2043_v39  ;;  %v1842_v14 = vrot.slane %v1840_v30, 4 }
  0xdf   : > { %v2495_v25 = vsel %vm5829_vm6, %v2493_v13, %v2494_v27  ;;  %v1853_v18 = vshrl.u32 %v6584_v9, 16  ;;  %v1845_v10 = vrot.slane %v1843_v62, 5  ;;  %v1851_v28 = vrot.slane %v1849_v8, 5  ;;  %v4553_v9 = vld [vmem:[%s5520_s7 + $0x6c] sm:$0xf] }
  0xe0   : > { %v2054_v16 = vsel %vm5559_vm3, %v2049_v37, %v2053_v17  ;;  %v4653_v22 = vcombine.low %v2492_v44, %v2495_v25  ;;  %v1859_v7 = vshll.u32 %v6602_v56, 16  ;;  %v3527_v29 = vshrl.u32 %v4782_v42, 16  ;;  %v6709_v44 = vld [vmem:[%s5520_s7 + $0x74] sm:$0x1]  ;;  %v4529_v8 = vld [vmem:[%s5520_s7 + $0xc] sm:$0xf] }
  0xe1   : > { %v4598_v58 = vcombine.low %v2044_v48, %v2054_v16  ;;  %v1855_v61 = vrot.slane %v1853_v18, 4  ;;  %v1846_v11 = vor.u32 %v1845_v10, %v1842_v14  ;;  %v3530_v46 = vshll.u32 %v4782_v42, 16 }
  0xe2   : > { %v2691_v40 = vsel %vm720_vm0, %v4653_v22, 0  ;;  %v3536_v60 = vshll.u32 %v6671_v19, 16  ;;  %v1861_v41 = vrot.slane %v1859_v7, 5  ;;  %v3529_v4 = vrot.slane %v3527_v29, 4 }
  0xe3   : > { %5024 = vmatpush3.bf16.xpose.msra.mxu1 %v2691_v40  ;;  %v1856_v55 = vor.u32 %v1855_v61, %v1851_v28  ;;  %v3540_v57 = vshrl.u32 %v6671_v19, 16  ;;  %4996 = vmatpush3.bf16.xpose.msra.mxu0 %v2295_v20  ;;  %v1847_v63 = vrot.slane %v1846_v11, 4  ;;  %v3532_v1 = vrot.slane %v3530_v46, 5  ;;  %v4779_v11 = vld [vmem:[%s5520_s7 + $0xc0] sm:$0xf]  ;;  %v6731_v46 = vld [vmem:[%s7696_s1 + $0xb0] sm:$0xff]  }
  0xe4   : > { %v3538_v35 = vrot.slane %v3536_v60, 5  ;;  %v3546_v56 = vshll.u32 %v6683_v12, 16  ;;  %5159 = vmatprep.subr.msk.bf16.mxu0 %vm720_vm0, %v4598_v58  ;;  %v2008_v21 = vshrl.u32 %v4553_v9, 16  ;;  %v2011_v34 = vshll.u32 %v4553_v9, 16 }
  0xe5   : > { %v1857_v2 = vrot.slane %v1856_v55, 4  ;;  %v3542_v43 = vrot.slane %v3540_v57, 4  ;;  %v1852_v53 = vsel %vm5559_vm3, %v1847_v63, %v1851_v28  ;;  %v3533_v39 = vor.u32 %v3532_v1, %v3529_v4  ;;  %v6735_v4 = vld [vmem:[%s5520_s7 + $0xc4] sm:$0xf] }
  0xe6   : > { %v3548_v15 = vrot.slane %v3546_v56, 5  ;;  %v2017_v31 = vshll.u32 %v6620_v0, 16  ;;  %v2010_v33 = vrot.slane %v2008_v21, 4  ;;  %v2013_v5 = vrot.slane %v2011_v34, 5  ;;  %v6741_v56 = vld [vmem:[%s5520_s7 + $0xc8] sm:$0x1] }
  0xe7   : > { %v1862_v6 = vsel %vm5559_vm3, %v1857_v2, %v1861_v41  ;;  %v3543_v45 = vor.u32 %v3542_v43, %v3538_v35  ;;  %v3534_v49 = vrot.slane %v3533_v39, 4  ;;  %v2021_v17 = vshrl.u32 %v6620_v0, 16 }
  0xe8   : > { %v4590_v3 = vcombine.low %v1852_v53, %v1862_v6  ;;  %v2019_v59 = vrot.slane %v2017_v31, 5  ;;  %v2014_v42 = vor.u32 %v2013_v5, %v2010_v33  ;;  %v2027_v52 = vshll.u32 %v6623_v24, 16  ;;  %v6752_v5 = vld [vmem:[%s5520_s7 + $0x64] sm:$0xf] }
  0xe9   : > { %v3544_v27 = vrot.slane %v3543_v45, 4  ;;  %v3335_v13 = vshrl.u32 %v4758_v38, 16  ;;  %v3539_v20 = vsel %vm5559_vm3, %v3534_v49, %v3538_v35  ;;  %v2023_v37 = vrot.slane %v2021_v17, 4 }
  0xea   : > { %v2292_v30 = vsel %vm720_vm0, %v4590_v3, 0  ;;  %5026 = vmatmul.mubr.msk.bf16.vlgmr.msra.gmra.mxu1 %vm720_vm0, %v6497_v54  ;;  %v3338_v62 = vshll.u32 %v4758_v38, 16  ;;  %v2015_v48 = vrot.slane %v2014_v42, 4  ;;  %v2029_v25 = vrot.slane %v2027_v52, 5  ;;  %v4755_v38 = vld [vmem:[%s5520_s7 + $0x60] sm:$0xf] }
  0xeb   : > { %v3549_v0 = vsel %vm5559_vm3, %v3544_v27, %v3548_v15  ;;  %v3337_v24 = vrot.slane %v3335_v13, 4  ;;  %5027 = vmatprep.mubr.msk.bf16.mxu1 %vm720_vm0, %v6695_v26  ;;  %4998 = vmatpush3.bf16.xpose.msra.mxu0 %v2292_v30  ;;  %v2024_v18 = vor.u32 %v2023_v37, %v2019_v59  ;;  %v3344_v22 = vshll.u32 %v6704_v51, 16  ;;  %v5313_v37 = vld [vmem:[%s5520_s7 + $0x6c] sm:$0xff]  }
  0xec   : > { %v4812_v14 = vcombine.low %v3539_v20, %v3549_v0  ;;  %v3340_v16 = vrot.slane %v3338_v62, 5  ;;  %v2020_v54 = vsel %vm5559_vm3, %v2015_v48, %v2019_v59  ;;  %v3348_v10 = vshrl.u32 %v6704_v51, 16  ;;  %v6764_v0 = vld [vmem:[%s5520_s7 + $0x68] sm:$0x1] }
  0xed   : > { %v3354_v28 = vshll.u32 %v6709_v44, 16  ;;  %v1816_v58 = vshrl.u32 %v4529_v8, 16  ;;  %v2025_v61 = vrot.slane %v2024_v18, 4  ;;  %v3346_v29 = vrot.slane %v3344_v22, 5 }
  0xee   : > { %5177 = vmatprep.subr.msk.bf16.mxu1 %vm720_vm0, %v4812_v14  ;;  %v3341_v7 = vor.u32 %v3340_v16, %v3337_v24  ;;  %v1819_v40 = vshll.u32 %v4529_v8, 16  ;;  %v3350_v60 = vrot.slane %v3348_v10, 4  ;;  %v1825_v41 = vshll.u32 %v6645_v50, 16  ;;  %v6769_v24 = vld [vmem:[%s7696_s1 + $0xb8] sm:$0xff]  }
  0xef   : > { %v3356_v9 = vrot.slane %v3354_v28, 5  ;;  %v1818_v55 = vrot.slane %v1816_v58, 4  ;;  %v2030_v57 = vsel %vm5559_vm3, %v2025_v61, %v2029_v25  ;;  %v1829_v35 = vshrl.u32 %v6645_v50, 16  ;;  %v6777_v10 = vld [vmem:[%s5520_s7 + $0xb8] sm:$0xf]  ;;  %v5312_v61 = vld [vmem:[%s5520_s7 + $0xcc] sm:$0xff]  }
  0xf0   : > { %v3342_v63 = vrot.slane %v3341_v7, 4  ;;  %v1821_v1 = vrot.slane %v1819_v40, 5  ;;  %v4597_v2 = vcombine.low %v2020_v54, %v2030_v57  ;;  %v3351_v43 = vor.u32 %v3350_v60, %v3346_v29  ;;  %v4776_v54 = vld [vmem:[%s5520_s7 + $0xb4] sm:$0xf]  ;;  %v6781_v40 = vld [vmem:[%s5520_s7 + $0xbc] sm:$0x1] }
  0xf1   : > { %v1827_v21 = vrot.slane %v1825_v41, 5  ;;  %v1835_v34 = vshll.u32 %v6653_v47, 16  ;;  %v1831_v15 = vrot.slane %v1829_v35, 4  ;;  %v3503_v31 = vshrl.u32 %v4779_v11, 16  ;;  %v4752_v35 = vld [vmem:[%s5520_s7 + $0x54] sm:$0xf] }
  0xf2   : > { %v3347_v53 = vsel %vm5559_vm3, %v3342_v63, %v3346_v29  ;;  %v1822_v39 = vor.u32 %v1821_v1, %v1818_v55  ;;  %5028 = vmatmul.mubr.msk.bf16.gmra.mxu1 %vm720_vm0, %v6695_v26  ;;  %5160 = vmatprep.subr.msk.bf16.mxu0 %vm720_vm0, %v4597_v2  ;;  %v3352_v50 = vrot.slane %v3351_v43, 4  ;;  %v3506_v45 = vshll.u32 %v4779_v11, 16 }
  0xf3   : > { %v1837_v6 = vrot.slane %v1835_v34, 5  ;;  %v3512_v33 = vshll.u32 %v6735_v4, 16  ;;  %5029 = vmatprep.mubr.msk.bf16.mxu1 %vm720_vm0, %v6731_v46  ;;  %v1832_v3 = vor.u32 %v1831_v15, %v1827_v21  ;;  %v3505_v49 = vrot.slane %v3503_v31, 4  ;;  %v6797_v34 = vld [vmem:[%s5520_s7 + $0x58] sm:$0xf] }
  0xf4   : > { %v1823_v47 = vrot.slane %v1822_v39, 4  ;;  %v3516_v59 = vshrl.u32 %v6735_v4, 16  ;;  %v3357_v26 = vsel %vm5559_vm3, %v3352_v50, %v3356_v9  ;;  %v3508_v17 = vrot.slane %v3506_v45, 5 }
  0xf5   : > { %v3514_v27 = vrot.slane %v3512_v33, 5  ;;  %v3522_v42 = vshll.u32 %v6741_v56, 16  ;;  %v4804_v52 = vcombine.low %v3347_v53, %v3357_v26  ;;  %v1833_v30 = vrot.slane %v1832_v3, 4  ;;  %v5317_v3 = vld [vmem:[%s5520_s7 + $0x60] sm:$0xff]  }
  0xf6   : > { %v1828_v13 = vsel %vm5559_vm3, %v1823_v47, %v1827_v21  ;;  %v3518_v20 = vrot.slane %v3516_v59, 4  ;;  %v3509_v62 = vor.u32 %v3508_v17, %v3505_v49  ;;  %v3311_v48 = vshrl.u32 %v4755_v38, 16 }
  0xf7   : > { %v3524_v8 = vrot.slane %v3522_v42, 5  ;;  %v3314_v25 = vshll.u32 %v4755_v38, 16  ;;  %v3661_v14 = vsel %vm720_vm0, %v4804_v52, 0  ;;  %v1838_v18 = vsel %vm5559_vm3, %v1833_v30, %v1837_v6  ;;  %v6802_v38 = vld [vmem:[%s5520_s7 + $0x5c] sm:$0x1]  ;;  %v6807_v6 = vld [vmem:[%s7696_s1 + $0x88] sm:$0xff]  }
  0xf8   : > { %v3519_v16 = vor.u32 %v3518_v20, %v3514_v27  ;;  %v3320_v22 = vshll.u32 %v6752_v5, 16  ;;  %5058 = vmatpush3.bf16.xpose.msra.mxu1 %v3661_v14  ;;  %v4589_v28 = vcombine.low %v1828_v13, %v1838_v18  ;;  %v3510_v58 = vrot.slane %v3509_v62, 4 }
  0xf9   : > { %v3313_v7 = vrot.slane %v3311_v48, 4  ;;  %v3316_v29 = vrot.slane %v3314_v25, 5  ;;  %v3324_v9 = vshrl.u32 %v6752_v5, 16  ;;  %v3330_v55 = vshll.u32 %v6764_v0, 16 }
  0xfa   : > { %v3520_v11 = vrot.slane %v3519_v16, 4  ;;  %v3322_v60 = vrot.slane %v3320_v22, 5  ;;  %5030 = vmatmul.mubr.msk.bf16.gmra.mxu1 %vm720_vm0, %v6731_v46  ;;  %v2289_v41 = vsel %vm720_vm0, %v4589_v28, 0  ;;  %v3515_v57 = vsel %vm5559_vm3, %v3510_v58, %v3514_v27  ;;  %v6818_v27 = vld [vmem:[%s7696_s1 + $0xe0] sm:$0xff]   ;;  %v4773_v22 = vld [vmem:[%s5520_s7 + $0xa8] sm:$0xf] }
  0xfb   : > { %v3317_v63 = vor.u32 %v3316_v29, %v3313_v7  ;;  %v3003_v1 = vsel %vm720_vm0, %v5313_v37, 0  ;;  %5031 = vmatprep.mubr.msk.bf16.mxu1 %vm720_vm0, %v6769_v24  ;;  %5000 = vmatpush3.bf16.xpose.msra.mxu0 %v2289_v41  ;;  %v3326_v43 = vrot.slane %v3324_v9, 4  ;;  %v3332_v46 = vrot.slane %v3330_v55, 5  ;;  %v5315_v37 = vld [vmem:[%s5520_s7 + $0xc0] sm:$0xff]   ;;  %v6832_v7 = vld [vmem:[%s5520_s7 + $0xac] sm:$0xf] }
  0xfc   : > { %v3525_v2 = vsel %vm5559_vm3, %v3520_v11, %v3524_v8  ;;  %v3479_v21 = vshrl.u32 %v4776_v54, 16  ;;  %5169 = vmatprep.subr.msk.bf16.mxu0 %vm720_vm0, %v5312_v61  ;;  %v3482_v15 = vshll.u32 %v4776_v54, 16  ;;  %v3488_v31 = vshll.u32 %v6777_v10, 16  ;;  %v6844_v41 = vld [vmem:[%s5520_s7 + $0xb0] sm:$0x1] }
  0xfd   : > { %v4811_v53 = vcombine.low %v3515_v57, %v3525_v2  ;;  %v3318_v39 = vrot.slane %v3317_v63, 4  ;;  %v3327_v50 = vor.u32 %v3326_v43, %v3322_v60  ;;  %v3492_v33 = vshrl.u32 %v6777_v10, 16  ;;  %v4749_v43 = vld [vmem:[%s5520_s7 + $0x48] sm:$0xf] }
  0xfe   : > { %v3481_v45 = vrot.slane %v3479_v21, 4  ;;  %v3498_v47 = vshll.u32 %v6781_v40, 16  ;;  %v3484_v59 = vrot.slane %v3482_v15, 5  ;;  %v3490_v26 = vrot.slane %v3488_v31, 5  ;;  %v6852_v15 = vld [vmem:[%s5520_s7 + $0x4c] sm:$0xf] }
  0xff   : > { %5178 = vmatprep.subr.msk.bf16.mxu1 %vm720_vm0, %v4811_v53  ;;  %v3323_v49 = vsel %vm5559_vm3, %v3318_v39, %v3322_v60  ;;  %v3287_v17 = vshrl.u32 %v4752_v35, 16  ;;  %v3328_v42 = vrot.slane %v3327_v50, 4  ;;  %v3494_v52 = vrot.slane %v3492_v33, 4  ;;  %v6859_v50 = vld [vmem:[%s7696_s1 + $0x90] sm:$0xff]  }
 0x100   : > { %v3500_v13 = vrot.slane %v3498_v47, 5  ;;  %v3290_v30 = vshll.u32 %v4752_v35, 16  ;;  %v3485_v20 = vor.u32 %v3484_v59, %v3481_v45  ;;  %v3296_v8 = vshll.u32 %v6797_v34, 16 }
 0x101   : > { %v3289_v62 = vrot.slane %v3287_v17, 4  ;;  %v3300_v48 = vshrl.u32 %v6797_v34, 16  ;;  %v3333_v25 = vsel %vm5559_vm3, %v3328_v42, %v3332_v46  ;;  %v3495_v14 = vor.u32 %v3494_v52, %v3490_v26  ;;  %v5321_v52 = vld [vmem:[%s5520_s7 + $0x54] sm:$0xff]  }
 0x102   : > { %v3292_v18 = vrot.slane %v3290_v30, 5  ;;  %v3306_v16 = vshll.u32 %v6802_v38, 16  ;;  %5032 = vmatmul.mubr.msk.bf16.gmra.mxu1 %vm720_vm0, %v6769_v24  ;;  %5002 = vmatmul.mubr.msk.bf16.vlgmr.msra.gmra.mxu0 %vm720_vm0, %v6613_v32  ;;  %v4803_v54 = vcombine.low %v3323_v49, %v3333_v25  ;;  %v3486_v28 = vrot.slane %v3485_v20, 4 }
 0x103   : > { %v3298_v58 = vrot.slane %v3296_v8, 5  ;;  %v3302_v61 = vrot.slane %v3300_v48, 4  ;;  %5073 = vmatprep.mubr.msk.bf16.mxu1 %vm720_vm0, %v6818_v27  ;;  %5034 = vmatpush3.bf16.xpose.msra.mxu0 %v3003_v1  ;;  %v3496_v29 = vrot.slane %v3495_v14, 4  ;;  %v3000_v32 = vsel %vm720_vm0, %v5317_v3, 0  ;;  %v5319_v3 = vld [vmem:[%s5520_s7 + $0xb4] sm:$0xff]  }
 0x104   : > { %5003 = vmatprep.mubr.msk.bf16.mxu0 %vm720_vm0, %v6807_v6  ;;  %v3293_v24 = vor.u32 %v3292_v18, %v3289_v62  ;;  %v3308_v11 = vrot.slane %v3306_v16, 5  ;;  %v3658_v60 = vsel %vm720_vm0, %v4803_v54, 0  ;;  %v3491_v9 = vsel %vm5559_vm3, %v3486_v28, %v3490_v26  ;;  %5170 = vmatprep.subr.msk.bf16.mxu0 %vm720_vm0, %v5315_v37  ;;  %v6867_v26 = vld [vmem:[%s5520_s7 + $0x50] sm:$0x1]  ;;  %v4770_v14 = vld [vmem:[%s5520_s7 + $0x9c] sm:$0xf] }
 0x105   : > { %v3303_v55 = vor.u32 %v3302_v61, %v3298_v58  ;;  %v3455_v57 = vshrl.u32 %v4773_v22, 16  ;;  %5060 = vmatpush3.bf16.xpose.msra.mxu1 %v3658_v60  ;;  %v3501_v63 = vsel %vm5559_vm3, %v3496_v29, %v3500_v13  ;;  %v3458_v35 = vshll.u32 %v4773_v22, 16  ;;  %v6880_v28 = vld [vmem:[%s5520_s7 + $0xa0] sm:$0xf] }
 0x106   : > { %v3294_v1 = vrot.slane %v3293_v24, 4  ;;  %v3464_v2 = vshll.u32 %v6832_v7, 16  ;;  %v4810_v46 = vcombine.low %v3491_v9, %v3501_v63  ;;  %v3468_v39 = vshrl.u32 %v6832_v7, 16 }
 0x107   : > { %v3304_v21 = vrot.slane %v3303_v55, 4  ;;  %v3457_v53 = vrot.slane %v3455_v57, 4  ;;  %v3460_v45 = vrot.slane %v3458_v35, 5  ;;  %v3474_v47 = vshll.u32 %v6844_v41, 16  ;;  %v4746_v35 = vld [vmem:[%s5520_s7 + $0x3c] sm:$0xf] }
 0x108   : > { %v3299_v31 = vsel %vm5559_vm3, %v3294_v1, %v3298_v58  ;;  %v3466_v33 = vrot.slane %v3464_v2, 5  ;;  %5179 = vmatprep.subr.msk.bf16.mxu1 %vm720_vm0, %v4810_v46  ;;  %v3470_v59 = vrot.slane %v3468_v39, 4  ;;  %v3263_v17 = vshrl.u32 %v4749_v43, 16  ;;  %v6898_v39 = vld [vmem:[%s5520_s7 + $0x40] sm:$0xf] }
 0x109   : > { %v3309_v49 = vsel %vm5559_vm3, %v3304_v21, %v3308_v11  ;;  %v3266_v42 = vshll.u32 %v4749_v43, 16  ;;  %v3461_v30 = vor.u32 %v3460_v45, %v3457_v53  ;;  %v3476_v20 = vrot.slane %v3474_v47, 5  ;;  %v5322_v43 = vld [vmem:[%s7696_s1 + $0x98] sm:$0xff]  }
 0x10a   : > { %v4802_v13 = vcombine.low %v3299_v31, %v3309_v49  ;;  %v3272_v37 = vshll.u32 %v6852_v15, 16  ;;  %5004 = vmatmul.mubr.msk.bf16.gmra.mxu0 %vm720_vm0, %v6807_v6  ;;  %v3471_v62 = vor.u32 %v3470_v59, %v3466_v33  ;;  %v3265_v8 = vrot.slane %v3263_v17, 4  ;;  %v6906_v17 = vld [vmem:[%s5520_s7 + $0x44] sm:$0x1] }
 0x10b   : > { %v3268_v48 = vrot.slane %v3266_v42, 5  ;;  %v3276_v25 = vshrl.u32 %v6852_v15, 16  ;;  %5036 = vmatpush3.bf16.xpose.msra.mxu0 %v3000_v32  ;;  %5005 = vmatprep.mubr.msk.bf16.mxu0 %vm720_vm0, %v6859_v50  ;;  %v3462_v16 = vrot.slane %v3461_v30, 4  ;;  %v3282_v54 = vshll.u32 %v6867_v26, 16  ;;  %v6887_v32 = vld [vmem:[%s5520_s7 + $0xa4] sm:$0x1] }
 0x10c   : > { %v3655_v18 = vsel %vm720_vm0, %v4802_v13, 0  ;;  %v3274_v22 = vrot.slane %v3272_v37, 5  ;;  %v3472_v6 = vrot.slane %v3471_v62, 4  ;;  %5171 = vmatprep.subr.msk.bf16.mxu0 %vm720_vm0, %v5319_v3  ;;  %v2997_v29 = vsel %vm720_vm0, %v5321_v52, 0  ;;  %v5323_v3 = vld [vmem:[%s5520_s7 + $0xa8] sm:$0xff]  }
 0x10d   : > { %v3269_v58 = vor.u32 %v3268_v48, %v3265_v8  ;;  %v3278_v61 = vrot.slane %v3276_v25, 4  ;;  %5062 = vmatpush3.bf16.xpose.msra.mxu1 %v3655_v18  ;;  %v3467_v24 = vsel %vm5559_vm3, %v3462_v16, %v3466_v33  ;;  %v3284_v11 = vrot.slane %v3282_v54, 5  ;;  %v5325_v13 = vld [vmem:[%s5520_s7 + $0x48] sm:$0xff]   ;;  %v4767_v18 = vld [vmem:[%s5520_s7 + $0x90] sm:$0xf] }
 0x10e   : > { %v3431_v60 = vshrl.u32 %v4770_v14, 16  ;;  %v3434_v9 = vshll.u32 %v4770_v14, 16  ;;  %v3477_v55 = vsel %vm5559_vm3, %v3472_v6, %v3476_v20  ;;  %v3440_v1 = vshll.u32 %v6880_v28, 16  ;;  %v6920_v6 = vld [vmem:[%s5520_s7 + $0x94] sm:$0xf] }
 0x10f   : > { %v3270_v57 = vrot.slane %v3269_v58, 4  ;;  %v3279_v63 = vor.u32 %v3278_v61, %v3274_v22  ;;  %v4809_v2 = vcombine.low %v3467_v24, %v3477_v55  ;;  %v3444_v53 = vshrl.u32 %v6880_v28, 16  ;;  %v6927_v55 = vld [vmem:[%s5520_s7 + $0x98] sm:$0x1] }
 0x110   : > { %v3433_v46 = vrot.slane %v3431_v60, 4  ;;  %v3436_v21 = vrot.slane %v3434_v9, 5  ;;  %v3442_v33 = vrot.slane %v3440_v1, 5  ;;  %v3450_v47 = vshll.u32 %v6887_v32, 16 }
 0x111   : > { %v3275_v31 = vsel %vm5559_vm3, %v3270_v57, %v3274_v22  ;;  %v3280_v45 = vrot.slane %v3279_v63, 4  ;;  %5180 = vmatprep.subr.msk.bf16.mxu1 %vm720_vm0, %v4809_v2  ;;  %v3446_v59 = vrot.slane %v3444_v53, 4  ;;  %v3239_v42 = vshrl.u32 %v4746_v35, 16 }
 0x112   : > { %v3437_v49 = vor.u32 %v3436_v21, %v3433_v46  ;;  %v3242_v52 = vshll.u32 %v4746_v35, 16  ;;  %5006 = vmatmul.mubr.msk.bf16.gmra.mxu0 %vm720_vm0, %v6859_v50  ;;  %v3452_v20 = vrot.slane %v3450_v47, 5  ;;  %v3248_v37 = vshll.u32 %v6898_v39, 16  ;;  %v4743_v46 = vld [vmem:[%s5520_s7 + $0x30] sm:$0xf]  ;;  %v6937_v21 = vld [vmem:[%s7696_s1 + $0xc0] sm:$0xff]  }
 0x113   : > { %v3285_v30 = vsel %vm5559_vm3, %v3280_v45, %v3284_v11  ;;  %v3252_v62 = vshrl.u32 %v6898_v39, 16  ;;  %5038 = vmatpush3.bf16.xpose.msra.mxu0 %v2997_v29  ;;  %5007 = vmatprep.mubr.msk.bf16.mxu0 %vm720_vm0, %v5322_v43  ;;  %v3447_v25 = vor.u32 %v3446_v59, %v3442_v33  ;;  %v3241_v14 = vrot.slane %v3239_v42, 4  ;;  %v5326_v47 = vld [vmem:[%s5520_s7 + $0x9c] sm:$0xff]  }
 0x114   : > { %v4801_v8 = vcombine.low %v3275_v31, %v3285_v30  ;;  %v3438_v48 = vrot.slane %v3437_v49, 4  ;;  %5172 = vmatprep.subr.msk.bf16.mxu0 %vm720_vm0, %v5323_v3  ;;  %v3244_v50 = vrot.slane %v3242_v52, 5  ;;  %v3250_v16 = vrot.slane %v3248_v37, 5  ;;  %v6942_v52 = vld [vmem:[%s5520_s7 + $0x34] sm:$0xf] }
 0x115   : > { %v3254_v22 = vrot.slane %v3252_v62, 4  ;;  %v3258_v54 = vshll.u32 %v6906_v17, 16  ;;  %v3448_v29 = vrot.slane %v3447_v25, 4  ;;  %v2994_v24 = vsel %vm720_vm0, %v5325_v13, 0 }
 0x116   : > { %v3652_v58 = vsel %vm720_vm0, %v4801_v8, 0  ;;  %v3443_v61 = vsel %vm5559_vm3, %v3438_v48, %v3442_v33  ;;  %v3245_v11 = vor.u32 %v3244_v50, %v3241_v14  ;;  %v3407_v57 = vshrl.u32 %v4767_v18, 16  ;;  %v5327_v8 = vld [vmem:[%s5520_s7 + $0x3c] sm:$0xff]  }
 0x117   : > { %5064 = vmatpush3.bf16.xpose.msra.mxu1 %v3652_v58  ;;  %v3255_v60 = vor.u32 %v3254_v22, %v3250_v16  ;;  %v3260_v9 = vrot.slane %v3258_v54, 5  ;;  %v3453_v63 = vsel %vm5559_vm3, %v3448_v29, %v3452_v20  ;;  %v3410_v1 = vshll.u32 %v4767_v18, 16  ;;  %v6951_v20 = vld [vmem:[%s5520_s7 + $0x38] sm:$0x1]  ;;  %v4764_v54 = vld [vmem:[%s5520_s7 + $0x84] sm:$0xf] }
 0x118   : > { %v3416_v35 = vshll.u32 %v6920_v6, 16  ;;  %v3420_v2 = vshrl.u32 %v6920_v6, 16  ;;  %v4808_v53 = vcombine.low %v3443_v61, %v3453_v63  ;;  %v3246_v31 = vrot.slane %v3245_v11, 4  ;;  %v6963_v11 = vld [vmem:[%s5520_s7 + $0x88] sm:$0xf] }
 0x119   : > { %v3256_v45 = vrot.slane %v3255_v60, 4  ;;  %v3409_v33 = vrot.slane %v3407_v57, 4  ;;  %v3412_v3 = vrot.slane %v3410_v1, 5  ;;  %v3426_v42 = vshll.u32 %v6927_v55, 16  ;;  %v6967_v1 = vld [vmem:[%s5520_s7 + $0x8c] sm:$0x1] }
 0x11a   : > { %v3418_v49 = vrot.slane %v3416_v35, 5  ;;  %v3422_v59 = vrot.slane %v3420_v2, 4  ;;  %5181 = vmatprep.subr.msk.bf16.mxu1 %vm720_vm0, %v4808_v53  ;;  %5008 = vmatmul.mubr.msk.bf16.gmra.mxu0 %vm720_vm0, %v5322_v43  ;;  %v3251_v13 = vsel %vm5559_vm3, %v3246_v31, %v3250_v16  ;;  %v3215_v37 = vshrl.u32 %v4743_v46, 16  ;;  %v4740_v31 = vld [vmem:[%s5520_s7 + $0x24] sm:$0xf] }
 0x11b   : > { %v3261_v30 = vsel %vm5559_vm3, %v3256_v45, %v3260_v9  ;;  %v3218_v62 = vshll.u32 %v4743_v46, 16  ;;  %5040 = vmatpush3.bf16.xpose.msra.mxu0 %v2994_v24  ;;  %v3413_v25 = vor.u32 %v3412_v3, %v3409_v33  ;;  %v3428_v18 = vrot.slane %v3426_v42, 5  ;;  %5049 = vmatprep.mubr.msk.bf16.mxu0 %vm720_vm0, %v6937_v21 }
 0x11c   : > { %v4800_v48 = vcombine.low %v3251_v13, %v3261_v30  ;;  %v3423_v14 = vor.u32 %v3422_v59, %v3418_v49  ;;  %5173 = vmatprep.subr.msk.bf16.mxu0 %vm720_vm0, %v5326_v47  ;;  %v3217_v43 = vrot.slane %v3215_v37, 4  ;;  %v3224_v16 = vshll.u32 %v6942_v52, 16  ;;  %v5328_v59 = vld [vmem:[%s5520_s7 + $0x90] sm:$0xff]   ;;  %v6979_v37 = vld [vmem:[%s5520_s7 + $0x28] sm:$0xf] }
 0x11d   : > { %v3220_v50 = vrot.slane %v3218_v62, 5  ;;  %v3228_v22 = vshrl.u32 %v6942_v52, 16  ;;  %v3414_v61 = vrot.slane %v3413_v25, 4  ;;  %v3234_v24 = vshll.u32 %v6951_v20, 16 }
 0x11e   : > { %v3649_v58 = vsel %vm720_vm0, %v4800_v48, 0  ;;  %v3424_v29 = vrot.slane %v3423_v14, 4  ;;  %v3226_v9 = vrot.slane %v3224_v16, 5  ;;  %v2991_v63 = vsel %vm720_vm0, %v5327_v8, 0  ;;  %v5329_v14 = vld [vmem:[%s5520_s7 + $0x30] sm:$0xff]  }
 0x11f   : > { %5066 = vmatpush3.bf16.xpose.msra.mxu1 %v3649_v58  ;;  %v3221_v60 = vor.u32 %v3220_v50, %v3217_v43  ;;  %v3230_v57 = vrot.slane %v3228_v22, 4  ;;  %v3419_v35 = vsel %vm5559_vm3, %v3414_v61, %v3418_v49  ;;  %v3236_v46 = vrot.slane %v3234_v24, 5  ;;  %v6986_v16 = vld [vmem:[%s5520_s7 + $0x2c] sm:$0x1] }
 0x120   : > { %v3429_v2 = vsel %vm5559_vm3, %v3424_v29, %v3428_v18  ;;  %v3383_v53 = vshrl.u32 %v4764_v54, 16  ;;  %v3386_v3 = vshll.u32 %v4764_v54, 16  ;;  %v3392_v13 = vshll.u32 %v6963_v11, 16 }
 0x121   : > { %v4807_v45 = vcombine.low %v3419_v35, %v3429_v2  ;;  %v3222_v33 = vrot.slane %v3221_v60, 4  ;;  %v3231_v47 = vor.u32 %v3230_v57, %v3226_v9  ;;  %v3396_v30 = vshrl.u32 %v6963_v11, 16 }
 0x122   : > { %v3385_v42 = vrot.slane %v3383_v53, 4  ;;  %v3402_v49 = vshll.u32 %v6967_v1, 16  ;;  %v3388_v48 = vrot.slane %v3386_v3, 5  ;;  %v3191_v25 = vshrl.u32 %v4740_v31, 16 }
 0x123   : > { %5182 = vmatprep.subr.msk.bf16.mxu1 %vm720_vm0, %v4807_v45  ;;  %v3227_v62 = vsel %vm5559_vm3, %v3222_v33, %v3226_v9  ;;  %v3232_v8 = vrot.slane %v3231_v47, 4  ;;  %5042 = vmatpush3.bf16.xpose.msra.mxu0 %v2991_v63  ;;  %v3394_v18 = vrot.slane %v3392_v13, 5  ;;  %v3398_v43 = vrot.slane %v3396_v30, 4  ;;  %v4761_v63 = vld [vmem:[%s5520_s7 + $0x78] sm:$0xf] }
 0x124   : > { %v3404_v50 = vrot.slane %v3402_v49, 5  ;;  %v3194_v22 = vshll.u32 %v4740_v31, 16  ;;  %v3389_v58 = vor.u32 %v3388_v48, %v3385_v42  ;;  %5174 = vmatprep.subr.msk.bf16.mxu0 %vm720_vm0, %v5328_v59  ;;  %v3193_v61 = vrot.slane %v3191_v25, 4  ;;  %v6997_v31 = vld [vmem:[%s5520_s7 + $0x7c] sm:$0xf] }
 0x125   : > { %v3237_v54 = vsel %vm5559_vm3, %v3232_v8, %v3236_v46  ;;  %v3200_v29 = vshll.u32 %v6979_v37, 16  ;;  %v3399_v60 = vor.u32 %v3398_v43, %v3394_v18  ;;  %v3204_v57 = vshrl.u32 %v6979_v37, 16  ;;  %7714 = vst [vmem:[#allocation5_spill] sm:$0xff] %v6997_v31  ;;  %v7005_v30 = vld [vmem:[%s5520_s7 + $0x80] sm:$0x1]  ;;  %v5330_v8 = vld [vmem:[%s5520_s7 + $0x84] sm:$0xff]  }
 0x126   : > { %v4799_v24 = vcombine.low %v3227_v62, %v3237_v54  ;;  %v3196_v9 = vrot.slane %v3194_v22, 5  ;;  %v3390_v35 = vrot.slane %v3389_v58, 4  ;;  %v3210_v53 = vshll.u32 %v6986_v16, 16  ;;  %v6999_v45 = vpop.f32.mrf.mxu1  ;;  %7715 = vst [vmem:[#allocation6_spill] sm:$0xff] %v7005_v30  ;;  %v4737_v54 = vld [vmem:[%s5520_s7 + $0x18] sm:$0xf] }
 0x127   : > { %v3202_v2 = vrot.slane %v3200_v29, 5  ;;  %v2988_v46 = vsel %vm720_vm0, %v5329_v14, 0  ;;  %v3400_v47 = vrot.slane %v3399_v60, 4  ;;  %v3206_v59 = vrot.slane %v3204_v57, 4 }
 0x128   : > { %v3646_v33 = vsel %vm720_vm0, %v4799_v24, 0  ;;  %v3197_v3 = vor.u32 %v3196_v9, %v3193_v61  ;;  %v3395_v42 = vsel %vm5559_vm3, %v3390_v35, %v3394_v18  ;;  %v3212_v13 = vrot.slane %v3210_v53, 5  ;;  %v7008_v48 = vpop.f32.mrf.mxu1  ;;  %v7016_v24 = vld [vmem:[%s5520_s7 + $0x1c] sm:$0xf] }
 0x129   : > { %5068 = vmatpush3.bf16.xpose.msra.mxu1 %v3646_v33  ;;  %v3359_v49 = vshrl.u32 %v4761_v63, 16  ;;  %v3362_v62 = vshll.u32 %v4761_v63, 16  ;;  %v3405_v25 = vsel %vm5559_vm3, %v3400_v47, %v3404_v50  ;;  %v3207_v43 = vor.u32 %v3206_v59, %v3202_v2  ;;  %v7026_v33 = vld [vmem:[%s5520_s7 + $0x20] sm:$0x1]  ;;  %v5331_v59 = vld [vmem:[%s5520_s7 + $0x24] sm:$0xff]  }
 0x12a   : > { %v3198_v14 = vrot.slane %v3197_v3, 4  ;;  %v3368_v22 = vshll.u32 %v6997_v31, 16  ;;  %v4806_v58 = vcombine.low %v3395_v42, %v3405_v25  ;;  %v3372_v29 = vshrl.u32 %v6997_v31, 16  ;;  %v7018_v60 = vpop.f32.mrf.mxu1  ;;  %7716 = vst [vmem:[#allocation7_spill] sm:$0xff] %v7026_v33 }
 0x12b   : > { %v3361_v18 = vrot.slane %v3359_v49, 4  ;;  %v3364_v61 = vrot.slane %v3362_v62, 5  ;;  %v3208_v50 = vrot.slane %v3207_v43, 4  ;;  %5044 = vmatpush3.bf16.xpose.msra.mxu0 %v2988_v46  ;;  %v3378_v63 = vshll.u32 %v7005_v30, 16  ;;  %v4824_v30 = vld [vmem:[%s5520_s7 + $0x6c] sm:$0xe] }
 0x12c   : > { %v3203_v9 = vsel %vm5559_vm3, %v3198_v14, %v3202_v2  ;;  %v3370_v57 = vrot.slane %v3368_v22, 5  ;;  %5183 = vmatprep.subr.msk.bf16.mxu1 %vm720_vm0, %v4806_v58  ;;  %v3374_v53 = vrot.slane %v3372_v29, 4  ;;  %5175 = vmatprep.subr.msk.bf16.mxu0 %vm720_vm0, %v5330_v8  ;;  %v3167_v47 = vshrl.u32 %v4737_v54, 16  ;;  %v7029_v42 = vpop.f32.mrf.mxu1  ;;  %v4832_v22 = vld [vmem:[%s5520_s7 + $0xcc] sm:$0xe] }
 0x12d   : > { %v3365_v35 = vor.u32 %v3364_v61, %v3361_v18  ;;  %v3170_v3 = vshll.u32 %v4737_v54, 16  ;;  %v3213_v2 = vsel %vm5559_vm3, %v3208_v50, %v3212_v13  ;;  %v3380_v46 = vrot.slane %v3378_v63, 5 }
 0x12e   : > { %v3176_v49 = vshll.u32 %v7016_v24, 16  ;;  %v3180_v62 = vshrl.u32 %v7016_v24, 16  ;;  %v4798_v25 = vcombine.low %v3203_v9, %v3213_v2  ;;  %v3375_v8 = vor.u32 %v3374_v53, %v3370_v57  ;;  %v7036_v58 = vpop.f32.mrf.mxu1 }
 0x12f   : > { %v3366_v14 = vrot.slane %v3365_v35, 4  ;;  %v3169_v43 = vrot.slane %v3167_v47, 4  ;;  %v3172_v54 = vrot.slane %v3170_v3, 5  ;;  %v3186_v29 = vshll.u32 %v7026_v33, 16  ;;  %v5333_v35 = vld [vmem:[%s5520_s7 + $0x78] sm:$0xff]  }
 0x130   : > { %v3178_v18 = vrot.slane %v3176_v49, 5  ;;  %v3182_v61 = vrot.slane %v3180_v62, 4  ;;  %v3643_v13 = vsel %vm720_vm0, %v4798_v25, 0  ;;  %v3376_v63 = vrot.slane %v3375_v8, 4  ;;  %v7045_v53 = vpop.f32.mrf.mxu1 }
 0x131   : > { %v3371_v50 = vsel %vm5559_vm3, %v3366_v14, %v3370_v57  ;;  %v2985_v9 = vsel %vm720_vm0, %v5331_v59, 0  ;;  %5070 = vmatpush3.bf16.xpose.msra.mxu1 %v3643_v13  ;;  %v3173_v47 = vor.u32 %v3172_v54, %v3169_v43  ;;  %v3188_v2 = vrot.slane %v3186_v29, 5  ;;  %v4831_v54 = vld [vmem:[%s5520_s7 + $0xc0] sm:$0xe] }
 0x132   : > { %v3183_v3 = vor.u32 %v3182_v61, %v3178_v18  ;;  %v4848_v49 = vrot.slane %v4832_v22, 9  ;;  %v3381_v62 = vsel %vm5559_vm3, %v3376_v63, %v3380_v46  ;;  %v3947_v25 = vrot.slane %v6671_v19, 5  ;;  %v7051_v59 = vpop.f32.mrf.mxu1 }
 0x133   : > { %v3950_v57 = vrot.slane %v6683_v12, 5  ;;  %v4840_v14 = vrot.slane %v4824_v30, 9  ;;  %v4805_v8 = vcombine.low %v3371_v50, %v3381_v62  ;;  %v3174_v31 = vrot.slane %v3173_v47, 4  ;;  %5046 = vmatpush3.bf16.xpose.msra.mxu0 %v2985_v9  ;;  %v5334_v12 = vld [vmem:[%s5520_s7 + $0x18] sm:$0xff]   ;;  %v4823_v30 = vld [vmem:[%s5520_s7 + $0x60] sm:$0xe] }
 0x134   : > { %v3184_v33 = vrot.slane %v3183_v3, 4  ;;  %v3891_v43 = vrot.slane %v6704_v51, 5  ;;  %v3948_v22 = vsel %vm5829_vm6, %v4848_v49, %v3947_v25  ;;  %v3949_v46 = vrot.slane %v3947_v25, 4  ;;  %5176 = vmatprep.subr.msk.bf16.mxu0 %vm720_vm0, %v5333_v35  ;;  %v4830_v35 = vld [vmem:[%s5520_s7 + $0xb4] sm:$0xe]  ;;  %v7072_v47 = vpop.f32.mrf.mxu1 }
 0x135   : > { %v3894_v19 = vrot.slane %v6709_v44, 5  ;;  %5184 = vmatprep.subr.msk.bf16.mxu1 %vm720_vm0, %v4805_v8  ;;  %v3179_v61 = vsel %vm5559_vm3, %v3174_v31, %v3178_v18  ;;  %v4847_v44 = vrot.slane %v4831_v54, 9  ;;  %v3940_v9 = vrot.slane %v6735_v4, 5  ;;  %v4822_v18 = vld [vmem:[%s5520_s7 + $0x54] sm:$0xe] }
 0x136   : > { %v3189_v51 = vsel %vm5559_vm3, %v3184_v33, %v3188_v2  ;;  %v3892_v29 = vsel %vm5829_vm6, %v4840_v14, %v3891_v43  ;;  %v3893_v13 = vrot.slane %v3891_v43, 4  ;;  %v3951_v63 = vsel %vm5829_vm6, %v3949_v46, %v3950_v57 }
 0x137   : > { %v4797_v50 = vcombine.low %v3179_v61, %v3189_v51  ;;  %v4876_v3 = vcombine.low %v3948_v22, %v3951_v63  ;;  %v3943_v36 = vrot.slane %v6741_v56, 5  ;;  %v4839_v33 = vrot.slane %v4823_v30, 9  ;;  %v7111_v63 = vld [vmem:[%s7696_s1 + $0xe8] sm:$0xff]  }
 0x138   : > { %v3895_v31 = vsel %vm5829_vm6, %v3893_v13, %v3894_v19  ;;  %v2982_v62 = vsel %vm720_vm0, %v5334_v12, 0  ;;  %v3942_v25 = vrot.slane %v3940_v9, 4  ;;  %v3884_v4 = vrot.slane %v6752_v5, 5  ;;  %v4829_v19 = vld [vmem:[%s5520_s7 + $0xa8] sm:$0xe]  ;;  %v7089_v12 = vpop.f32.mrf.mxu1 }
 0x139   : > { %v3640_v2 = vsel %vm720_vm0, %v4797_v50, 0  ;;  %v4868_v49 = vcombine.low %v3892_v29, %v3895_v31  ;;  %v3887_v57 = vrot.slane %v6764_v0, 5  ;;  %v4846_v14 = vrot.slane %v4830_v35, 9  ;;  %v4821_v35 = vld [vmem:[%s5520_s7 + $0x48] sm:$0xe] }
 0x13a   : > { %5072 = vmatpush3.bf16.xpose.msra.mxu1 %v3640_v2  ;;  %v3933_v8 = vrot.slane %v6777_v10, 5  ;;  %v3941_v43 = vsel %vm5829_vm6, %v4847_v44, %v3940_v9  ;;  %v815_v54 = vpop.f32.mrf.mxu0  ;;  %v3936_v22 = vrot.slane %v6781_v40, 5  ;;  %v4838_v46 = vrot.slane %v4822_v18, 9 }
 0x13b   : > { %5186 = vmatprep.subr.msk.bf16.mxu1 %vm720_vm0, %v4876_v3  ;;  %v4063_v56 = vsel %vm720_vm0, %v4868_v49, 0  ;;  %5048 = vmatpush3.bf16.xpose.msra.mxu0 %v2982_v62  ;;  %v3944_v5 = vsel %vm5829_vm6, %v3942_v25, %v3943_v36  ;;  %v7094_v0 = vadd.f32 %v6999_v45, %v815_v54  ;;  %v3885_v10 = vsel %vm5829_vm6, %v4839_v33, %v3884_v4  ;;  %v7121_v36 = vpop.f32.mrf.mxu1  ;;  %v4828_v62 = vld [vmem:[%s5520_s7 + $0x9c] sm:$0xe] }
 0x13c   : > { %v3886_v30 = vrot.slane %v3884_v4, 4  ;;  %5185 = vmatprep.subr.msk.bf16.mxu0 %vm720_vm0, %v4876_v3  ;;  %v817_v61 = vpop.f32.mrf.mxu0  ;;  %v3934_v40 = vsel %vm5829_vm6, %v4846_v14, %v3933_v8  ;;  %v3935_v51 = vrot.slane %v3933_v8, 4  ;;  %v3877_v29 = vrot.slane %v6797_v34, 5 }
 0x13d   : > { %v3880_v13 = vrot.slane %v6802_v38, 5  ;;  %v7106_v45 = vadd.f32 %v7008_v48, %v817_v61  ;;  %v4845_v44 = vrot.slane %v4829_v19, 9  ;;  %v3926_v9 = vrot.slane %v6832_v7, 5  ;;  %v7129_v7 = vld [vmem:[%s7696_s1 + $0xc8] sm:$0xff]  }
 0x13e   : > { %v3888_v50 = vsel %vm5829_vm6, %v3886_v30, %v3887_v57  ;;  %v4875_v3 = vcombine.low %v3941_v43, %v3944_v5  ;;  %v819_v34 = vpop.f32.mrf.mxu0  ;;  %v3937_v38 = vsel %vm5829_vm6, %v3935_v51, %v3936_v22  ;;  %v7119_v31 = vsel %vm5829_vm6, %v4838_v46, %v3877_v29  ;;  %v4820_v22 = vld [vmem:[%s5520_s7 + $0x3c] sm:$0xe]  ;;  %v4827_v5 = vld [vmem:[%s5520_s7 + $0x90] sm:$0xe]  ;;  %v7161_v30 = vpop.f32.mrf.mxu1 }
 0x13f   : > { %v3879_v48 = vrot.slane %v3877_v29, 4  ;;  %v4867_v33 = vcombine.low %v3885_v10, %v3888_v50  ;;  %v7124_v18 = vadd.f32 %v7018_v60, %v819_v34  ;;  %v7131_v2 = vcombine.low %v3934_v40, %v3937_v38 }
 0x140   : > { %v3928_v49 = vrot.slane %v3926_v9, 4  ;;  %v821_v25 = vpop.f32.mrf.mxu0  ;;  %v3927_v60 = vsel %vm5829_vm6, %v4845_v44, %v3926_v9  ;;  %v3929_v57 = vrot.slane %v6844_v41, 5  ;;  %v4837_v14 = vrot.slane %v4821_v35, 9  ;;  %v4819_v35 = vld [vmem:[%s5520_s7 + $0x30] sm:$0xe] }
 0x141   : > { %5074 = vmatmul.mubr.msk.bf16.vlgmr.msra.gmra.mxu1 %vm720_vm0, %v6818_v27  ;;  %v7138_v4 = vsel %vm5829_vm6, %v3879_v48, %v3880_v13  ;;  %v7144_v8 = vadd.f32 %v7029_v42, %v821_v25  ;;  %v3870_v27 = vrot.slane %v6852_v15, 5  ;;  %v3873_v54 = vrot.slane %v6867_v26, 5  ;;  %v7183_v13 = vld [vmem:[%s7696_s1 + $0xf0] sm:$0xff]  }
 0x142   : > { %5113 = vmatpush3.bf16.xpose.msra.mxu1 %v4063_v56  ;;  %v4866_v43 = vcombine.low %v7119_v31, %v7138_v4  ;;  %5075 = vmatprep.mubr.msk.bf16.mxu1 %vm720_vm0, %v7111_v63  ;;  %v3930_v41 = vsel %vm5829_vm6, %v3928_v49, %v3929_v57  ;;  %v4844_v42 = vrot.slane %v4828_v62, 9  ;;  %v3919_v46 = vrot.slane %v6880_v28, 5  ;;  %v825_v10 = vpop.f32.mrf.mxu0 }
 0x143   : > { %5188 = vmatprep.subr.msk.bf16.mxu1 %vm720_vm0, %v4875_v3  ;;  %5050 = vmatmul.mubr.msk.bf16.vlgmr.msra.gmra.mxu0 %vm720_vm0, %v6937_v21  ;;  %v3922_v19 = vrot.slane %v6887_v32, 5  ;;  %v4060_v15 = vsel %vm720_vm0, %v4867_v33, 0  ;;  %v7166_v26 = vcombine.low %v3927_v60, %v3930_v41  ;;  %v7170_v21 = vsel %vm5829_vm6, %v4837_v14, %v3870_v27  ;;  %v7196_v33 = vpop.f32.mrf.mxu1 }
 0x144   : > { %5082 = vmatpush3.bf16.xpose.msra.mxu0 %v4063_v56  ;;  %5051 = vmatprep.mubr.msk.bf16.mxu0 %vm720_vm0, %v7129_v7  ;;  %v3872_v28 = vrot.slane %v3870_v27, 4  ;;  %v3920_v32 = vsel %vm5829_vm6, %v4844_v42, %v3919_v46  ;;  %v3921_v61 = vrot.slane %v3919_v46, 4  ;;  %v4836_v40 = vrot.slane %v4820_v22, 9  ;;  %v827_v51 = vpop.f32.mrf.mxu0  ;;  %v4826_v27 = vld [vmem:[%s5520_s7 + $0x84] sm:$0xe] }
 0x145   : > { %5187 = vmatprep.subr.msk.bf16.mxu0 %vm720_vm0, %v4875_v3  ;;  %v3863_v56 = vrot.slane %v6898_v39, 5  ;;  %v3866_v50 = vrot.slane %v6906_v17, 5  ;;  %v4843_v44 = vrot.slane %v4827_v5, 9  ;;  %v3912_v9 = vrot.slane %v6920_v6, 5  ;;  %v7201_v17 = vld [vmem:[%s7696_s1 + $0xd0] sm:$0xff]  }
 0x146   : > { %v7178_v29 = vsel %vm5829_vm6, %v3872_v28, %v3873_v54  ;;  %v3923_v3 = vsel %vm5829_vm6, %v3921_v61, %v3922_v19  ;;  %v829_v48 = vpop.f32.mrf.mxu0  ;;  %v3915_v25 = vrot.slane %v6927_v55, 5  ;;  %v4835_v57 = vrot.slane %v4819_v35, 9  ;;  %v4818_v42 = vld [vmem:[%s5520_s7 + $0x24] sm:$0xe]  ;;  %v5340_v35 = vld [vmem:[%s7696_s1 + $0xd8] sm:$0xff]  }
 0x147   : > { %v4865_v39 = vcombine.low %v7170_v21, %v7178_v29  ;;  %v7194_v34 = vsel %vm5829_vm6, %v4836_v40, %v3863_v56  ;;  %v3865_v38 = vrot.slane %v3863_v56, 4  ;;  %v7203_v6 = vcombine.low %v3920_v32, %v3923_v3  ;;  %v4179_v29 = vld [vmem:[%s7697_s2 + $0x8] sm:$0xff] }
 0x148   : > { %v3913_v49 = vsel %vm5829_vm6, %v4843_v44, %v3912_v9  ;;  %v3914_v62 = vrot.slane %v3912_v9, 4  ;;  %v3856_v14 = vrot.slane %v6942_v52, 5  ;;  %v831_v54 = vpop.f32.mrf.mxu0  ;;  %v7224_v41 = vadd.f32 %v7036_v58, %v825_v10  ;;  %v1078_v58 = vpop.f32.mrf.mxu1  ;;  %v4817_v44 = vld [vmem:[%s5520_s7 + $0x18] sm:$0xe] }
 0x149   : > { %5076 = vmatmul.mubr.msk.bf16.gmra.mxu1 %vm720_vm0, %v7111_v63  ;;  %v7212_v60 = vsel %vm5829_vm6, %v3865_v38, %v3866_v50  ;;  %v3859_v63 = vrot.slane %v6951_v20, 5  ;;  %v7238_v5 = vadd.f32 %v7045_v53, %v827_v51  ;;  %v4057_v10 = vsel %vm720_vm0, %v4866_v43, 0 }
 0x14a   : > { %5114 = vmatpush3.bf16.xpose.msra.mxu1 %v4060_v15  ;;  %5077 = vmatprep.mubr.msk.bf16.mxu1 %vm720_vm0, %v7183_v13  ;;  %v4864_v22 = vcombine.low %v7194_v34, %v7212_v60  ;;  %v3916_v55 = vsel %vm5829_vm6, %v3914_v62, %v3915_v25  ;;  %v7235_v46 = vsel %vm5829_vm6, %v4835_v57, %v3856_v14  ;;  %v3858_v19 = vrot.slane %v3856_v14, 4  ;;  %v835_v20 = vpop.f32.mrf.mxu0  ;;  %v1080_v9 = vpop.f32.mrf.mxu1  ;;  %v4185_v34 = vld [vmem:[%s7697_s2 + $0x38] sm:$0xff]  ;;  %v7718_v60 = vld [vmem:[#allocation5_spill] sm:$0xff] }
 0x14b   : > { %5190 = vmatprep.subr.msk.bf16.mxu1 %vm720_vm0, %v7131_v2  ;;  %5052 = vmatmul.mubr.msk.bf16.gmra.mxu0 %vm720_vm0, %v7129_v7  ;;  %v7231_v52 = vcombine.low %v3913_v49, %v3916_v55  ;;  %v7247_v7 = vadd.f32 %v7051_v59, %v829_v48  ;;  %v4842_v28 = vrot.slane %v4826_v27, 9  ;;  %v3905_v32 = vrot.slane %v6963_v11, 5  ;;  %v5341_v59 = vld [vmem:[%s7696_s1 + $0xf8] sm:$0xff]  }
 0x14c   : > { %5084 = vmatpush3.bf16.xpose.msra.mxu0 %v4060_v15  ;;  %5053 = vmatprep.mubr.msk.bf16.mxu0 %vm720_vm0, %v7201_v17  ;;  %v7254_v53 = vsel %vm5829_vm6, %v3858_v19, %v3859_v63  ;;  %v3908_v31 = vrot.slane %v6967_v1, 5  ;;  %v4834_v4 = vrot.slane %v4818_v42, 9  ;;  %v3849_v43 = vrot.slane %v6979_v37, 5  ;;  %v837_v15 = vpop.f32.mrf.mxu0  ;;  %v1082_v14 = vpop.f32.mrf.mxu1  ;;  %v7332_v19 = vld [vmem:[%s7696_s1 + $0x110] sm:$0xff]  }
 0x14d   : > { %5189 = vmatprep.subr.msk.bf16.mxu0 %vm720_vm0, %v7131_v2  ;;  %v4863_v11 = vcombine.low %v7235_v46, %v7254_v53  ;;  %v3906_v2 = vsel %vm5829_vm6, %v4842_v28, %v3905_v32  ;;  %v3907_v61 = vrot.slane %v3905_v32, 4  ;;  %v3852_v40 = vrot.slane %v6986_v16, 5 }
 0x14e   : > { %v7268_v1 = vsel %vm5829_vm6, %v4834_v4, %v3849_v43  ;;  %v3851_v56 = vrot.slane %v3849_v43, 4  ;;  %v7271_v37 = vadd.f32 %v7072_v47, %v831_v54  ;;  %v7274_v51 = vadd.f32 %v7089_v12, %v835_v20  ;;  %v839_v50 = vpop.f32.mrf.mxu0  ;;  %v1084_v28 = vpop.f32.mrf.mxu1  ;;  %v4182_v43 = vld [vmem:[%s7697_s2 + $0x20] sm:$0xff] }
 0x14f   : > { %v3909_v16 = vsel %vm5829_vm6, %v3907_v61, %v3908_v31  ;;  %v7283_v3 = vadd.f32 %v7121_v36, %v837_v15  ;;  %v7286_v38 = vadd.f32 %v7161_v30, %v839_v50  ;;  %v4833_v49 = vrot.slane %v4817_v44, 9  ;;  %v7345_v31 = vld [vmem:[%s7696_s1 + $0x100] sm:$0xff]   ;;  %v7719_v44 = vld [vmem:[#allocation6_spill] sm:$0xff] }
 0x150   : > { %v7290_v47 = vcombine.low %v3906_v2, %v3909_v16  ;;  %v7294_v12 = vsel %vm5829_vm6, %v3851_v56, %v3852_v40  ;;  %v841_v48 = vpop.f32.mrf.mxu0  ;;  %v3842_v30 = vrot.slane %v7016_v24, 5  ;;  %v5425_v20 = vmov 0   ;;  %v4825_v2 = vld [vmem:[%s5520_s7 + $0x78] sm:$0xe] }
 0x151   : > { %5078 = vmatmul.mubr.msk.bf16.gmra.mxu1 %vm720_vm0, %v7183_v13  ;;  %v4862_v36 = vcombine.low %v7268_v1, %v7294_v12  ;;  %v7717_v13 = vld [vmem:[#allocation7_spill] sm:$0xff]  ;;  %v7306_v25 = vadd.f32 %v7196_v33, %v841_v48  ;;  %5260 = vset.pattern.permute.xlu0 %v5425_v20  ;;  %v4051_v15 = vsel %vm720_vm0, %v4864_v22, 0  ;;  %v3898_v22 = vrot.slane %v7718_v60, 5 }
 0x152   : > { %5115 = vmatpush3.bf16.xpose.msra.mxu1 %v4057_v10  ;;  %5079 = vmatprep.mubr.msk.bf16.mxu1 %vm720_vm0, %v5341_v59  ;;  %v3845_v62 = vrot.slane %v7717_v13, 5  ;;  %v845_v57 = vpop.f32.mrf.mxu0  ;;  %v7311_v27 = vsel %vm5829_vm6, %v4833_v49, %v3842_v30  ;;  %v3844_v24 = vrot.slane %v3842_v30, 4  ;;  %v4180_v33 = vld [vmem:[%s7697_s2 + $0x10] sm:$0xff]  ;;  %v4048_v61 = vsel %vm720_vm0, %v4863_v11, 0 }
 0x153   : > { %5192 = vmatprep.subr.msk.bf16.mxu1 %vm720_vm0, %v7166_v26  ;;  %5054 = vmatmul.mubr.msk.bf16.gmra.mxu0 %vm720_vm0, %v7201_v17  ;;  %v7313_v54 = vadd.f32 %v1078_v58, %v845_v57  ;;  %v4178_v17 = vld [vmem:[%s7697_s2] sm:$0xff]  ;;  %v4841_v56 = vrot.slane %v4825_v2, 9  ;;  %v3900_v50 = vrot.slane %v3898_v22, 4  ;;  %v4045_v11 = vsel %vm720_vm0, %v4862_v36, 0  ;;  %v5343_v57 = vld [vmem:[%s7696_s1 + $0x118] sm:$0xff]  }
 0x154   : > { %5086 = vmatpush3.bf16.xpose.msra.mxu0 %v4057_v10  ;;  %5055 = vmatprep.mubr.msk.bf16.mxu0 %vm720_vm0, %v5340_v35  ;;  %v847_v55 = vpop.f32.mrf.mxu0  ;;  %v7325_v63 = vsel %vm5829_vm6, %v3844_v24, %v3845_v62 }
 0x155   : > { %5191 = vmatprep.subr.msk.bf16.mxu0 %vm720_vm0, %v7166_v26  ;;  %v7327_v42 = vadd.f32 %v1080_v9, %v847_v55  ;;  %5261 = vset.pattern.permute.xlu1 %v5425_v20  ;;  %v4054_v26 = vsel %vm720_vm0, %v4865_v39, 0  ;;  %v4861_v58 = vcombine.low %v7311_v27, %v7325_v63  ;;  %v4181_v39 = vld [vmem:[%s7697_s2 + $0x18] sm:$0xff]  ;;  %v3901_v9 = vrot.slane %v7719_v44, 5 }
 0x156   : > { %v849_v10 = vpop.f32.mrf.mxu0  ;;  %4188 = vperm.xlu0 %5260, %v4178_v17   ;;  %4198 = vperm.xlu1 %5261, %v4180_v33   ;;  %v5345_v33 = vld [vmem:[%s7696_s1 + $0x108] sm:$0xff]  }
 0x157   : > { %v7340_v32 = vadd.f32 %v1082_v14, %v849_v10  ;;  %v3902_v46 = vsel %vm5829_vm6, %v3900_v50, %v3901_v9  ;;  %v4042_v13 = vsel %vm720_vm0, %v4861_v58, 0 }
 0x158   : > { %v851_v4 = vpop.f32.mrf.mxu0 }
 0x159   : > { %5080 = vmatmul.mubr.msk.bf16.gmra.mxu1 %vm720_vm0, %v5341_v59  ;;  %v7350_v21 = vadd.f32 %v1084_v28, %v851_v4  ;;  %v4183_v59 = vld [vmem:[%s7697_s2 + $0x28] sm:$0xff] }
 0x15a   : > { %5116 = vmatpush3.bf16.xpose.msra.mxu1 %v4054_v26  ;;  %5101 = vmatprep.mubr.msk.bf16.mxu1 %vm720_vm0, %v7332_v19 }
 0x15b   : > { %5194 = vmatprep.subr.msk.bf16.mxu1 %vm720_vm0, %v7203_v6  ;;  %5056 = vmatmul.mubr.msk.bf16.gmra.mxu0 %vm720_vm0, %v5340_v35 }
 0x15c   : > { %5088 = vmatpush3.bf16.xpose.msra.mxu0 %v4054_v26  ;;  %5097 = vmatprep.mubr.msk.bf16.mxu0 %vm720_vm0, %v7345_v31 }
 0x15d   : > { %5193 = vmatprep.subr.msk.bf16.mxu0 %vm720_vm0, %v7203_v6  ;;  %4193 = vperm.xlu0 %5260, %v4179_v29   ;;  %v4184_v6 = vld [vmem:[%s7697_s2 + $0x30] sm:$0xff] }
 0x15e   : > { %4203 = vperm.xlu1 %5261, %v4181_v39  }
 0x161   : > { %4208 = vperm.xlu0 %5260, %v4182_v43  }
 0x162   : > { %5117 = vmatpush3.bf16.xpose.msra.mxu1 %v4051_v15  ;;  %4213 = vperm.xlu1 %5261, %v4183_v59  }
 0x163   : > { %5196 = vmatprep.subr.msk.bf16.mxu1 %vm720_vm0, %v7231_v52 }
 0x164   : > { %5090 = vmatpush3.bf16.xpose.msra.mxu0 %v4051_v15 }
 0x165   : > { %5195 = vmatprep.subr.msk.bf16.mxu0 %vm720_vm0, %v7231_v52  ;;  %4218 = vperm.xlu0 %5260, %v4184_v6   ;;  %v3899_v52 = vsel %vm5829_vm6, %v4841_v56, %v3898_v22 }
 0x166   : > { %4223 = vperm.xlu1 %5261, %v4185_v34   ;;  %v1712_v40 = vpop.f32.mrf.mxu1  ;;  %v4869_v48 = vcombine.low %v3899_v52, %v3902_v46 }
 0x168   : > { %v1714_v35 = vpop.f32.mrf.mxu1 }
 0x16a   : > { %5118 = vmatpush3.bf16.xpose.msra.mxu1 %v4048_v61  ;;  %v1716_v16 = vpop.f32.mrf.mxu1 }
 0x16b   : > { %5198 = vmatprep.subr.msk.bf16.mxu1 %vm720_vm0, %v7290_v47 }
 0x16c   : > { %5092 = vmatpush3.bf16.xpose.msra.mxu0 %v4048_v61  ;;  %v1718_v53 = vpop.f32.mrf.mxu1 }
 0x16d   : > { %5197 = vmatprep.subr.msk.bf16.mxu0 %vm720_vm0, %v7290_v47 }
 0x16e   : > { %v1722_v49 = vpop.f32.mrf.mxu1 }
 0x170   : > { %v1724_v30 = vpop.f32.mrf.mxu1 }
 0x172   : > { %5119 = vmatpush3.bf16.xpose.msra.mxu1 %v4045_v11  ;;  %v1726_v23 = vpop.f32.mrf.mxu1 }
 0x173   : > { %5200 = vmatprep.subr.msk.bf16.mxu1 %vm720_vm0, %v4869_v48 }
 0x174   : > { %5094 = vmatpush3.bf16.xpose.msra.mxu0 %v4045_v11  ;;  %v1728_v62 = vpop.f32.mrf.mxu1 }
 0x175   : > { %5199 = vmatprep.subr.msk.bf16.mxu0 %vm720_vm0, %v4869_v48 }
 0x176   : > { %v1732_v36 = vpop.f32.mrf.mxu1 }
 0x178   : > { %v1734_v63 = vpop.f32.mrf.mxu1 }
 0x17a   : > { %5120 = vmatpush3.bf16.xpose.msra.mxu1 %v4042_v13  ;;  %v1421_v47 = vpop.f32.mrf.mxu0 }
 0x17b   : > { %v1460_v1 = vadd.f32 %v1421_v47, %v7094_v0 }
 0x17c   : > { %5096 = vmatpush3.bf16.xpose.msra.mxu0 %v4042_v13  ;;  %v1423_v12 = vpop.f32.mrf.mxu0 }
 0x17d   : > { %v1461_v14 = vadd.f32 %v1423_v12, %v7106_v45  ;;  %v7412_v27 = vadd.f32 %v1712_v40, %v1460_v1 }
 0x17e   : > { %v1425_v24 = vpop.f32.mrf.mxu0 }
 0x17f   : > { %v1462_v17 = vadd.f32 %v1425_v24, %v7124_v18  ;;  %v7418_v55 = vadd.f32 %v1714_v35, %v1461_v14 }
 0x180   : > { %v1427_v0 = vpop.f32.mrf.mxu0 }
 0x181   : > { %5102 = vmatmul.mubr.msk.bf16.vlgmr.msra.gmra.mxu1 %vm720_vm0, %v7332_v19  ;;  %v1463_v45 = vadd.f32 %v1427_v0, %v7144_v8  ;;  %v7424_v20 = vadd.f32 %v1716_v16, %v1462_v17  ;;  %v1736_v19 = vpop.f32.mrf.mxu1 }
 0x182   : > { %5103 = vmatprep.mubr.msk.bf16.mxu1 %vm720_vm0, %v5343_v57  ;;  %v1431_v18 = vpop.f32.mrf.mxu0 }
 0x183   : > { %5098 = vmatmul.mubr.msk.bf16.vlgmr.msra.gmra.mxu0 %vm720_vm0, %v7345_v31  ;;  %v1464_v26 = vadd.f32 %v1431_v18, %v7224_v41  ;;  %v7430_v58 = vadd.f32 %v1718_v53, %v1463_v45  ;;  %v1738_v43 = vpop.f32.mrf.mxu1 }
 0x184   : > { %5099 = vmatprep.mubr.msk.bf16.mxu0 %vm720_vm0, %v5345_v33  ;;  %v1433_v10 = vpop.f32.mrf.mxu0 }
 0x185   : > { %v1465_v28 = vadd.f32 %v1433_v10, %v7238_v5  ;;  %v7433_v4 = vadd.f32 %v1722_v49, %v1464_v26  ;;  %v1742_v60 = vpop.f32.mrf.mxu1 }
 0x186   : > { %v1435_v29 = vpop.f32.mrf.mxu0 }
 0x187   : > { %v1466_v8 = vadd.f32 %v1435_v29, %v7247_v7  ;;  %v7436_v39 = vadd.f32 %v1724_v30, %v1465_v28  ;;  %v1744_v56 = vpop.f32.mrf.mxu1 }
 0x188   : > { %v1437_v31 = vpop.f32.mrf.mxu0 }
 0x189   : > { %5104 = vmatmul.mubr.msk.bf16.gmra.mxu1 %vm720_vm0, %v5343_v57  ;;  %v1467_v15 = vadd.f32 %v1437_v31, %v7271_v37  ;;  %v7440_v41 = vadd.f32 %v1726_v23, %v1466_v8 }
 0x18a   : > { %v1441_v59 = vpop.f32.mrf.mxu0 }
 0x18b   : > { %5100 = vmatmul.mubr.msk.bf16.gmra.mxu0 %vm720_vm0, %v5345_v33  ;;  %v1468_v5 = vadd.f32 %v1441_v59, %v7274_v51  ;;  %v7444_v6 = vadd.f32 %v1728_v62, %v1467_v15 }
 0x18c   : > { %v1443_v34 = vpop.f32.mrf.mxu0 }
 0x18d   : > { %v1469_v7 = vadd.f32 %v1443_v34, %v7283_v3  ;;  %v7447_v22 = vadd.f32 %v1732_v36, %v1468_v5  ;;  %v1746_v3 = vpop.f32.mrf.mxu1 }
 0x18e   : > { %v1445_v2 = vpop.f32.mrf.mxu0 }
 0x18f   : > { %v1470_v61 = vadd.f32 %v1445_v2, %v7286_v38  ;;  %v7450_v40 = vadd.f32 %v1734_v63, %v1469_v7 }
 0x190   : > { %v1447_v37 = vpop.f32.mrf.mxu0 }
 0x191   : > { %v1471_v50 = vadd.f32 %v1447_v37, %v7306_v25  ;;  %v7453_v44 = vadd.f32 %v1736_v19, %v1470_v61  ;;  %v1748_v25 = vpop.f32.mrf.mxu1 }
 0x192   : > { %v1451_v51 = vpop.f32.mrf.mxu0 }
 0x193   : > { %v1472_v9 = vadd.f32 %v1451_v51, %v7313_v54  ;;  %v7456_v35 = vadd.f32 %v1738_v43, %v1471_v50 }
 0x194   : > { %v1453_v16 = vpop.f32.mrf.mxu0 }
 0x195   : > { %v1473_v52 = vadd.f32 %v1453_v16, %v7327_v42  ;;  %v7459_v46 = vadd.f32 %v1742_v60, %v1472_v9 }
 0x196   : > { %v1455_v38 = vpop.f32.mrf.mxu0 }
 0x197   : > { %v1474_v53 = vadd.f32 %v1455_v38, %v7340_v32  ;;  %v7462_v11 = vadd.f32 %v1744_v56, %v1473_v52 }
 0x198   : > { %v1457_v48 = vpop.f32.mrf.mxu0 }
 0x199   : > { %v1475_v49 = vadd.f32 %v1457_v48, %v7350_v21  ;;  %v7465_v30 = vadd.f32 %v1746_v3, %v1474_v53 }
 0x19b   : > { %v7467_v54 = vadd.f32 %v1748_v25, %v1475_v49 }
 0x1aa   : > { %v7469_v13 = vpop.f32.mrf.mxu1 }
 0x1ac   : > { %v7471_v42 = vpop.f32.mrf.mxu1 }
 0x1ae   : > { %v7473_v1 = vpop.f32.mrf.mxu1 }
 0x1b0   : > { %v7475_v12 = vpop.f32.mrf.mxu1 }
 0x1b2   : > { %v7477_v57 = vpop.f32.mrf.mxu1 }
 0x1b4   : > { %v7481_v14 = vpop.f32.mrf.mxu1 }
 0x1b6   : > { %v7485_v17 = vpop.f32.mrf.mxu1 }
 0x1b8   : > { %v7489_v0 = vpop.f32.mrf.mxu1 }
 0x1ba   : > { %v2792_v45 = vpop.f32.mrf.mxu1 }
 0x1bc   : > { %v2794_v26 = vpop.f32.mrf.mxu1 }
 0x1be   : > { %v7491_v19 = vpop.f32.mrf.mxu1 }
 0x1c0   : > { %v7493_v29 = vpop.f32.mrf.mxu1 }
 0x1c2   : > { %v2370_v23 = vpop.f32.mrf.mxu0  ;;  %v7495_v31 = vpop.f32.mrf.mxu1 }
 0x1c3   : > { %7720 = vst [vmem:[#allocation7_spill] sm:$0xff] %v7495_v31 }
 0x1c4   : > { %v2372_v62 = vpop.f32.mrf.mxu0  ;;  %v7497_v15 = vpop.f32.mrf.mxu1 }
 0x1c5   : > { %7721 = vst [vmem:[#allocation5_spill] sm:$0xff] %v7497_v15 }
 0x1c6   : > { %v2374_v47 = vpop.f32.mrf.mxu0  ;;  %v7499_v5 = vpop.f32.mrf.mxu1 }
 0x1c7   : > { %7722 = vst [vmem:[#allocation6_spill] sm:$0xff] %v7499_v5  ;;  %v2411_v5 = vadd.f32 %v2374_v47, %v7424_v20 }
 0x1c8   : > { %v2376_v32 = vpop.f32.mrf.mxu0  ;;  %v7503_v60 = vpop.f32.mrf.mxu1 }
 0x1c9   : > { %7723 = vst [vmem:[#allocation8_spill] sm:$0xff] %v7503_v60 }
 0x1ca   : > { %v2380_v36 = vpop.f32.mrf.mxu0 }
 0x1cc   : > { %v7479_v21 = vpop.f32.mrf.mxu0 }
 0x1cd   : > { %v2414_v20 = vadd.f32 %v7479_v21, %v7436_v39 }
 0x1ce   : > { %v7483_v24 = vpop.f32.mrf.mxu0 }
 0x1d0   : > { %v7487_v33 = vpop.f32.mrf.mxu0 }
 0x1d1   : > { %v7548_v15 = vpop.permute.xlu1 %4198 }
 0x1d2   : > { %v2390_v63 = vpop.f32.mrf.mxu0 }
 0x1d4   : > { %v2392_v18 = vpop.f32.mrf.mxu0 }
 0x1d6   : > { %v2394_v10 = vpop.f32.mrf.mxu0 }
 0x1d8   : > { %v2396_v28 = vpop.f32.mrf.mxu0 }
 0x1da   : > { %v2400_v8 = vpop.f32.mrf.mxu0 }
 0x1db   : > { %v2421_v39 = vadd.f32 %v2400_v8, %v7459_v46 }
 0x1dc   : > { %v2402_v43 = vpop.f32.mrf.mxu0 }
 0x1de   : > { %v2404_v59 = vpop.f32.mrf.mxu0 }
 0x1e0   : > { %v7501_v34 = vpop.f32.mrf.mxu0 }
 0x1e1   : > { %v2424_v46 = vadd.f32 %v7501_v34, %v7467_v54 }
 0x201   : > { %v7505_v7 = vpop.f32.mrf.mxu1 }
 0x202   : > { %7724 = vst [vmem:[#allocation9_spill] sm:$0xff] %v7505_v7 }
 0x203   : > { %v3063_v2 = vpop.f32.mrf.mxu0  ;;  %v7507_v61 = vpop.f32.mrf.mxu1 }
 0x204   : > { %7725 = vst [vmem:[#allocation10_spill] sm:$0xff] %v7507_v61 }
 0x205   : > { %v3065_v37 = vpop.f32.mrf.mxu0  ;;  %v7509_v56 = vpop.f32.mrf.mxu1 }
 0x206   : > { %7726 = vst [vmem:[#allocation11_spill] sm:$0xff] %v7509_v56 }
 0x207   : > { %v7511_v50 = vpop.f32.mrf.mxu0  ;;  %v7513_v51 = vpop.f32.mrf.mxu1 }
 0x208   : > { %7727 = vst [vmem:[#allocation12_spill] sm:$0xff] %v7511_v50  ;;  %7728 = vst [vmem:[#allocation13_spill] sm:$0xff] %v7513_v51 }
 0x209   : > { %v7515_v9 = vpop.f32.mrf.mxu0  ;;  %v7517_v16 = vpop.f32.mrf.mxu1 }
 0x20a   : > { %7729 = vst [vmem:[#allocation14_spill] sm:$0xff] %v7515_v9  ;;  %7730 = vst [vmem:[#allocation15_spill] sm:$0xff] %v7517_v16 }
 0x20b   : > { %v7519_v3 = vpop.f32.mrf.mxu0  ;;  %v7521_v52 = vpop.f32.mrf.mxu1 }
 0x20c   : > { %7731 = vst [vmem:[#allocation16_spill] sm:$0xff] %v7519_v3  ;;  %7732 = vst [vmem:[#allocation17_spill] sm:$0xff] %v7521_v52 }
 0x20d   : > { %v7523_v38 = vpop.f32.mrf.mxu0  ;;  %v7525_v53 = vpop.f32.mrf.mxu1 }
 0x20e   : > { %7733 = vst [vmem:[#allocation18_spill] sm:$0xff] %v7523_v38  ;;  %7734 = vst [vmem:[#allocation19_spill] sm:$0xff] %v7525_v53  ;;  %v7539_v38 = vpop.permute.xlu0 %4188 }
 0x20f   : > { %v7527_v48 = vpop.f32.mrf.mxu0  ;;  %v7529_v25 = vpop.f32.mrf.mxu1  ;;  %7741 = vst [vmem:[#allocation26_spill] sm:$0xff] %v7539_v38 }
 0x210   : > { %7735 = vst [vmem:[#allocation20_spill] sm:$0xff] %v7527_v48  ;;  %7736 = vst [vmem:[#allocation21_spill] sm:$0xff] %v7529_v25  ;;  %v2409_v48 = vadd.f32 %v2370_v23, %v7412_v27  ;;  %v2417_v25 = vadd.f32 %v2390_v63, %v7447_v22  ;;  %v2419_v27 = vadd.f32 %v2394_v10, %v7453_v44  ;;  %v7742_v10 = vld [vmem:[#allocation7_spill] sm:$0xff] }
 0x211   : > { %v7531_v49 = vpop.f32.mrf.mxu0  ;;  %v3741_v56 = vpop.f32.mrf.mxu1  ;;  %v2416_v44 = vadd.f32 %v7487_v33, %v7444_v6  ;;  %v2816_v33 = vadd.f32 %v7481_v14, %v2414_v20  ;;  %v2823_v14 = vadd.f32 %v7742_v10, %v2421_v39 }
 0x212   : > { %7737 = vst [vmem:[#allocation22_spill] sm:$0xff] %v7531_v49  ;;  %v2410_v49 = vadd.f32 %v2372_v62, %v7418_v55  ;;  %v2819_v31 = vadd.f32 %v2792_v45, %v2417_v25  ;;  %v2811_v22 = vadd.f32 %v7469_v13, %v2409_v48  ;;  %v7554_v55 = vpop.permute.xlu0 %4193  ;;  %v7574_v6 = vpop.permute.xlu1 %4203 }
 0x213   : > { %v3083_v51 = vpop.f32.mrf.mxu0  ;;  %v3743_v61 = vpop.f32.mrf.mxu1  ;;  %v7584_v45 = vadd.f32 %v7489_v0, %v2416_v44  ;;  %v7746_v0 = vld [vmem:[#allocation9_spill] sm:$0xff] }
 0x214   : > { %v2812_v23 = vadd.f32 %v7471_v42, %v2410_v49  ;;  %v3110_v47 = vadd.f32 %v3083_v51, %v2819_v31  ;;  %v3102_v21 = vadd.f32 %v3063_v2, %v2811_v22 }
 0x215   : > { %v3085_v9 = vpop.f32.mrf.mxu0  ;;  %v7533_v60 = vpop.f32.mrf.mxu1 }
 0x216   : > { %7738 = vst [vmem:[#allocation23_spill] sm:$0xff] %v7533_v60  ;;  %v2418_v60 = vadd.f32 %v2392_v18, %v7450_v40  ;;  %v2420_v40 = vadd.f32 %v2396_v28, %v7456_v35  ;;  %v2422_v35 = vadd.f32 %v2402_v43, %v7462_v11  ;;  %v3103_v11 = vadd.f32 %v3065_v37, %v2812_v23  ;;  %v7748_v37 = vld [vmem:[#allocation14_spill] sm:$0xff]  ;;  %v4214_v22 = vpop.permute.xlu1 %4213 }
 0x217   : > { %v3087_v16 = vpop.f32.mrf.mxu0  ;;  %v7535_v3 = vpop.f32.mrf.mxu1 }
 0x218   : > { %7739 = vst [vmem:[#allocation24_spill] sm:$0xff] %v7535_v3  ;;  %v2412_v3 = vadd.f32 %v2376_v32, %v7430_v58  ;;  %v2813_v58 = vadd.f32 %v7473_v1, %v2411_v5  ;;  %v2820_v13 = vadd.f32 %v2794_v26, %v2418_v60  ;;  %v2821_v1 = vadd.f32 %v7491_v19, %v2419_v27  ;;  %v4209_v26 = vpop.permute.xlu0 %4208  ;;  %v7743_v19 = vld [vmem:[#allocation5_spill] sm:$0xff] }
 0x219   : > { %v3089_v52 = vpop.f32.mrf.mxu0  ;;  %v7537_v7 = vpop.f32.mrf.mxu1  ;;  %v2824_v28 = vadd.f32 %v7743_v19, %v2422_v35  ;;  %v3760_v60 = vadd.f32 %v7746_v0, %v3102_v21  ;;  %v7755_v21 = vld [vmem:[#allocation18_spill] sm:$0xff] }
 0x21a   : > { %7740 = vst [vmem:[#allocation25_spill] sm:$0xff] %v7537_v7  ;;  %v2413_v7 = vadd.f32 %v2380_v36, %v7433_v4  ;;  %v2415_v4 = vadd.f32 %v7483_v24, %v7440_v41  ;;  %v2814_v42 = vadd.f32 %v7475_v12, %v2412_v3  ;;  %v2423_v41 = vadd.f32 %v2404_v59, %v7465_v30  ;;  %v7745_v59 = vld [vmem:[#allocation6_spill] sm:$0xff] }
 0x21b   : > { %v3093_v53 = vpop.f32.mrf.mxu0  ;;  %v7545_v50 = vpop.f32.mrf.mxu1  ;;  %v3111_v24 = vadd.f32 %v3085_v9, %v2820_v13  ;;  %v3768_v30 = vadd.f32 %v3741_v56, %v3110_v47  ;;  %v3112_v18 = vadd.f32 %v3087_v16, %v2821_v1  ;;  %v7749_v3 = vld [vmem:[#allocation10_spill] sm:$0xff]  ;;  %v7753_v47 = vld [vmem:[#allocation11_spill] sm:$0xff] }
 0x21c   : > { %v2815_v32 = vadd.f32 %v7477_v57, %v2413_v7  ;;  %v2822_v57 = vadd.f32 %v7493_v29, %v2420_v40  ;;  %v2817_v63 = vadd.f32 %v7485_v17, %v2415_v4  ;;  %v7744_v29 = vld [vmem:[#allocation12_spill] sm:$0xff]  ;;  %v2825_v5 = vadd.f32 %v7745_v59, %v2423_v41 }
 0x21d   : > { %v3095_v38 = vpop.f32.mrf.mxu0  ;;  %v7561_v62 = vpop.f32.mrf.mxu1  ;;  %v3104_v8 = vadd.f32 %v7744_v29, %v2813_v58  ;;  %v3769_v17 = vadd.f32 %v3743_v61, %v3111_v24  ;;  %v7747_v7 = vld [vmem:[#allocation8_spill] sm:$0xff]  ;;  %v3105_v56 = vadd.f32 %v7748_v37, %v2814_v42  ;;  %v3114_v51 = vadd.f32 %v3093_v53, %v2823_v14  ;;  %v7750_v25 = vld [vmem:[#allocation23_spill] sm:$0xff]  ;;  %v7754_v42 = vld [vmem:[#allocation26_spill] sm:$0xff] }
 0x21e   : > { %v3113_v54 = vadd.f32 %v3089_v52, %v2822_v57  ;;  %v2826_v2 = vadd.f32 %v7747_v7, %v2424_v46  ;;  %v3761_v48 = vadd.f32 %v7749_v3, %v3103_v11  ;;  %v3770_v49 = vadd.f32 %v7750_v25, %v3112_v18  ;;  %v7751_v40 = vld [vmem:[#allocation16_spill] sm:$0xff]  ;;  %v7758_v29 = vld [vmem:[#allocation15_spill] sm:$0xff]  ;;  %v7760_v7 = vld [vmem:[#allocation17_spill] sm:$0xff] }
 0x21f   : > { %v3097_v36 = vpop.f32.mrf.mxu0  ;;  %v7580_v12 = vpop.f32.mrf.mxu1  ;;  %v3106_v61 = vadd.f32 %v7751_v40, %v2815_v32  ;;  %v7752_v23 = vld [vmem:[#allocation24_spill] sm:$0xff]  ;;  %v3115_v4 = vadd.f32 %v3095_v38, %v2824_v28  ;;  %v3762_v39 = vadd.f32 %v7753_v47, %v3104_v8  ;;  %v3107_v32 = vadd.f32 %v7755_v21, %v2816_v33  ;;  %v7762_v25 = vld [vmem:[#allocation19_spill] sm:$0xff] }
 0x220   : > { %v3771_v58 = vadd.f32 %v7752_v23, %v3113_v54  ;;  %v3116_v38 = vadd.f32 %v3097_v36, %v2825_v5  ;;  %v7759_v33 = vld [vmem:[#allocation20_spill] sm:$0xff] }
 0x221   : > { %v3099_v31 = vpop.f32.mrf.mxu0  ;;  %v7756_v24 = vld [vmem:[#allocation25_spill] sm:$0xff]  ;;  %v3764_v8 = vadd.f32 %v7758_v29, %v3106_v61  ;;  %v3108_v54 = vadd.f32 %v7759_v33, %v2817_v63  ;;  %v3773_v36 = vadd.f32 %v7545_v50, %v3115_v4  ;;  %v3765_v37 = vadd.f32 %v7760_v7, %v3107_v32 }
 0x222   : > { %v3772_v57 = vadd.f32 %v7756_v24, %v3114_v51  ;;  %v3774_v51 = vadd.f32 %v7561_v62, %v3116_v38 }
 0x241   : > { %v4143_v43 = vpop.f32.mrf.mxu1 }
 0x242   : > { %v4170_v34 = vadd.f32 %v4143_v43, %v3768_v30  ;;  %v7757_v30 = vld [vmem:[#allocation13_spill] sm:$0xff]  ;;  %v3117_v43 = vadd.f32 %v3099_v31, %v2826_v2 }
 0x243   : > { %v4145_v9 = vpop.f32.mrf.mxu1  ;;  %v4123_v16 = vpop.f32.mrf.mxu0  ;;  %v3763_v18 = vadd.f32 %v7757_v30, %v3105_v56  ;;  %v7761_v56 = vld [vmem:[#allocation22_spill] sm:$0xff] }
 0x244   : > { %v4234_v52 = vadd.f32 %v4209_v26, %v4170_v34  ;;  %v4171_v27 = vadd.f32 %v4145_v9, %v3769_v17  ;;  %v4162_v20 = vadd.f32 %v4123_v16, %v3760_v60  ;;  %v3109_v63 = vadd.f32 %v7761_v56, %v7584_v45  ;;  %v4224_v16 = vpop.permute.xlu1 %4223 }
 0x245   : > { %v4147_v44 = vpop.f32.mrf.mxu1  ;;  %v4125_v13 = vpop.f32.mrf.mxu0 }
 0x246   : > { %4250 = vst [vmem:[%s7600_s23 + $0x40] sm:$0xff] %v4234_v52  ;;  %v4235_v53 = vadd.f32 %v4209_v26, %v4171_v27  ;;  %v4172_v35 = vadd.f32 %v4147_v44, %v3770_v49  ;;  %v4226_v1 = vadd.f32 %v7754_v42, %v4162_v20  ;;  %v4163_v41 = vadd.f32 %v4125_v13, %v3761_v48  ;;  %v4219_v26 = vpop.permute.xlu0 %4218 }
 0x247   : > { %v4149_v46 = vpop.f32.mrf.mxu1  ;;  %v4127_v11 = vpop.f32.mrf.mxu0  ;;  %v3766_v49 = vadd.f32 %v7762_v25, %v3108_v54  ;;  %v3775_v52 = vadd.f32 %v7580_v12, %v3117_v43 }
 0x248   : > { %4251 = vst [vmem:[%s7600_s23 + $0x48] sm:$0xff] %v4235_v53  ;;  %v4236_v10 = vadd.f32 %v4214_v22, %v4172_v35  ;;  %v4173_v14 = vadd.f32 %v4149_v46, %v3771_v58  ;;  %4242 = vst [vmem:[%s7600_s23] sm:$0xff] %v4226_v1  ;;  %v4227_v19 = vadd.f32 %v7754_v42, %v4163_v41 }
 0x249   : > { %v4164_v28 = vadd.f32 %v4127_v11, %v3762_v39  ;;  %v4153_v59 = vpop.f32.mrf.mxu1  ;;  %v4129_v5 = vpop.f32.mrf.mxu0 }
 0x24a   : > { %4252 = vst [vmem:[%s7600_s23 + $0x50] sm:$0xff] %v4236_v10  ;;  %v4237_v17 = vadd.f32 %v4214_v22, %v4173_v14  ;;  %v4174_v34 = vadd.f32 %v4153_v59, %v3772_v57  ;;  %4243 = vst [vmem:[%s7600_s23 + $0x8] sm:$0xff] %v4227_v19  ;;  %v4165_v60 = vadd.f32 %v4129_v5, %v3763_v18 }
 0x24b   : > { %v4228_v0 = vadd.f32 %v7554_v55, %v4164_v28  ;;  %v4155_v50 = vpop.f32.mrf.mxu1  ;;  %v4133_v31 = vpop.f32.mrf.mxu0 }
 0x24c   : > { %4253 = vst [vmem:[%s7600_s23 + $0x58] sm:$0xff] %v4237_v17  ;;  %v4238_v2 = vadd.f32 %v4219_v26, %v4174_v34  ;;  %v4175_v9 = vadd.f32 %v4155_v50, %v3773_v36  ;;  %v4229_v3 = vadd.f32 %v7554_v55, %v4165_v60  ;;  %v4166_v48 = vadd.f32 %v4133_v31, %v3764_v8  ;;  %v7763_v55 = vld [vmem:[#allocation21_spill] sm:$0xff] }
 0x24d   : > { %4244 = vst [vmem:[%s7600_s23 + $0x10] sm:$0xff] %v4228_v0  ;;  %v4157_v45 = vpop.f32.mrf.mxu1  ;;  %v4135_v27 = vpop.f32.mrf.mxu0  ;;  %v3767_v61 = vadd.f32 %v7763_v55, %v3109_v63 }
 0x24e   : > { %4254 = vst [vmem:[%s7600_s23 + $0x60] sm:$0xff] %v4238_v2  ;;  %v4239_v62 = vadd.f32 %v4219_v26, %v4175_v9  ;;  %v4176_v22 = vadd.f32 %v4157_v45, %v3774_v51  ;;  %4245 = vst [vmem:[%s7600_s23 + $0x18] sm:$0xff] %v4229_v3  ;;  %v4230_v20 = vadd.f32 %v7548_v15, %v4166_v48 }
 0x24f   : > { %v4167_v40 = vadd.f32 %v4135_v27, %v3765_v37  ;;  %v4159_v23 = vpop.f32.mrf.mxu1  ;;  %v4137_v58 = vpop.f32.mrf.mxu0 }
 0x250   : > { %4255 = vst [vmem:[%s7600_s23 + $0x68] sm:$0xff] %v4239_v62  ;;  %v4240_v12 = vadd.f32 %v4224_v16, %v4176_v22  ;;  %v4177_v4 = vadd.f32 %v4159_v23, %v3775_v52  ;;  %4246 = vst [vmem:[%s7600_s23 + $0x20] sm:$0xff] %v4230_v20  ;;  %v4168_v13 = vadd.f32 %v4137_v58, %v3766_v49 }
 0x251   : > { %v4231_v44 = vadd.f32 %v7548_v15, %v4167_v40  ;;  %v4139_v47 = vpop.f32.mrf.mxu0 }
 0x252   : > { %4256 = vst [vmem:[%s7600_s23 + $0x70] sm:$0xff] %v4240_v12  ;;  %v4241_v39 = vadd.f32 %v4224_v16, %v4177_v4  ;;  %v4232_v53 = vadd.f32 %v7574_v6, %v4168_v13  ;;  %v4169_v35 = vadd.f32 %v4139_v47, %v3767_v61 }
 0x253   : > { %4247 = vst [vmem:[%s7600_s23 + $0x28] sm:$0xff] %v4231_v44 }
 0x254   : > { %4257 = vst [vmem:[%s7600_s23 + $0x78] sm:$0xff] %v4241_v39  ;;  %4248 = vst [vmem:[%s7600_s23 + $0x30] sm:$0xff] %v4232_v53  ;;  %v4233_v15 = vadd.f32 %v7574_v6, %v4169_v35 }
 0x256   : > { %4249 = vst [vmem:[%s7600_s23 + $0x38] sm:$0xff] %v4233_v15 }
 0x257   : > { %5360 = shalt.err (!%p5357_p5)
}
 0x258   : > { %s5361_s9 = scalar_lea.hbm %s7640_s30, 2048  ;;  %s5365_s11 = scalar_lea.hbm %s7698_s3, 4096 }
 0x259   : > { %p5362_p6 = scmp.ne.s32.totalorder %s7640_s30, %s5361_s9  ;;  %p5366_p10 = scmp.lt.s32.totalorder %s7640_s30, %s7698_s3 }
 0x25a   : > { %p5367_p11 = scmp.lt.s32.totalorder %s5365_s11, %s5361_s9 }
 0x25b   : > { %p5363_p7 = pnand %p5362_p6, %p5489_p4 }
 0x25c   : > { %p5368_p12 = por %p5367_p11, %p5366_p10 }
 0x25d   : > { %p5364_p9 = pneg %p5363_p7 }
 0x25f   : > { %p5369_p13 = pnand %p5368_p12, %p5364_p9 }
 0x261   : > { %5372 = shalt.err (!%p5369_p13)
}
 0x262   : > { %s5427_s21 = smov 256   ;;  %s5428_s23 = smov 16  }
 0x263   : > { %5202 = dma.vmem_to_hbm [thread:$0]  (%p5489_p4), %s7642_s27, 2048, %s7640_s30, %s7650_s15, %s5427_s21, %s5427_s21, %s5428_s23  }
 0x264 PF: > { %p5208_p0 = scmp.ge.s32.totalorder %s5423_s17, 2  ;;  %s4289_s26 = sand.u32 1, %s5403_s12  }
 0x265   : > { %s4290_s28 = scalar_lea.sflag [#allocation3], %s4289_s26 }
 0x266   : > { %p5205_p1 = pnand %p5208_p0, %p5496_p8 }
 0x268   : > { %p5206_p2 = pneg %p5205_p1 }
 0x26a   : > { %5398 = dma.done.wait (%p5206_p2), %s4290_s28, 2048  }
 0x26b   : > { %5400 = vsyncadd (%p5206_p2), %s4290_s28, 4294965248  ;;  %s16_s17 = sadd.s32 1, %s5423_s17   ;;  %s7764_s12 = smov %s5407_s13 }
 0x26c   : > { %p13_p3 = scmp.ge.s32.totalorder %s16_s17, 4   ;;  %s7765_s13 = smov %s5411_s14 }
 0x26d   : > { %s7766_s14 = smov %s5502_s25  ;;  %s7767_s15 = smov %s5419_s16 }
 0x26e   : > { %s7768_s16 = smov %s7770_s20  ;;  %15 = sbr.rel (!%p13_p3) target bundleno = 4 (0x4), region = 77 }
 0x273   :  { %4295 = vsyncpa [#allocation3], 1 }
 0x274   :  { %4297 = vsyncpa [#allocation3 + $0x1], 1 }

</bundles_post_ra>
